<compile_context>
chip_gen: v6e
topology: v6e:2x2x1
jax: 0.10.0
libtpu: 0.0.40
codegen_flags: <defaults>
</compile_context>

<pallas_src>
import functools

import jax
import jax.numpy as jnp
from jax import lax
from jax.experimental import pallas as pl
from jax.experimental.pallas import tpu as pltpu


# ----------------------------- small helpers --------------------------------
def _round_up(x, m):
    return -(-x // m) * m


def _vmem_capacity_bytes():
    """Per-core VMEM capacity; conservative fallback = v7x (64 MiB)."""
    try:
        info = pltpu.get_tpu_info()
        for name in ("vmem_capacity_bytes", "vmem_bytes", "vmem_size_bytes"):
            v = getattr(info, name, None)
            if v:
                return int(v)
    except Exception:
        pass
    return 64 * 1024 * 1024


def _plan_tiles(B, n_in, n_out, d_in, d_out, shared, batch_tile=None):
    """Pick the batch tile (lane width) and a vmem_limit from the real working set."""
    nod = n_out * d_out
    vmem_cap = _vmem_capacity_bytes()
    w_bytes = 4 * (n_out * d_in * d_out if shared else n_in * nod * d_in)

    # rough f32 bytes live in VMEM per batch lane (double-buffered I/O + loop live set)
    io = 2 * (n_in * d_in + n_in + nod)
    if shared:
        live = n_in * d_in + 2 * n_out * n_in * d_in + 3 * n_out * n_in + 3 * nod
    else:
        live = n_in * d_in + 3 * n_in * nod + 3 * n_in * n_out + 2 * nod
    per_lane = 4 * (io + live)

    budget = max(int(0.55 * vmem_cap) - 2 * w_bytes, 2 * 1024 * 1024)

    if batch_tile is not None:
        tb = int(batch_tile)
    elif B <= 128:
        # single small tile; block lane dim == full (padded) array dim, so it is legal
        tb = _round_up(max(B, 8), 8)
    else:
        fit = max(budget // per_lane, 128)
        tb = max(128, min(512, (fit // 128) * 128))
        tb = min(tb, _round_up(B, 128))
        # keep >= 2 grid steps so a 2-TensorCore chip (v7x) can shard the parallel axis
        if B >= 256 and _round_up(B, tb) // tb < 2:
            tb = max(128, _round_up(-(-B // 2), 128))

    n_tiles = _round_up(B, tb) // tb
    b_pad = n_tiles * tb
    est = per_lane * tb + 2 * w_bytes
    vmem_limit = int(min(0.9 * vmem_cap, max(32 * 1024 * 1024, 2 * est)))
    return tb, n_tiles, b_pad, vmem_limit


def _softmax(logits, axis):
    m = jnp.max(logits, axis=axis, keepdims=True)
    e = jnp.exp(logits - m)
    return e * pl.reciprocal(jnp.sum(e, axis=axis, keepdims=True))


def _squash_scale(sq, eps=6e-8):
    # squash(s) = (|s|^2 / (1+|s|^2)) * s / (|s| + eps), folded into one scalar/capsule
    return sq * pl.reciprocal((1.0 + sq) * (jnp.sqrt(sq) + jnp.float32(eps)))


# ------------------------------- kernel --------------------------------------
def _capsule_kernel(u_ref, w_ref, mask_ref, out_ref, *,
                    num_in_caps, num_out_caps, dim_in_caps, dim_out_caps,
                    num_iterations, shared, matmul_dtype):
    n_in, n_out, d_in, d_out = num_in_caps, num_out_caps, dim_in_caps, dim_out_caps
    tb = u_ref.shape[-1]
    cast = (lambda x: x.astype(matmul_dtype)) if matmul_dtype is not None else (lambda x: x)

    u = u_ref[...].astype(jnp.float32)          # [N_in, D_in, TB]
    w = w_ref[...].astype(jnp.float32)
    mask = mask_ref[...].astype(jnp.float32)    # [N_in, TB]

    if shared:
        # w: [N_out, D_in, D_out].  u_hat is factored out of the loop entirely:
        #   s  = w  @ (probs^T-weighted sum of u)   (MXU)
        #   wv = w^T @ v                            (MXU)
        neg = jnp.broadcast_to(mask[None, :, :] * jnp.float32(-1e18),
                               (n_out, n_in, tb))                       # hoisted once
        logits = jnp.zeros((n_out, n_in, tb), jnp.float32)
        v = jnp.zeros((n_out, d_out, tb), jnp.float32)
        for it in range(num_iterations):
            logits = logits + neg
            probs = _softmax(logits, axis=0)                            # over N_out (leading)
            # t[o,k,b] = sum_i probs[o,i,b] * u[i,k,b]
            t = jnp.sum(probs[:, :, None, :] * u[None, :, :, :], axis=1)  # [N_out, D_in, TB]
            # s[o,d,b] = sum_k w[o,k,d] * t[o,k,b]     (MXU, batched over N_out)
            s = lax.dot_general(cast(w), cast(t),
                                dimension_numbers=(((1,), (1,)), ((0,), (0,))),
                                preferred_element_type=jnp.float32)     # [N_out, D_out, TB]
            sq = jnp.sum(s * s, axis=1, keepdims=True)                  # [N_out, 1, TB]
            v = s * _squash_scale(sq)
            if it != num_iterations - 1:
                # wv[o,k,b] = sum_d w[o,k,d] * v[o,d,b]  (MXU)
                wv = lax.dot_general(cast(w), cast(v),
                                     dimension_numbers=(((2,), (1,)), ((0,), (0,))),
                                     preferred_element_type=jnp.float32)  # [N_out, D_in, TB]
                # delta[o,i,b] = sum_k wv[o,k,b] * u[i,k,b]
                logits = logits + jnp.sum(wv[:, None, :, :] * u[None, :, :, :], axis=2)
    else:
        # w: [N_in, N_out*D_out, D_in] (wrapper pre-reshaped, lane = D_in).
        # Priors: one batched MXU matmul, no in-kernel transposes.
        uh = lax.dot_general(cast(w), cast(u),
                             dimension_numbers=(((2,), (1,)), ((0,), (0,))),
                             preferred_element_type=jnp.float32)        # [N_in, NOD, TB]
        u_hat = uh.reshape(n_in, n_out, d_out, tb)                      # layout-preserving

        neg = jnp.broadcast_to(mask[:, None, :] * jnp.float32(-1e18),
                               (n_in, n_out, tb))                       # hoisted once
        logits = jnp.zeros((n_in, n_out, tb), jnp.float32)
        v = jnp.zeros((n_out, d_out, tb), jnp.float32)
        for it in range(num_iterations):
            logits = logits + neg
            probs = _softmax(logits, axis=1)                            # over N_out
            s = jnp.sum(probs[:, :, None, :] * u_hat, axis=0)           # [N_out, D_out, TB]
            sq = jnp.sum(s * s, axis=1, keepdims=True)
            v = s * _squash_scale(sq)
            if it != num_iterations - 1:
                logits = logits + jnp.sum(u_hat * v[None, :, :, :], axis=2)  # [N_in, N_out, TB]

    # Lane-dense output slab: [NOD, TB]
    out_ref[...] = v.reshape(n_out * d_out, tb).astype(out_ref.dtype)


# ------------------------------- wrapper --------------------------------------
def capsule_layer(inputs_u, inputs_mask, route_weights, *,
                  num_iterations=3, shared=False, batch_tile=None, matmul_dtype=None):
    """Pallas implementation of CapsuleLayer.forward."""
    B, N_in, D_in = inputs_u.shape
    if shared:
        N_out, _, D_out = route_weights.shape
        w = route_weights.astype(jnp.float32)                           # [N_out, D_in, D_out]
        w_spec = pl.BlockSpec((N_out, D_in, D_out), lambda b: (0, 0, 0))
    else:
        _, N_out, _, D_out = route_weights.shape
        # [N_in, N_out*D_out, D_in]: ready for the batched priors matmul (lane = D_in)
        w = jnp.transpose(route_weights, (0, 1, 3, 2)).reshape(N_in, N_out * D_out, D_in)
        w = w.astype(jnp.float32)
        w_spec = pl.BlockSpec((N_in, N_out * D_out, D_in), lambda b: (0, 0, 0))
        # TODO(synk): for very large non-shared weights, add a grid axis over N_in chunks
        # (accumulating priors) so the whole weight block need not stay VMEM-resident.

    NOD = N_out * D_out
    TB, n_tiles, B_pad, vmem_limit = _plan_tiles(
        B, N_in, N_out, D_in, D_out, shared, batch_tile=batch_tile)

    # Batch-on-lane layout: transposes happen once here, never inside the kernel.
    u_t = jnp.transpose(inputs_u.astype(jnp.float32), (1, 2, 0))        # [N_in, D_in, B]
    mask_t = jnp.transpose(inputs_mask.astype(jnp.float32), (1, 0))     # [N_in, B]
    if B_pad != B:
        pad = B_pad - B
        u_t = jnp.pad(u_t, ((0, 0), (0, 0), (0, pad)))
        mask_t = jnp.pad(mask_t, ((0, 0), (0, pad)), constant_values=1.0)

    kernel = functools.partial(
        _capsule_kernel,
        num_in_caps=N_in, num_out_caps=N_out, dim_in_caps=D_in, dim_out_caps=D_out,
        num_iterations=num_iterations, shared=shared, matmul_dtype=matmul_dtype)

    out_t = pl.pallas_call(
        kernel,
        out_shape=jax.ShapeDtypeStruct((NOD, B_pad), jnp.float32),
        grid_spec=pltpu.PrefetchScalarGridSpec(
            num_scalar_prefetch=0,
            grid=(n_tiles,),
            in_specs=[
                pl.BlockSpec((N_in, D_in, TB), lambda b: (0, 0, b)),
                w_spec,
                pl.BlockSpec((N_in, TB), lambda b: (0, b)),
            ],
            out_specs=pl.BlockSpec((NOD, TB), lambda b: (0, b)),
        ),
        compiler_params=pltpu.CompilerParams(
            dimension_semantics=("parallel",),
            vmem_limit_bytes=vmem_limit),
    )(u_t, w, mask_t)

    # [NOD, B_pad] -> [B, N_out, D_out]
    return jnp.transpose(out_t[:, :B], (1, 0)).reshape(B, N_out, D_out)


# ---------------- pure-JAX reference (mirrors the PyTorch code) --------------
def capsule_ref(inputs_u, inputs_mask, route_weights, num_iterations=3, shared=False):
    u = inputs_u.astype(jnp.float32)
    rw = route_weights.astype(jnp.float32)
    if shared:
        u_hat = jnp.einsum('bik,okd->biod', u, rw)
    else:
        u_hat = jnp.einsum('bik,iokd->biod', u, rw)
    B, N_in, N_out, D_out = u_hat.shape
    logits = jnp.zeros((B, N_in, N_out), jnp.float32)
    mask = inputs_mask.astype(jnp.float32)[:, :, None]
    v = None
    for it in range(num_iterations):
        logits = logits + mask * (-1e18)
        probs = jax.nn.softmax(logits, axis=-1)
        s = jnp.sum(probs[..., None] * u_hat, axis=1)
        sq = jnp.sum(s * s, axis=-1, keepdims=True)
        v = (sq / (1.0 + sq)) * s / (jnp.sqrt(sq) + 6e-8)
        if it != num_iterations - 1:
            logits = logits + jnp.sum(u_hat * v[:, None, :, :], axis=-1)
    return v


if __name__ == "__main__":
    key = jax.random.PRNGKey(0)
    k1, k2, k3 = jax.random.split(key, 3)

    B, N_in, N_out, D_in, D_out = 2, 8, 4, 32, 16
    num_iterations = 3

    inputs_u = jax.random.normal(k1, (B, N_in, D_in), jnp.float32)
    # padding mask: 1.0 at padded input-capsule positions
    lengths = jnp.array([8, 5])
    inputs_mask = (jnp.arange(N_in)[None, :] >= lengths[:, None]).astype(jnp.float32)

    # ---- default: per-input-capsule routing weights (share_route_weights_for_in_caps=False)
    w_full = 0.01 * jax.random.normal(k2, (N_in, N_out, D_in, D_out), jnp.float32)
    out = capsule_layer(inputs_u, inputs_mask, w_full,
                        num_iterations=num_iterations, shared=False)
    jax.block_until_ready(out)
    ref = capsule_ref(inputs_u, inputs_mask, w_full, num_iterations, shared=False)
    assert out.shape == (B, N_out, D_out)
    assert jnp.allclose(out, ref, atol=1e-5, rtol=1e-4), "non-shared mismatch"

    # ---- shared routing weights (share_route_weights_for_in_caps=True)
    w_shared = 0.01 * jax.random.normal(k3, (N_out, D_in, D_out), jnp.float32)
    out_s = capsule_layer(inputs_u, inputs_mask, w_shared,
                          num_iterations=num_iterations, shared=True)
    jax.block_until_ready(out_s)
    ref_s = capsule_ref(inputs_u, inputs_mask, w_shared, num_iterations, shared=True)
    assert out_s.shape == (B, N_out, D_out)
    assert jnp.allclose(out_s, ref_s, atol=1e-5, rtol=1e-4), "shared mismatch"

    print("KERNEL_OK")
</pallas_src>

<mosaic_0001>
module attributes {stable_mosaic.version = 11 : i64} {
  func.func @_capsule_kernel(%arg0: i32, %arg1: memref<8x32x8xf32, #tpu.memory_space<vmem>>, %arg2: memref<8x64x32xf32, #tpu.memory_space<vmem>>, %arg3: memref<8x8xf32, #tpu.memory_space<vmem>>, %arg4: memref<64x8xf32, #tpu.memory_space<vmem>>) attributes {dimension_semantics = [#tpu.dimension_semantics<parallel>], iteration_bounds = array<i64: 1>, scalar_prefetch = 0 : i64, scratch_operands = 0 : i64, tpu.core_type = #tpu.core_type<tc>, window_params = [{transform_indices = @transform_0, window_bounds = array<i64: 8, 32, 8>}, {pipeline_mode = #tpu.pipeline_mode<synchronous>, transform_indices = @transform_1, window_bounds = array<i64: 8, 64, 32>}, {transform_indices = @transform_2, window_bounds = array<i64: 8, 8>}, {transform_indices = @transform_3, window_bounds = array<i64: 64, 8>}]} {
    %c0 = arith.constant 0 : index
    %c0_0 = arith.constant 0 : index
    %c0_1 = arith.constant 0 : index
    %0 = vector.load %arg1[%c0, %c0_0, %c0_1] : memref<8x32x8xf32, #tpu.memory_space<vmem>>, vector<8x32x8xf32>
    %c0_2 = arith.constant 0 : index
    %c0_3 = arith.constant 0 : index
    %c0_4 = arith.constant 0 : index
    %1 = vector.load %arg2[%c0_2, %c0_3, %c0_4] : memref<8x64x32xf32, #tpu.memory_space<vmem>>, vector<8x64x32xf32>
    %c0_5 = arith.constant 0 : index
    %c0_6 = arith.constant 0 : index
    %2 = vector.load %arg3[%c0_5, %c0_6] : memref<8x8xf32, #tpu.memory_space<vmem>>, vector<8x8xf32>
    %cst = arith.constant dense<0.000000e+00> : vector<8x64x8xf32>
    %3 = tpu.matmul %1, %0, %cst {dimension_numbers = #tpu.dot_dimension_numbers<[2], [1], [1], [2], [0, 0, 0, 1, 1, 2], [0], [0]>} : vector<8x64x32xf32>, vector<8x32x8xf32>, vector<8x64x8xf32> -> vector<8x64x8xf32>
    %4 = vector.shape_cast %3 : vector<8x64x8xf32> to vector<8x4x16x8xf32>
    %5 = vector.shape_cast %2 : vector<8x8xf32> to vector<8x1x8xf32>
    %cst_7 = arith.constant -9.99999984E+17 : f32
    %6 = vector.broadcast %cst_7 : f32 to vector<8x1x8xf32>
    %7 = arith.mulf %5, %6 : vector<8x1x8xf32>
    %8 = vector.shape_cast %7 : vector<8x1x8xf32> to vector<8x1x8xf32>
    %9 = vector.broadcast %8 : vector<8x1x8xf32> to vector<8x4x8xf32>
    %cst_8 = arith.constant 0.000000e+00 : f32
    %10 = vector.broadcast %cst_8 : f32 to vector<8x4x8xf32>
    %11 = arith.addf %10, %9 : vector<8x4x8xf32>
    %cst_9 = arith.constant dense<0xFF800000> : vector<8x8xf32>
    %12 = vector.multi_reduction <maximumf>, %11, %cst_9 [1] : vector<8x4x8xf32> to vector<8x8xf32>
    %13 = vector.shape_cast %12 : vector<8x8xf32> to vector<8x1x8xf32>
    %14 = vector.broadcast %13 : vector<8x1x8xf32> to vector<8x4x8xf32>
    %15 = arith.subf %11, %14 : vector<8x4x8xf32>
    %16 = math.exp %15 : vector<8x4x8xf32>
    %cst_10 = arith.constant dense<0.000000e+00> : vector<8x8xf32>
    %17 = vector.multi_reduction <add>, %16, %cst_10 [1] : vector<8x4x8xf32> to vector<8x8xf32>
    %18 = vector.shape_cast %17 : vector<8x8xf32> to vector<8x1x8xf32>
    %19 = tpu.reciprocal %18 : vector<8x1x8xf32> -> vector<8x1x8xf32>
    %20 = vector.broadcast %19 : vector<8x1x8xf32> to vector<8x4x8xf32>
    %21 = arith.mulf %16, %20 : vector<8x4x8xf32>
    %22 = vector.shape_cast %21 : vector<8x4x8xf32> to vector<8x4x1x8xf32>
    %23 = vector.broadcast %22 : vector<8x4x1x8xf32> to vector<8x4x16x8xf32>
    %24 = arith.mulf %23, %4 : vector<8x4x16x8xf32>
    %cst_11 = arith.constant dense<0.000000e+00> : vector<4x16x8xf32>
    %25 = vector.multi_reduction <add>, %24, %cst_11 [0] : vector<8x4x16x8xf32> to vector<4x16x8xf32>
    %26 = arith.mulf %25, %25 : vector<4x16x8xf32>
    %cst_12 = arith.constant dense<0.000000e+00> : vector<4x8xf32>
    %27 = vector.multi_reduction <add>, %26, %cst_12 [1] : vector<4x16x8xf32> to vector<4x8xf32>
    %28 = vector.shape_cast %27 : vector<4x8xf32> to vector<4x1x8xf32>
    %cst_13 = arith.constant 1.000000e+00 : f32
    %29 = vector.broadcast %cst_13 : f32 to vector<4x1x8xf32>
    %30 = arith.addf %29, %28 : vector<4x1x8xf32>
    %31 = math.sqrt %28 : vector<4x1x8xf32>
    %cst_14 = arith.constant 5.99999978E-8 : f32
    %32 = vector.broadcast %cst_14 : f32 to vector<4x1x8xf32>
    %33 = arith.addf %31, %32 : vector<4x1x8xf32>
    %34 = arith.mulf %30, %33 : vector<4x1x8xf32>
    %35 = tpu.reciprocal %34 : vector<4x1x8xf32> -> vector<4x1x8xf32>
    %36 = arith.mulf %28, %35 : vector<4x1x8xf32>
    %37 = vector.broadcast %36 : vector<4x1x8xf32> to vector<4x16x8xf32>
    %38 = arith.mulf %25, %37 : vector<4x16x8xf32>
    %39 = vector.shape_cast %38 : vector<4x16x8xf32> to vector<1x4x16x8xf32>
    %40 = vector.broadcast %39 : vector<1x4x16x8xf32> to vector<8x4x16x8xf32>
    %41 = arith.mulf %4, %40 : vector<8x4x16x8xf32>
    %cst_15 = arith.constant dense<0.000000e+00> : vector<8x4x8xf32>
    %42 = vector.multi_reduction <add>, %41, %cst_15 [2] : vector<8x4x16x8xf32> to vector<8x4x8xf32>
    %43 = arith.addf %11, %42 : vector<8x4x8xf32>
    %44 = arith.addf %43, %9 : vector<8x4x8xf32>
    %cst_16 = arith.constant dense<0xFF800000> : vector<8x8xf32>
    %45 = vector.multi_reduction <maximumf>, %44, %cst_16 [1] : vector<8x4x8xf32> to vector<8x8xf32>
    %46 = vector.shape_cast %45 : vector<8x8xf32> to vector<8x1x8xf32>
    %47 = vector.broadcast %46 : vector<8x1x8xf32> to vector<8x4x8xf32>
    %48 = arith.subf %44, %47 : vector<8x4x8xf32>
    %49 = math.exp %48 : vector<8x4x8xf32>
    %cst_17 = arith.constant dense<0.000000e+00> : vector<8x8xf32>
    %50 = vector.multi_reduction <add>, %49, %cst_17 [1] : vector<8x4x8xf32> to vector<8x8xf32>
    %51 = vector.shape_cast %50 : vector<8x8xf32> to vector<8x1x8xf32>
    %52 = tpu.reciprocal %51 : vector<8x1x8xf32> -> vector<8x1x8xf32>
    %53 = vector.broadcast %52 : vector<8x1x8xf32> to vector<8x4x8xf32>
    %54 = arith.mulf %49, %53 : vector<8x4x8xf32>
    %55 = vector.shape_cast %54 : vector<8x4x8xf32> to vector<8x4x1x8xf32>
    %56 = vector.broadcast %55 : vector<8x4x1x8xf32> to vector<8x4x16x8xf32>
    %57 = arith.mulf %56, %4 : vector<8x4x16x8xf32>
    %cst_18 = arith.constant dense<0.000000e+00> : vector<4x16x8xf32>
    %58 = vector.multi_reduction <add>, %57, %cst_18 [0] : vector<8x4x16x8xf32> to vector<4x16x8xf32>
    %59 = arith.mulf %58, %58 : vector<4x16x8xf32>
    %cst_19 = arith.constant dense<0.000000e+00> : vector<4x8xf32>
    %60 = vector.multi_reduction <add>, %59, %cst_19 [1] : vector<4x16x8xf32> to vector<4x8xf32>
    %61 = vector.shape_cast %60 : vector<4x8xf32> to vector<4x1x8xf32>
    %cst_20 = arith.constant 1.000000e+00 : f32
    %62 = vector.broadcast %cst_20 : f32 to vector<4x1x8xf32>
    %63 = arith.addf %62, %61 : vector<4x1x8xf32>
    %64 = math.sqrt %61 : vector<4x1x8xf32>
    %cst_21 = arith.constant 5.99999978E-8 : f32
    %65 = vector.broadcast %cst_21 : f32 to vector<4x1x8xf32>
    %66 = arith.addf %64, %65 : vector<4x1x8xf32>
    %67 = arith.mulf %63, %66 : vector<4x1x8xf32>
    %68 = tpu.reciprocal %67 : vector<4x1x8xf32> -> vector<4x1x8xf32>
    %69 = arith.mulf %61, %68 : vector<4x1x8xf32>
    %70 = vector.broadcast %69 : vector<4x1x8xf32> to vector<4x16x8xf32>
    %71 = arith.mulf %58, %70 : vector<4x16x8xf32>
    %72 = vector.shape_cast %71 : vector<4x16x8xf32> to vector<1x4x16x8xf32>
    %73 = vector.broadcast %72 : vector<1x4x16x8xf32> to vector<8x4x16x8xf32>
    %74 = arith.mulf %4, %73 : vector<8x4x16x8xf32>
    %cst_22 = arith.constant dense<0.000000e+00> : vector<8x4x8xf32>
    %75 = vector.multi_reduction <add>, %74, %cst_22 [2] : vector<8x4x16x8xf32> to vector<8x4x8xf32>
    %76 = arith.addf %44, %75 : vector<8x4x8xf32>
    %77 = arith.addf %76, %9 : vector<8x4x8xf32>
    %cst_23 = arith.constant dense<0xFF800000> : vector<8x8xf32>
    %78 = vector.multi_reduction <maximumf>, %77, %cst_23 [1] : vector<8x4x8xf32> to vector<8x8xf32>
    %79 = vector.shape_cast %78 : vector<8x8xf32> to vector<8x1x8xf32>
    %80 = vector.broadcast %79 : vector<8x1x8xf32> to vector<8x4x8xf32>
    %81 = arith.subf %77, %80 : vector<8x4x8xf32>
    %82 = math.exp %81 : vector<8x4x8xf32>
    %cst_24 = arith.constant dense<0.000000e+00> : vector<8x8xf32>
    %83 = vector.multi_reduction <add>, %82, %cst_24 [1] : vector<8x4x8xf32> to vector<8x8xf32>
    %84 = vector.shape_cast %83 : vector<8x8xf32> to vector<8x1x8xf32>
    %85 = tpu.reciprocal %84 : vector<8x1x8xf32> -> vector<8x1x8xf32>
    %86 = vector.broadcast %85 : vector<8x1x8xf32> to vector<8x4x8xf32>
    %87 = arith.mulf %82, %86 : vector<8x4x8xf32>
    %88 = vector.shape_cast %87 : vector<8x4x8xf32> to vector<8x4x1x8xf32>
    %89 = vector.broadcast %88 : vector<8x4x1x8xf32> to vector<8x4x16x8xf32>
    %90 = arith.mulf %89, %4 : vector<8x4x16x8xf32>
    %cst_25 = arith.constant dense<0.000000e+00> : vector<4x16x8xf32>
    %91 = vector.multi_reduction <add>, %90, %cst_25 [0] : vector<8x4x16x8xf32> to vector<4x16x8xf32>
    %92 = arith.mulf %91, %91 : vector<4x16x8xf32>
    %cst_26 = arith.constant dense<0.000000e+00> : vector<4x8xf32>
    %93 = vector.multi_reduction <add>, %92, %cst_26 [1] : vector<4x16x8xf32> to vector<4x8xf32>
    %94 = vector.shape_cast %93 : vector<4x8xf32> to vector<4x1x8xf32>
    %cst_27 = arith.constant 1.000000e+00 : f32
    %95 = vector.broadcast %cst_27 : f32 to vector<4x1x8xf32>
    %96 = arith.addf %95, %94 : vector<4x1x8xf32>
    %97 = math.sqrt %94 : vector<4x1x8xf32>
    %cst_28 = arith.constant 5.99999978E-8 : f32
    %98 = vector.broadcast %cst_28 : f32 to vector<4x1x8xf32>
    %99 = arith.addf %97, %98 : vector<4x1x8xf32>
    %100 = arith.mulf %96, %99 : vector<4x1x8xf32>
    %101 = tpu.reciprocal %100 : vector<4x1x8xf32> -> vector<4x1x8xf32>
    %102 = arith.mulf %94, %101 : vector<4x1x8xf32>
    %103 = vector.broadcast %102 : vector<4x1x8xf32> to vector<4x16x8xf32>
    %104 = arith.mulf %91, %103 : vector<4x16x8xf32>
    %105 = vector.shape_cast %104 : vector<4x16x8xf32> to vector<64x8xf32>
    %c0_29 = arith.constant 0 : index
    %c0_30 = arith.constant 0 : index
    %106 = vector.load %arg4[%c0_29, %c0_30] : memref<64x8xf32, #tpu.memory_space<vmem>>, vector<64x8xf32>
    tpu.vector_store %arg4[%c0_29, %c0_30], %105 {strides = array<i32>} : memref<64x8xf32, #tpu.memory_space<vmem>>, vector<64x8xf32>,
    return
  }
  func.func @transform_0(%arg0: i32) -> (i32, i32, i32) {
    %c0_i32 = arith.constant 0 : i32
    %c0_i32_0 = arith.constant 0 : i32
    %c0_i32_1 = arith.constant 0 : i32
    return %c0_i32, %c0_i32_0, %arg0 : i32, i32, i32
  }
  func.func @transform_1(%arg0: i32) -> (i32, i32, i32) {
    %c0_i32 = arith.constant 0 : i32
    %c0_i32_0 = arith.constant 0 : i32
    %c0_i32_1 = arith.constant 0 : i32
    %c0_i32_2 = arith.constant 0 : i32
    return %c0_i32, %c0_i32_0, %c0_i32_1 : i32, i32, i32
  }
  func.func @transform_2(%arg0: i32) -> (i32, i32) {
    %c0_i32 = arith.constant 0 : i32
    %c0_i32_0 = arith.constant 0 : i32
    return %c0_i32, %arg0 : i32, i32
  }
  func.func @transform_3(%arg0: i32) -> (i32, i32) {
    %c0_i32 = arith.constant 0 : i32
    %c0_i32_0 = arith.constant 0 : i32
    return %c0_i32, %arg0 : i32, i32
  }
}

</mosaic_0001>

<bundles_post_ra>
// kernel: tpu_custom_call.1
= control target key start
LH: loop header
LB: loop body
LE: loop exit
PB: predicated region body
PF: predicated region fallthrough
CT: control target
= control target key end

     0   :  { %vm111_vm0 = vcmask 261120   ;;  %vm1266_vm1 = vcmask 64512   ;;  %vm1299_vm2 = vcmask 60416   ;;  %vm2400_vm11 = vcmask 1041409   ;;  %s7648_s0 = inlined_call_operand.vmem [shape: f32[8,32,8], index: 0, kind: input, shape index: {}]   ;;  %s7649_s1 = inlined_call_operand.vmem [shape: f32[8,64,32], index: 1, kind: input, shape index: {}]   ;;  %s7650_s2 = inlined_call_operand.vmem [shape: f32[8,8], index: 2, kind: input, shape index: {}]   ;;  %s7651_s3 = inlined_call_operand.vmem [shape: f32[64,8], index: 3, kind: output, shape index: {}]  }
   0x1   :  { %v17_v0 = vld [vmem:[%s7648_s0 + $0x18] sm:$0xff]  ;;  %v16_v2 = vld [vmem:[%s7648_s0 + $0x10] sm:$0xff]  ;;  %v15_v4 = vld [vmem:[%s7648_s0 + $0x8] sm:$0xff]  ;;  %vm2402_vm12 = vcmask 1042434   ;;  %vm2404_vm13 = vcmask 1043459  }
   0x2   :  { %v21_v1 = vld [vmem:[%s7648_s0 + $0x38] sm:$0xff]  ;;  %4647 = vmatprep.subr.mxu0 %v17_v0  ;;  %v20_v3 = vld [vmem:[%s7648_s0 + $0x30] sm:$0xff]  ;;  %v19_v5 = vld [vmem:[%s7648_s0 + $0x28] sm:$0xff] }
   0x3   :  { %4667 = vmatprep.subr.mxu1 %v21_v1  ;;  %4648 = vmatpush3.msra.mxu0 %v17_v0  ;;  %v14_v6 = vld [vmem:[%s7648_s0] sm:$0xff]  ;;  %v47_v10 = vld [vmem:[%s7649_s1 + $0x8] sm:$0xff]  ;;  %v25_v12 = vld [vmem:[%s7648_s0 + $0x58] sm:$0xff] }
   0x4   :  { %4668 = vmatpush3.msra.mxu1 %v21_v1  ;;  %4649 = vmatprep.subr.mxu0 %v16_v2  ;;  %v18_v7 = vld [vmem:[%s7648_s0 + $0x20] sm:$0xff]  ;;  %v55_v11 = vld [vmem:[%s7649_s1 + $0x48] sm:$0xff]  ;;  %v29_v13 = vld [vmem:[%s7648_s0 + $0x78] sm:$0xff] }
   0x5   :  { %4669 = vmatprep.subr.mxu1 %v20_v3  ;;  %4650 = vmatpush3.msra.mxu0 %v16_v2  ;;  %v46_v8 = vld [vmem:[%s7649_s1] sm:$0xff]  ;;  %v48_v14 = vld [vmem:[%s7649_s1 + $0x10] sm:$0xff]  ;;  %v49_v16 = vld [vmem:[%s7649_s1 + $0x18] sm:$0xff] }
   0x6   :  { %4670 = vmatpush3.msra.mxu1 %v20_v3  ;;  %4651 = vmatprep.subr.mxu0 %v15_v4  ;;  %v54_v9 = vld [vmem:[%s7649_s1 + $0x40] sm:$0xff]  ;;  %v56_v15 = vld [vmem:[%s7649_s1 + $0x50] sm:$0xff]  ;;  %v57_v17 = vld [vmem:[%s7649_s1 + $0x58] sm:$0xff] }
   0x7   :  { %4671 = vmatprep.subr.mxu1 %v19_v5  ;;  %4652 = vmatpush3.msra.mxu0 %v15_v4  ;;  %v24_v18 = vld [vmem:[%s7648_s0 + $0x50] sm:$0xff]  ;;  %v50_v20 = vld [vmem:[%s7649_s1 + $0x20] sm:$0xff]  ;;  %v51_v22 = vld [vmem:[%s7649_s1 + $0x28] sm:$0xff] }
   0x8   :  { %4672 = vmatpush3.msra.mxu1 %v19_v5  ;;  %4653 = vmatprep.subr.mxu0 %v14_v6  ;;  %v28_v19 = vld [vmem:[%s7648_s0 + $0x70] sm:$0xff]  ;;  %v58_v21 = vld [vmem:[%s7649_s1 + $0x60] sm:$0xff]  ;;  %v59_v23 = vld [vmem:[%s7649_s1 + $0x68] sm:$0xff] }
   0x9   :  { %4673 = vmatprep.subr.mxu1 %v18_v7  ;;  %4654 = vmatpush3.msra.mxu0 %v14_v6  ;;  %v23_v24 = vld [vmem:[%s7648_s0 + $0x48] sm:$0xff]  ;;  %v52_v26 = vld [vmem:[%s7649_s1 + $0x30] sm:$0xff]  ;;  %v53_v28 = vld [vmem:[%s7649_s1 + $0x38] sm:$0xff] }
   0xa   :  { %4655 = vmatprep.mubr.msk.f32.mxu0 %vm111_vm0, %v46_v8  ;;  %4674 = vmatpush3.msra.mxu1 %v18_v7  ;;  %v27_v25 = vld [vmem:[%s7648_s0 + $0x68] sm:$0xff]  ;;  %v60_v27 = vld [vmem:[%s7649_s1 + $0x70] sm:$0xff]  ;;  %v61_v29 = vld [vmem:[%s7649_s1 + $0x78] sm:$0xff] }
   0xb   :  { %4675 = vmatprep.mubr.msk.f32.mxu1 %vm111_vm0, %v54_v9  ;;  %4656 = vmatmul.mubr.msk.f32.vlgmr.msra.gmra.mxu0 %vm111_vm0, %v47_v10  ;;  %v22_v30 = vld [vmem:[%s7648_s0 + $0x40] sm:$0xff]  ;;  %v63_v34 = vld [vmem:[%s7649_s1 + $0x88] sm:$0xff]  ;;  %v33_v35 = vld [vmem:[%s7648_s0 + $0x98] sm:$0xff] }
   0xc   :  { %4676 = vmatmul.mubr.msk.f32.vlgmr.msra.gmra.mxu1 %vm111_vm0, %v55_v11  ;;  %4687 = vmatprep.subr.mxu0 %v25_v12  ;;  %v26_v31 = vld [vmem:[%s7648_s0 + $0x60] sm:$0xff]  ;;  %v71_v36 = vld [vmem:[%s7649_s1 + $0xc8] sm:$0xff]  ;;  %v37_v37 = vld [vmem:[%s7648_s0 + $0xb8] sm:$0xff] }
   0xd   :  { %4707 = vmatprep.subr.mxu1 %v29_v13  ;;  %4688 = vmatpush3.msra.mxu0 %v25_v12  ;;  %v62_v32 = vld [vmem:[%s7649_s1 + $0x80] sm:$0xff]  ;;  %v64_v38 = vld [vmem:[%s7649_s1 + $0x90] sm:$0xff]  ;;  %v65_v40 = vld [vmem:[%s7649_s1 + $0x98] sm:$0xff] }
   0xe   :  { %4658 = vmatprep.mubr.msk.f32.mxu0 %vm111_vm0, %v48_v14  ;;  %4678 = vmatprep.mubr.msk.f32.mxu1 %vm111_vm0, %v56_v15  ;;  %v70_v33 = vld [vmem:[%s7649_s1 + $0xc0] sm:$0xff]  ;;  %v72_v39 = vld [vmem:[%s7649_s1 + $0xd0] sm:$0xff]  ;;  %v73_v42 = vld [vmem:[%s7649_s1 + $0xd8] sm:$0xff] }
   0xf   :  { %4708 = vmatpush3.msra.mxu1 %v29_v13  ;;  %4659 = vmatmul.mubr.msk.f32.gmra.mxu0 %vm111_vm0, %v49_v16  ;;  %v32_v41 = vld [vmem:[%s7648_s0 + $0x90] sm:$0xff]  ;;  %v66_v44 = vld [vmem:[%s7649_s1 + $0xa0] sm:$0xff]  ;;  %v67_v46 = vld [vmem:[%s7649_s1 + $0xa8] sm:$0xff] }
  0x10   :  { %4679 = vmatmul.mubr.msk.f32.gmra.mxu1 %vm111_vm0, %v57_v17  ;;  %4689 = vmatprep.subr.mxu0 %v24_v18  ;;  %v36_v43 = vld [vmem:[%s7648_s0 + $0xb0] sm:$0xff]  ;;  %v74_v45 = vld [vmem:[%s7649_s1 + $0xe0] sm:$0xff]  ;;  %v31_v47 = vld [vmem:[%s7648_s0 + $0x88] sm:$0xff] }
  0x11   :  { %4709 = vmatprep.subr.mxu1 %v28_v19  ;;  %4690 = vmatpush3.msra.mxu0 %v24_v18  ;;  %v75_v48 = vld [vmem:[%s7649_s1 + $0xe8] sm:$0xff]  ;;  %v68_v50 = vld [vmem:[%s7649_s1 + $0xb0] sm:$0xff]  ;;  %v69_v52 = vld [vmem:[%s7649_s1 + $0xb8] sm:$0xff] }
  0x12   :  { %4661 = vmatprep.mubr.msk.f32.mxu0 %vm111_vm0, %v50_v20  ;;  %4681 = vmatprep.mubr.msk.f32.mxu1 %vm111_vm0, %v58_v21  ;;  %v35_v49 = vld [vmem:[%s7648_s0 + $0xa8] sm:$0xff]  ;;  %v76_v51 = vld [vmem:[%s7649_s1 + $0xf0] sm:$0xff]  ;;  %v30_v53 = vld [vmem:[%s7648_s0 + $0x80] sm:$0xff] }
  0x13   :  { %4710 = vmatpush3.msra.mxu1 %v28_v19  ;;  %4662 = vmatmul.mubr.msk.f32.gmra.mxu0 %vm111_vm0, %v51_v22  ;;  %v77_v54 = vld [vmem:[%s7649_s1 + $0xf8] sm:$0xff]  ;;  %v34_v55 = vld [vmem:[%s7648_s0 + $0xa0] sm:$0xff]  ;;  %v79_v58 = vld [vmem:[%s7649_s1 + $0x108] sm:$0xff] }
  0x14   :  { %4682 = vmatmul.mubr.msk.f32.gmra.mxu1 %vm111_vm0, %v59_v23  ;;  %4691 = vmatprep.subr.mxu0 %v23_v24  ;;  %v78_v56 = vld [vmem:[%s7649_s1 + $0x100] sm:$0xff]  ;;  %v41_v59 = vld [vmem:[%s7648_s0 + $0xd8] sm:$0xff]  ;;  %v87_v60 = vld [vmem:[%s7649_s1 + $0x148] sm:$0xff] }
  0x15   :  { %4711 = vmatprep.subr.mxu1 %v27_v25  ;;  %4692 = vmatpush3.msra.mxu0 %v23_v24  ;;  %v86_v57 = vld [vmem:[%s7649_s1 + $0x140] sm:$0xff]  ;;  %v45_v61 = vld [vmem:[%s7648_s0 + $0xf8] sm:$0xff]  ;;  %v80_v62 = vld [vmem:[%s7649_s1 + $0x110] sm:$0xff] }
  0x16   :  { %4664 = vmatprep.mubr.msk.f32.mxu0 %vm111_vm0, %v52_v26  ;;  %4684 = vmatprep.mubr.msk.f32.mxu1 %vm111_vm0, %v60_v27  ;;  %v88_v63 = vld [vmem:[%s7649_s1 + $0x150] sm:$0xff]  ;;  %v81_v0 = vld [vmem:[%s7649_s1 + $0x118] sm:$0xff]  ;;  %v82_v4 = vld [vmem:[%s7649_s1 + $0x120] sm:$0xff] }
  0x17   :  { %4712 = vmatpush3.msra.mxu1 %v27_v25  ;;  %4665 = vmatmul.mubr.msk.f32.gmra.mxu0 %vm111_vm0, %v53_v28  ;;  %v40_v1 = vld [vmem:[%s7648_s0 + $0xd0] sm:$0xff]  ;;  %v89_v2 = vld [vmem:[%s7649_s1 + $0x158] sm:$0xff]  ;;  %v90_v5 = vld [vmem:[%s7649_s1 + $0x160] sm:$0xff] }
  0x18   :  { %4685 = vmatmul.mubr.msk.f32.gmra.mxu1 %vm111_vm0, %v61_v29  ;;  %4693 = vmatprep.subr.mxu0 %v22_v30  ;;  %v44_v3 = vld [vmem:[%s7648_s0 + $0xf0] sm:$0xff]  ;;  %v83_v6 = vld [vmem:[%s7649_s1 + $0x128] sm:$0xff]  ;;  %v85_v12 = vld [vmem:[%s7649_s1 + $0x138] sm:$0xff] }
  0x19   :  { %4713 = vmatprep.subr.mxu1 %v26_v31  ;;  %4694 = vmatpush3.msra.mxu0 %v22_v30  ;;  %v39_v7 = vld [vmem:[%s7648_s0 + $0xc8] sm:$0xff]  ;;  %v84_v10 = vld [vmem:[%s7649_s1 + $0x130] sm:$0xff]  ;;  %v38_v13 = vld [vmem:[%s7648_s0 + $0xc0] sm:$0xff] }
  0x1a   :  { %4695 = vmatprep.mubr.msk.f32.mxu0 %vm111_vm0, %v62_v32  ;;  %4714 = vmatpush3.msra.mxu1 %v26_v31  ;;  %v91_v8 = vld [vmem:[%s7649_s1 + $0x168] sm:$0xff]  ;;  %v92_v11 = vld [vmem:[%s7649_s1 + $0x170] sm:$0xff]  ;;  %v93_v14 = vld [vmem:[%s7649_s1 + $0x178] sm:$0xff]  ;;  %v4953_v32 = vmov 1966171168  }
  0x1b   :  { %4715 = vmatprep.mubr.msk.f32.mxu1 %vm111_vm0, %v70_v33  ;;  %4696 = vmatmul.mubr.msk.f32.vlgmr.msra.gmra.mxu0 %vm111_vm0, %v63_v34  ;;  %v43_v9 = vld [vmem:[%s7648_s0 + $0xe8] sm:$0xff]  ;;  %v42_v15 = vld [vmem:[%s7648_s0 + $0xe0] sm:$0xff]  ;;  %v96_v20 = vld [vmem:[%s7649_s1 + $0x190] sm:$0xff]  ;;  %v1147_v33 = vunpack.c.l.s4 %v4953_v32  ;;  %v1149_v34 = vlaneseq }
  0x1c   :  { %4727 = vmatprep.subr.mxu0 %v33_v35  ;;  %4716 = vmatmul.mubr.msk.f32.vlgmr.msra.gmra.mxu1 %vm111_vm0, %v71_v36  ;;  %v94_v16 = vld [vmem:[%s7649_s1 + $0x180] sm:$0xff]  ;;  %v95_v18 = vld [vmem:[%s7649_s1 + $0x188] sm:$0xff]  ;;  %v104_v21 = vld [vmem:[%s7649_s1 + $0x1d0] sm:$0xff] }
  0x1d   :  { %4728 = vmatpush3.msra.mxu0 %v33_v35  ;;  %4747 = vmatprep.subr.mxu1 %v37_v37  ;;  %v102_v17 = vld [vmem:[%s7649_s1 + $0x1c0] sm:$0xff]  ;;  %v103_v19 = vld [vmem:[%s7649_s1 + $0x1c8] sm:$0xff]  ;;  %v97_v22 = vld [vmem:[%s7649_s1 + $0x198] sm:$0xff]  ;;  %v1148_v35 = vunpack.c.0.s8 %v1147_v33  ;;  %v1150_v36 = vshrl.u32 %v1149_v34, 7 }
  0x1e   :  { %4698 = vmatprep.mubr.msk.f32.mxu0 %vm111_vm0, %v64_v38  ;;  %4748 = vmatpush3.msra.mxu1 %v37_v37  ;;  %v105_v23 = vld [vmem:[%s7649_s1 + $0x1d8] sm:$0xff]  ;;  %v98_v24 = vld [vmem:[%s7649_s1 + $0x1a0] sm:$0xff]  ;;  %v99_v26 = vld [vmem:[%s7649_s1 + $0x1a8] sm:$0xff] }
  0x1f   :  { %4718 = vmatprep.mubr.msk.f32.mxu1 %vm111_vm0, %v72_v39  ;;  %4699 = vmatmul.mubr.msk.f32.gmra.mxu0 %vm111_vm0, %v65_v40  ;;  %v106_v25 = vld [vmem:[%s7649_s1 + $0x1e0] sm:$0xff]  ;;  %v107_v27 = vld [vmem:[%s7649_s1 + $0x1e8] sm:$0xff]  ;;  %v100_v28 = vld [vmem:[%s7649_s1 + $0x1b0] sm:$0xff]  ;;  %v5326_v37 = vsub.s32 %v1148_v35, %v1150_v36 }
  0x20   :  { %4729 = vmatprep.subr.mxu0 %v32_v41  ;;  %4719 = vmatmul.mubr.msk.f32.gmra.mxu1 %vm111_vm0, %v73_v42  ;;  %v108_v29 = vld [vmem:[%s7649_s1 + $0x1f0] sm:$0xff]  ;;  %v101_v30 = vld [vmem:[%s7649_s1 + $0x1b8] sm:$0xff]  ;;  %v110_v38 = vld [vmem:[%s7650_s2] sm:$0xff] }
  0x21   :  { %4730 = vmatpush3.msra.mxu0 %v32_v41  ;;  %4749 = vmatprep.subr.mxu1 %v36_v43  ;;  %v109_v31 = vld [vmem:[%s7649_s1 + $0x1f8] sm:$0xff]  ;;  %7830 = vst [vmem:[#allocation2_spill] sm:$0xff] %v5326_v37  ;;  %v1152_v39 = vrot.slane %v110_v38, %v5326_v37  ;;  %v1145_v42 = vcombine.high %v110_v38, %v110_v38 }
  0x22   :  { %4701 = vmatprep.mubr.msk.f32.mxu0 %vm111_vm0, %v66_v44  ;;  %4750 = vmatpush3.msra.mxu1 %v36_v43 }
  0x23   :  { %4721 = vmatprep.mubr.msk.f32.mxu1 %vm111_vm0, %v74_v45  ;;  %4702 = vmatmul.mubr.msk.f32.gmra.mxu0 %vm111_vm0, %v67_v46  ;;  %v1160_v40 = vcombine.high %v1152_v39, %v1152_v39  ;;  %v1168_v41 = vrot.slane %v1152_v39, %v5326_v37  ;;  %v5334_v45 = vsub.s32 0, %v1150_v36  ;;  %v1159_v46 = vrot.slane %v1145_v42, %v5326_v37 }
  0x24   :  { %4731 = vmatprep.subr.mxu0 %v31_v47  ;;  %4722 = vmatmul.mubr.msk.f32.gmra.mxu1 %vm111_vm0, %v75_v48 }
  0x25   :  { %4732 = vmatpush3.msra.mxu0 %v31_v47  ;;  %4751 = vmatprep.subr.mxu1 %v35_v49  ;;  %v1182_v43 = vrot.slane %v1160_v40, %v5326_v37  ;;  %v1202_v44 = vmul.f32 -1e+18, %v1168_v41  ;;  %7831 = vst [vmem:[#allocation3_spill] sm:$0xff] %v5334_v45  ;;  %v1190_v47 = vcombine.high %v1168_v41, %v1168_v41 }
  0x26   :  { %4704 = vmatprep.mubr.msk.f32.mxu0 %vm111_vm0, %v68_v50  ;;  %4752 = vmatpush3.msra.mxu1 %v35_v49 }
  0x27   :  { %4724 = vmatprep.mubr.msk.f32.mxu1 %vm111_vm0, %v76_v51  ;;  %4705 = vmatmul.mubr.msk.f32.gmra.mxu0 %vm111_vm0, %v69_v52  ;;  %v1203_v48 = vmul.f32 -1e+18, %v1182_v43  ;;  %v5338_v49 = vrot.slane %v1202_v44, %v5334_v45  ;;  %v1192_v50 = vcombine.high %v1182_v43, %v1182_v43  ;;  %v1161_v51 = vcombine.high %v1159_v46, %v1159_v46 }
  0x28   :  { %4733 = vmatprep.subr.mxu0 %v30_v53  ;;  %4725 = vmatmul.mubr.msk.f32.gmra.mxu1 %vm111_vm0, %v77_v54  ;;  %v1204_v52 = vmul.f32 -1e+18, %v1190_v47  ;;  %v1175_v54 = vrot.slane %v1159_v46, %v5326_v37 }
  0x29   :  { %4734 = vmatpush3.msra.mxu0 %v30_v53  ;;  %4753 = vmatprep.subr.mxu1 %v34_v55  ;;  %7832 = vst [vmem:[#allocation4_spill] sm:$0xff] %v5338_v49  ;;  %v5341_v53 = vrot.slane %v1203_v48, %v5334_v45 }
  0x2a   :  { %4735 = vmatprep.mubr.msk.f32.mxu0 %vm111_vm0, %v78_v56  ;;  %4754 = vmatpush3.msra.mxu1 %v34_v55  ;;  %v1267_v55 = vsel %vm1266_vm1, %v5338_v49, -inf  ;;  %v1205_v56 = vmul.f32 -1e+18, %v1192_v50 }
  0x2b   :  { %4755 = vmatprep.mubr.msk.f32.mxu1 %vm111_vm0, %v86_v57  ;;  %4736 = vmatmul.mubr.msk.f32.vlgmr.msra.gmra.mxu0 %vm111_vm0, %v79_v58  ;;  %7833 = vst [vmem:[#allocation5_spill] sm:$0xff] %v5341_v53  ;;  %v1189_v57 = vrot.slane %v1161_v51, %v5326_v37  ;;  %v5348_v58 = vrot.slane %v1204_v52, %v5334_v45 }
  0x2c   :  { %4767 = vmatprep.subr.mxu0 %v41_v59  ;;  %4756 = vmatmul.mubr.msk.f32.vlgmr.msra.gmra.mxu1 %vm111_vm0, %v87_v60  ;;  %v1275_v60 = vsub.f32 %v5338_v49, %v1267_v55 }
  0x2d   :  { %4768 = vmatpush3.msra.mxu0 %v41_v59  ;;  %4787 = vmatprep.subr.mxu1 %v45_v61  ;;  %7834 = vst [vmem:[#allocation6_spill] sm:$0xff] %v5348_v58  ;;  %v1268_v59 = vsel %vm1266_vm1, %v5341_v53, -inf }
  0x2e   :  { %4738 = vmatprep.mubr.msk.f32.mxu0 %vm111_vm0, %v80_v62  ;;  %4788 = vmatpush3.msra.mxu1 %v45_v61  ;;  %v1206_v61 = vmul.f32 -1e+18, %v1175_v54  ;;  %v5354_v62 = vrot.slane %v1205_v56, %v5334_v45 }
  0x2f   :  { %4758 = vmatprep.mubr.msk.f32.mxu1 %vm111_vm0, %v88_v63  ;;  %4739 = vmatmul.mubr.msk.f32.gmra.mxu0 %vm111_vm0, %v81_v0  ;;  %v1207_v63 = vmul.f32 -1e+18, %v1189_v57  ;;  %v1191_v0 = vcombine.high %v1175_v54, %v1175_v54 }
  0x30   :  { %4769 = vmatprep.subr.mxu0 %v40_v1  ;;  %4759 = vmatmul.mubr.msk.f32.gmra.mxu1 %vm111_vm0, %v89_v2  ;;  %7835 = vst [vmem:[#allocation7_spill] sm:$0xff] %v5354_v62  ;;  %v1269_v2 = vsel %vm1266_vm1, %v5348_v58, -inf }
  0x31   :  { %4770 = vmatpush3.msra.mxu0 %v40_v1  ;;  %4789 = vmatprep.subr.mxu1 %v44_v3  ;;  %v1276_v1 = vsub.f32 %v5341_v53, %v1268_v59 }
  0x32   :  { %4741 = vmatprep.mubr.msk.f32.mxu0 %vm111_vm0, %v82_v4  ;;  %4790 = vmatpush3.msra.mxu1 %v44_v3  ;;  %v1193_v3 = vcombine.high %v1189_v57, %v1189_v57  ;;  %v1283_v4 = vmul.f32 1.442695, %v1275_v60 }
  0x33   :  { %4761 = vmatprep.mubr.msk.f32.mxu1 %vm111_vm0, %v90_v5  ;;  %4742 = vmatmul.mubr.msk.f32.gmra.mxu0 %vm111_vm0, %v83_v6  ;;  %v5360_v5 = vrot.slane %v1206_v61, %v5334_v45  ;;  %v1277_v6 = vsub.f32 %v5348_v58, %v1269_v2 }
  0x34   :  { %4771 = vmatprep.subr.mxu0 %v39_v7  ;;  %4762 = vmatmul.mubr.msk.f32.gmra.mxu1 %vm111_vm0, %v91_v8  ;;  %v5366_v8 = vrot.slane %v1207_v63, %v5334_v45  ;;  %4809 = vpow2.f32 %v1283_v4 }
  0x35   :  { %4772 = vmatpush3.msra.mxu0 %v39_v7  ;;  %4791 = vmatprep.subr.mxu1 %v43_v9  ;;  %7836 = vst [vmem:[#allocation8_spill] sm:$0xff] %v5360_v5  ;;  %v1270_v7 = vsel %vm1266_vm1, %v5354_v62, -inf }
  0x36   :  { %4744 = vmatprep.mubr.msk.f32.mxu0 %vm111_vm0, %v84_v10  ;;  %4792 = vmatpush3.msra.mxu1 %v43_v9  ;;  %7837 = vst [vmem:[#allocation9_spill] sm:$0xff] %v5366_v8  ;;  %v1208_v9 = vmul.f32 -1e+18, %v1191_v0  ;;  %v1285_v10 = vmul.f32 1.442695, %v1276_v1 }
  0x37   :  { %4764 = vmatprep.mubr.msk.f32.mxu1 %vm111_vm0, %v92_v11  ;;  %4745 = vmatmul.mubr.msk.f32.gmra.mxu0 %vm111_vm0, %v85_v12  ;;  %v1209_v11 = vmul.f32 -1e+18, %v1193_v3  ;;  %v1278_v12 = vsub.f32 %v5354_v62, %v1270_v7 }
  0x38   :  { %4773 = vmatprep.subr.mxu0 %v38_v13  ;;  %4765 = vmatmul.mubr.msk.f32.gmra.mxu1 %vm111_vm0, %v93_v14  ;;  %v1287_v14 = vmul.f32 1.442695, %v1277_v6  ;;  %4811 = vpow2.f32 %v1285_v10 }
  0x39   :  { %4774 = vmatpush3.msra.mxu0 %v38_v13  ;;  %4793 = vmatprep.subr.mxu1 %v42_v15  ;;  %v1271_v13 = vsel %vm1266_vm1, %v5360_v5, -inf }
  0x3a   :  { %4775 = vmatprep.mubr.msk.f32.mxu0 %vm111_vm0, %v94_v16  ;;  %4794 = vmatpush3.msra.mxu1 %v42_v15  ;;  %v1272_v15 = vsel %vm1266_vm1, %v5366_v8, -inf  ;;  %v5374_v16 = vrot.slane %v1208_v9, %v5334_v45  ;;  %4813 = vpow2.f32 %v1287_v14 }
  0x3b   :  { %4795 = vmatprep.mubr.msk.f32.mxu1 %vm111_vm0, %v102_v17  ;;  %4776 = vmatmul.mubr.msk.f32.vlgmr.msra.gmra.mxu0 %vm111_vm0, %v95_v18  ;;  %v5377_v17 = vrot.slane %v1209_v11, %v5334_v45  ;;  %v1279_v18 = vsub.f32 %v5360_v5, %v1271_v13 }
  0x3c   :  { %4796 = vmatmul.mubr.msk.f32.vlgmr.msra.gmra.mxu1 %vm111_vm0, %v103_v19  ;;  %4778 = vmatprep.mubr.msk.f32.mxu0 %vm111_vm0, %v96_v20  ;;  %7838 = vst [vmem:[#allocation10_spill] sm:$0xff] %v5374_v16  ;;  %v1289_v19 = vmul.f32 1.442695, %v1278_v12  ;;  %v1280_v20 = vsub.f32 %v5366_v8, %v1272_v15 }
  0x3d   :  { %4798 = vmatprep.mubr.msk.f32.mxu1 %vm111_vm0, %v104_v21  ;;  %7839 = vst [vmem:[#allocation11_spill] sm:$0xff] %v5377_v17  ;;  %v1273_v21 = vsel %vm1266_vm1, %v5374_v16, -inf }
  0x3e   :  { %4815 = vpow2.f32 %v1289_v19 }
  0x3f   :  { %4779 = vmatmul.mubr.msk.f32.gmra.mxu0 %vm111_vm0, %v97_v22  ;;  %v1274_v22 = vsel %vm1266_vm1, %v5377_v17, -inf }
  0x40   :  { %4799 = vmatmul.mubr.msk.f32.gmra.mxu1 %vm111_vm0, %v105_v23  ;;  %4781 = vmatprep.mubr.msk.f32.mxu0 %vm111_vm0, %v98_v24  ;;  %v1291_v23 = vmul.f32 1.442695, %v1279_v18  ;;  %v1293_v24 = vmul.f32 1.442695, %v1280_v20 }
  0x41   :  { %4801 = vmatprep.mubr.msk.f32.mxu1 %vm111_vm0, %v106_v25  ;;  %v1281_v25 = vsub.f32 %v5374_v16, %v1273_v21 }
  0x42   :  { %4817 = vpow2.f32 %v1291_v23 }
  0x43   :  { %4782 = vmatmul.mubr.msk.f32.gmra.mxu0 %vm111_vm0, %v99_v26  ;;  %v1282_v26 = vsub.f32 %v5377_v17, %v1274_v22  ;;  %4819 = vpow2.f32 %v1293_v24 }
  0x44   :  { %4802 = vmatmul.mubr.msk.f32.gmra.mxu1 %vm111_vm0, %v107_v27  ;;  %4784 = vmatprep.mubr.msk.f32.mxu0 %vm111_vm0, %v100_v28  ;;  %v1295_v27 = vmul.f32 1.442695, %v1281_v25 }
  0x45   :  { %4804 = vmatprep.mubr.msk.f32.mxu1 %vm111_vm0, %v108_v29  ;;  %v1297_v28 = vmul.f32 1.442695, %v1282_v26  ;;  %v5387_v29 = vpop.eup %4809 }
  0x46   :  { %4821 = vpow2.f32 %v1295_v27 }
  0x47   :  { %4785 = vmatmul.mubr.msk.f32.gmra.mxu0 %vm111_vm0, %v101_v30  ;;  %v5389_v30 = vpop.eup %4811  ;;  %4823 = vpow2.f32 %v1297_v28 }
  0x48   :  { %4805 = vmatmul.mubr.msk.f32.gmra.mxu1 %vm111_vm0, %v109_v31  ;;  %v1300_v31 = vsel %vm1299_vm2, %v5387_v29, 0.0  ;;  %v5393_v32 = vpop.eup %4813  ;;  %v1307_v33 = vsel %vm1299_vm2, %v5389_v30, 0.0 }
  0x49   :  { %v1301_v34 = vrot.slane %v1300_v31, 4  ;;  %v1308_v36 = vrot.slane %v1307_v33, 4  ;;  %v1314_v38 = vsel %vm1299_vm2, %v5393_v32, 0.0 }
  0x4a   :  { %v1315_v41 = vrot.slane %v1314_v38, 4 }
  0x4b   :  { %v5397_v35 = vpop.eup %4815  ;;  %v1302_v40 = vadd.f32 %v1301_v34, %v1300_v31  ;;  %v1309_v44 = vadd.f32 %v1308_v36, %v1307_v33 }
  0x4c   :  { %v1321_v42 = vsel %vm1299_vm2, %v5397_v35, 0.0  ;;  %v1316_v50 = vadd.f32 %v1315_v41, %v1314_v38 }
  0x4d   :  { %v1322_v46 = vrot.slane %v1321_v42, 4  ;;  %v1303_v48 = vrot.slane %v1302_v40, 2  ;;  %v1310_v54 = vrot.slane %v1309_v44, 2 }
  0x4e   :  { %v1317_v61 = vrot.slane %v1316_v50, 2 }
  0x4f   :  { %v5401_v39 = vpop.eup %4817  ;;  %v1323_v57 = vadd.f32 %v1322_v46, %v1321_v42  ;;  %v1304_v60 = vadd.f32 %v1303_v48, %v1302_v40  ;;  %v1311_v0 = vadd.f32 %v1310_v54, %v1309_v44 }
  0x50   :  { %v5405_v43 = vpop.eup %4819  ;;  %v1328_v47 = vsel %vm1299_vm2, %v5401_v39, 0.0  ;;  %v1318_v9 = vadd.f32 %v1317_v61, %v1316_v50 }
  0x51   :  { %v1335_v51 = vsel %vm1299_vm2, %v5405_v43, 0.0  ;;  %v1329_v56 = vrot.slane %v1328_v47, 4  ;;  %v1324_v3 = vrot.slane %v1323_v57, 2  ;;  %v1305_v7 = vrot.slane %v1304_v60, 1 }
  0x52   :  { %v1336_v59 = vrot.slane %v1335_v51, 4  ;;  %v1312_v11 = vrot.slane %v1311_v0, 1  ;;  %v1319_v19 = vrot.slane %v1318_v9, 1 }
  0x53   :  { %v5411_v52 = vpop.eup %4821  ;;  %v1330_v2 = vadd.f32 %v1329_v56, %v1328_v47  ;;  %v1325_v13 = vadd.f32 %v1324_v3, %v1323_v57  ;;  %v1306_v18 = vadd.f32 %v1305_v7, %v1304_v60 }
  0x54   :  { %v5413_v55 = vpop.eup %4823  ;;  %v1342_v63 = vsel %vm1299_vm2, %v5411_v52, 0.0  ;;  %v1337_v4 = vadd.f32 %v1336_v59, %v1335_v51  ;;  %v1313_v21 = vadd.f32 %v1312_v11, %v1311_v0  ;;  %v1320_v26 = vadd.f32 %v1319_v19, %v1318_v9 }
  0x55   :  { %v1349_v1 = vsel %vm1299_vm2, %v5413_v55, 0.0  ;;  %v1343_v6 = vrot.slane %v1342_v63, 4  ;;  %v1331_v12 = vrot.slane %v1330_v2, 2  ;;  %v1326_v23 = vrot.slane %v1325_v13, 1 }
  0x56   :  { %v1350_v10 = vrot.slane %v1349_v1, 4  ;;  %v1338_v14 = vrot.slane %v1337_v4, 2  ;;  %4825 = vrcp.f32 %v1306_v18 }
  0x57   :  { %v1344_v15 = vadd.f32 %v1343_v6, %v1342_v63  ;;  %v1332_v22 = vadd.f32 %v1331_v12, %v1330_v2  ;;  %4827 = vrcp.f32 %v1313_v21  ;;  %v1327_v31 = vadd.f32 %v1326_v23, %v1325_v13 }
  0x58   :  { %v1351_v20 = vadd.f32 %v1350_v10, %v1349_v1  ;;  %v1339_v24 = vadd.f32 %v1338_v14, %v1337_v4  ;;  %4829 = vrcp.f32 %v1320_v26 }
  0x59   :  { %v1345_v25 = vrot.slane %v1344_v15, 2  ;;  %v1333_v28 = vrot.slane %v1332_v22, 1  ;;  %4831 = vrcp.f32 %v1327_v31 }
  0x5a   :  { %v1352_v27 = vrot.slane %v1351_v20, 2  ;;  %v1340_v33 = vrot.slane %v1339_v24, 1 }
  0x5b   :  { %v1346_v34 = vadd.f32 %v1345_v25, %v1344_v15  ;;  %v1334_v38 = vadd.f32 %v1333_v28, %v1332_v22 }
  0x5c   :  { %v1353_v36 = vadd.f32 %v1352_v27, %v1351_v20  ;;  %v1341_v40 = vadd.f32 %v1340_v33, %v1339_v24 }
  0x5d   :  { %v1347_v41 = vrot.slane %v1346_v34, 1  ;;  %4833 = vrcp.f32 %v1334_v38 }
  0x5e   :  { %v1354_v42 = vrot.slane %v1353_v36, 1  ;;  %4835 = vrcp.f32 %v1341_v40 }
  0x5f   :  { %v1348_v44 = vadd.f32 %v1347_v41, %v1346_v34 }
  0x60   :  { %v1355_v46 = vadd.f32 %v1354_v42, %v1353_v36 }
  0x61   :  { %4837 = vrcp.f32 %v1348_v44 }
  0x62   :  { %4839 = vrcp.f32 %v1355_v46 }
  0x63   :  { %v4826_v47 = vpop.eup %4825 }
  0x64   :  { %v4828_v48 = vpop.eup %4827  ;;  %v1364_v50 = vmul.f32 %v4826_v47, %v5387_v29 }
  0x65   :  { %v4830_v51 = vpop.eup %4829  ;;  %v1365_v54 = vmul.f32 %v4828_v48, %v5389_v30 }
  0x66   :  { %v4832_v56 = vpop.eup %4831  ;;  %v1386_v57 = vrot.slane %v1364_v50, %v5326_v37  ;;  %v1366_v59 = vmul.f32 %v4830_v51, %v5393_v32 }
  0x67   :  { %v1410_v60 = vrot.slane %v1365_v54, %v5326_v37  ;;  %v1367_v0 = vmul.f32 %v4832_v56, %v5397_v35 }
  0x68   :  { %v1387_v61 = vcombine.high %v1386_v57, %v1386_v57  ;;  %v1394_v2 = vrot.slane %v1386_v57, %v5326_v37  ;;  %v1434_v29 = vrot.slane %v1366_v59, %v5326_v37 }
  0x69   :  { %v1418_v3 = vrot.slane %v1410_v60, %v5326_v37  ;;  %v1411_v4 = vcombine.high %v1410_v60, %v1410_v60  ;;  %v1458_v7 = vrot.slane %v1367_v0, %v5326_v37 }
  0x6a   :  { %v4834_v63 = vpop.eup %4833  ;;  %v1401_v30 = vrot.slane %v1387_v61, %v5326_v37  ;;  %v1402_v6 = vcombine.high %v1394_v2, %v1394_v2  ;;  %v1442_v12 = vrot.slane %v1434_v29, %v5326_v37  ;;  %v1435_v13 = vcombine.high %v1434_v29, %v1434_v29 }
  0x6b   :  { %v4836_v1 = vpop.eup %4835  ;;  %v1368_v32 = vmul.f32 %v4834_v63, %v5401_v39  ;;  %v5438_v15 = vrot.slane %v1394_v2, %v5334_v45  ;;  %v5441_v18 = vrot.slane %v1418_v3, %v5334_v45  ;;  %v1425_v19 = vrot.slane %v1411_v4, %v5326_v37 }
  0x6c   :  { %v1369_v9 = vmul.f32 %v4836_v1, %v5405_v43  ;;  %v1459_v39 = vcombine.high %v1458_v7, %v1458_v7  ;;  %v5449_v21 = vrot.slane %v1401_v30, %v5334_v45  ;;  %v5452_v22 = vrot.slane %v1402_v6, %v5334_v45 }
  0x6d   :  { %v1426_v23 = vcombine.high %v1418_v3, %v1418_v3  ;;  %v1403_v24 = vcombine.high %v1401_v30, %v1401_v30  ;;  %v1427_v25 = vcombine.high %v1425_v19, %v1425_v19  ;;  %v1466_v26 = vrot.slane %v1458_v7, %v5326_v37 }
  0x6e   :  { %v4838_v10 = vpop.eup %4837  ;;  %v1482_v27 = vrot.slane %v1368_v32, %v5326_v37  ;;  %v1506_v28 = vrot.slane %v1369_v9, %v5326_v37  ;;  %v5462_v34 = vrot.slane %v1442_v12, %v5334_v45  ;;  %v1449_v36 = vrot.slane %v1435_v13, %v5326_v37 }
  0x6f   :  { %v4840_v14 = vpop.eup %4839  ;;  %v1370_v38 = vmul.f32 %v4838_v10, %v5411_v52  ;;  %v1473_v41 = vrot.slane %v1459_v39, %v5326_v37  ;;  %v1450_v42 = vcombine.high %v1442_v12, %v1442_v12  ;;  %v5469_v47 = vrot.slane %v1425_v19, %v5334_v45 }
  0x70   :  { %v1371_v40 = vmul.f32 %v4840_v14, %v5413_v55  ;;  %v1483_v44 = vcombine.high %v1482_v27, %v1482_v27  ;;  %v1507_v46 = vcombine.high %v1506_v28, %v1506_v28  ;;  %v5476_v51 = vrot.slane %v1426_v23, %v5334_v45 }
  0x71   :  { %v5479_v54 = vrot.slane %v1403_v24, %v5334_v45  ;;  %v1474_v52 = vcombine.high %v1466_v26, %v1466_v26  ;;  %v5482_v55 = vrot.slane %v1427_v25, %v5334_v45  ;;  %v5485_v56 = vrot.slane %v1466_v26, %v5334_v45 }
  0x72   :  { %v1451_v57 = vcombine.high %v1449_v36, %v1449_v36  ;;  %v1475_v59 = vcombine.high %v1473_v41, %v1473_v41  ;;  %v5492_v63 = vrot.slane %v1449_v36, %v5334_v45  ;;  %v1490_v0 = vrot.slane %v1482_v27, %v5326_v37 }
  0x73   :  { %v1530_v1 = vrot.slane %v1370_v38, %v5326_v37  ;;  %v1554_v2 = vrot.slane %v1371_v40, %v5326_v37  ;;  %v5498_v29 = vrot.slane %v1450_v42, %v5334_v45  ;;  %v1514_v3 = vrot.slane %v1506_v28, %v5326_v37 }
  0x74   :  { %v1497_v4 = vrot.slane %v1483_v44, %v5326_v37  ;;  %v1521_v30 = vrot.slane %v1507_v46, %v5326_v37  ;;  %v5508_v32 = vrot.slane %v1474_v52, %v5334_v45  ;;  %v1498_v9 = vcombine.high %v1490_v0, %v1490_v0 }
  0x75   :  { %v1531_v10 = vcombine.high %v1530_v1, %v1530_v1  ;;  %v1555_v12 = vcombine.high %v1554_v2, %v1554_v2  ;;  %v5511_v13 = vrot.slane %v1473_v41, %v5334_v45  ;;  %v5514_v14 = vrot.slane %v1451_v57, %v5334_v45 }
  0x76   :  { %v5517_v19 = vrot.slane %v1475_v59, %v5334_v45  ;;  %v1522_v39 = vcombine.high %v1514_v3, %v1514_v3  ;;  %v5524_v25 = vrot.slane %v1490_v0, %v5334_v45  ;;  %v1499_v26 = vcombine.high %v1497_v4, %v1497_v4 }
  0x77   :  { %v1523_v27 = vcombine.high %v1521_v30, %v1521_v30  ;;  %v1538_v28 = vrot.slane %v1530_v1, %v5326_v37  ;;  %v5528_v36 = vrot.slane %v1514_v3, %v5334_v45  ;;  %v5531_v38 = vrot.slane %v1497_v4, %v5334_v45 }
  0x78   :  { %v5534_v40 = vrot.slane %v1521_v30, %v5334_v45  ;;  %v1562_v41 = vrot.slane %v1554_v2, %v5326_v37  ;;  %v5542_v46 = vrot.slane %v1498_v9, %v5334_v45  ;;  %v1545_v52 = vrot.slane %v1531_v10, %v5326_v37 }
  0x79   :  { %v1569_v57 = vrot.slane %v1555_v12, %v5326_v37  ;;  %v1546_v59 = vcombine.high %v1538_v28, %v1538_v28  ;;  %v5551_v2 = vrot.slane %v1522_v39, %v5334_v45  ;;  %v5560_v10 = vrot.slane %v1499_v26, %v5334_v45 }
  0x7a   :  { %v1570_v3 = vcombine.high %v1562_v41, %v1562_v41  ;;  %v5563_v12 = vrot.slane %v1523_v27, %v5334_v45  ;;  %v5580_v26 = vrot.slane %v1545_v52, %v5334_v45  ;;  %v1547_v5 = vcombine.high %v1545_v52, %v1545_v52 }
  0x7b   :  { %v5583_v27 = vrot.slane %v1569_v57, %v5334_v45  ;;  %v5586_v8 = vrot.slane %v1546_v59, %v5334_v45  ;;  %v1571_v53 = vcombine.high %v1569_v57, %v1569_v57 }
  0xcb   :  { %v5432_v11 = vpop.f32.mrf.mxu0 }
  0xcc   :  { %7840 = vst [vmem:[#allocation12_spill] sm:$0xff] %v5432_v11  ;;  %v5434_v35 = vpop.f32.mrf.mxu1  ;;  %v1733_v0 = vmul.f32 %v5432_v11, %v5438_v15 }
  0xcd   :  { %7841 = vst [vmem:[#allocation13_spill] sm:$0xff] %v5434_v35  ;;  %v5444_v20 = vpop.f32.mrf.mxu0  ;;  %v1741_v1 = vmul.f32 %v5434_v35, %v5441_v18 }
  0xce   :  { %7842 = vst [vmem:[#allocation14_spill] sm:$0xff] %v5444_v20  ;;  %v5446_v43 = vpop.f32.mrf.mxu1  ;;  %v1732_v4 = vmul.f32 %v5438_v15, %v5444_v20  ;;  %v5572_v15 = vrot.slane %v1538_v28, %v5334_v45  ;;  %v1811_v62 = vsel %vm1266_vm1, %v1733_v0, 0.0 }
  0xcf   :  { %7843 = vst [vmem:[#allocation15_spill] sm:$0xff] %v5446_v43  ;;  %v5457_v31 = vpop.f32.mrf.mxu0  ;;  %v1740_v30 = vmul.f32 %v5441_v18, %v5446_v43  ;;  %v5575_v18 = vrot.slane %v1562_v41, %v5334_v45  ;;  %v1812_v28 = vsel %vm1266_vm1, %v1741_v1, 0.0  ;;  %v5593_v41 = vrot.slane %v1570_v3, %v5334_v45 }
  0xd0   :  { %7844 = vst [vmem:[#allocation16_spill] sm:$0xff] %v5457_v31  ;;  %v5459_v33 = vpop.f32.mrf.mxu1  ;;  %v1735_v37 = vmul.f32 %v5457_v31, %v5449_v21  ;;  %v1796_v49 = vsel %vm1266_vm1, %v1732_v4, 0.0 }
  0xd1   :  { %7845 = vst [vmem:[#allocation17_spill] sm:$0xff] %v5459_v33  ;;  %v5471_v48 = vpop.f32.mrf.mxu0  ;;  %v1743_v39 = vmul.f32 %v5459_v33, %v5469_v47  ;;  %v1797_v33 = vsel %vm1266_vm1, %v1740_v30, 0.0 }
  0xd2   :  { %7846 = vst [vmem:[#allocation18_spill] sm:$0xff] %v5471_v48  ;;  %v5473_v50 = vpop.f32.mrf.mxu1  ;;  %v1734_v31 = vmul.f32 %v5449_v21, %v5471_v48  ;;  %v1841_v0 = vsel %vm1266_vm1, %v1735_v37, 0.0 }
  0xd3   :  { %7847 = vst [vmem:[#allocation19_spill] sm:$0xff] %v5473_v50  ;;  %v5487_v60 = vpop.f32.mrf.mxu0  ;;  %v1742_v52 = vmul.f32 %v5469_v47, %v5473_v50  ;;  %v1842_v1 = vsel %vm1266_vm1, %v1743_v39, 0.0  ;;  %v5620_v39 = vrot.slane %v1547_v5, %v5334_v45 }
  0xd4   :  { %7848 = vst [vmem:[#allocation20_spill] sm:$0xff] %v5487_v60  ;;  %v5489_v61 = vpop.f32.mrf.mxu1  ;;  %v1737_v3 = vmul.f32 %v5487_v60, %v5452_v22  ;;  %v1813_v60 = vadd.f32 %v1812_v28, %v1811_v62 }
  0xd5   :  { %7849 = vst [vmem:[#allocation21_spill] sm:$0xff] %v5489_v61  ;;  %v5503_v6 = vpop.f32.mrf.mxu0  ;;  %v1745_v57 = vmul.f32 %v5489_v61, %v5476_v51 }
  0xd6   :  { %7850 = vst [vmem:[#allocation22_spill] sm:$0xff] %v5503_v6  ;;  %v5505_v7 = vpop.f32.mrf.mxu1  ;;  %v1736_v21 = vmul.f32 %v5452_v22, %v5503_v6  ;;  %v5629_v22 = vrot.slane %v1571_v53, %v5334_v45  ;;  %v1827_v6 = vsel %vm1266_vm1, %v1742_v52, 0.0  ;;  %v1871_v62 = vsel %vm1266_vm1, %v1737_v3, 0.0 }
  0xd7   :  { %7851 = vst [vmem:[#allocation23_spill] sm:$0xff] %v5505_v7  ;;  %v5519_v23 = vpop.f32.mrf.mxu0  ;;  %v1744_v47 = vmul.f32 %v5476_v51, %v5505_v7  ;;  %v1798_v51 = vadd.f32 %v1797_v33, %v1796_v49  ;;  %v1843_v7 = vadd.f32 %v1842_v1, %v1841_v0  ;;  %v1872_v28 = vsel %vm1266_vm1, %v1745_v57, 0.0 }
  0xd8   :  { %7852 = vst [vmem:[#allocation24_spill] sm:$0xff] %v5519_v23  ;;  %v5521_v24 = vpop.f32.mrf.mxu1  ;;  %v1739_v30 = vmul.f32 %v5519_v23, %v5479_v54  ;;  %v1826_v23 = vsel %vm1266_vm1, %v1734_v31, 0.0  ;;  %v1856_v49 = vsel %vm1266_vm1, %v1736_v21, 0.0 }
  0xd9   :  { %7853 = vst [vmem:[#allocation25_spill] sm:$0xff] %v5521_v24  ;;  %v5537_v42 = vpop.f32.mrf.mxu0  ;;  %v1747_v61 = vmul.f32 %v5521_v24, %v5482_v55  ;;  %v1857_v31 = vsel %vm1266_vm1, %v1744_v47, 0.0  ;;  %v1828_v21 = vadd.f32 %v1827_v6, %v1826_v23  ;;  %v1873_v47 = vadd.f32 %v1872_v28, %v1871_v62 }
  0xda   :  { %7854 = vst [vmem:[#allocation26_spill] sm:$0xff] %v5537_v42  ;;  %v5539_v44 = vpop.f32.mrf.mxu1  ;;  %v1738_v24 = vmul.f32 %v5479_v54, %v5537_v42  ;;  %v1901_v33 = vsel %vm1266_vm1, %v1739_v30, 0.0  ;;  %v1858_v23 = vadd.f32 %v1857_v31, %v1856_v49 }
  0xdb   :  { %7855 = vst [vmem:[#allocation27_spill] sm:$0xff] %v5539_v44  ;;  %v5557_v9 = vpop.f32.mrf.mxu0  ;;  %v1902_v1 = vsel %vm1266_vm1, %v1747_v61, 0.0 }
  0xdc   :  { %7856 = vst [vmem:[#allocation28_spill] sm:$0xff] %v5557_v9  ;;  %v5569_v17 = vpop.f32.mrf.mxu1  ;;  %v1749_v50 = vmul.f32 %v5557_v9, %v5462_v34  ;;  %v1746_v9 = vmul.f32 %v5482_v55, %v5539_v44  ;;  %v1903_v62 = vadd.f32 %v1902_v1, %v1901_v33 }
  0xdd   :  { %7857 = vst [vmem:[#allocation29_spill] sm:$0xff] %v5569_v17  ;;  %v5577_v16 = vpop.f32.mrf.mxu0  ;;  %v1757_v52 = vmul.f32 %v5569_v17, %v5485_v56 }
  0xde   :  { %7858 = vst [vmem:[#allocation30_spill] sm:$0xff] %v5577_v16  ;;  %v5590_v58 = vpop.f32.mrf.mxu1  ;;  %v1814_v54 = vsel %vm1266_vm1, %v1749_v50, 0.0  ;;  %v1748_v55 = vmul.f32 %v5462_v34, %v5577_v16  ;;  %v1886_v50 = vsel %vm1266_vm1, %v1738_v24, 0.0  ;;  %v1887_v61 = vsel %vm1266_vm1, %v1746_v9, 0.0 }
  0xdf   :  { %7859 = vst [vmem:[#allocation31_spill] sm:$0xff] %v5590_v58  ;;  %v5601_v59 = vpop.f32.mrf.mxu0  ;;  %v1816_v28 = vsel %vm1266_vm1, %v1757_v52, 0.0  ;;  %v1756_v24 = vmul.f32 %v5485_v56, %v5590_v58 }
  0xe0   :  { %7860 = vst [vmem:[#allocation32_spill] sm:$0xff] %v5601_v59  ;;  %v5609_v4 = vpop.f32.mrf.mxu1  ;;  %v1751_v3 = vmul.f32 %v5601_v59, %v5492_v63  ;;  %v1799_v59 = vsel %vm1266_vm1, %v1748_v55, 0.0 }
  0xe1   :  { %7861 = vst [vmem:[#allocation33_spill] sm:$0xff] %v5609_v4  ;;  %v5617_v37 = vpop.f32.mrf.mxu0 }
  0xe2   :  { %7862 = vst [vmem:[#allocation34_spill] sm:$0xff] %v5617_v37  ;;  %v5626_v48 = vpop.f32.mrf.mxu1  ;;  %v1750_v30 = vmul.f32 %v5492_v63, %v5617_v37  ;;  %v1815_v63 = vadd.f32 %v1814_v54, %v1813_v60  ;;  %v1844_v9 = vsel %vm1266_vm1, %v1751_v3, 0.0 }
  0xe3   :  { %7863 = vst [vmem:[#allocation35_spill] sm:$0xff] %v5626_v48  ;;  %v5633_v5 = vpop.f32.mrf.mxu0 }
  0xe4   :  { %7864 = vst [vmem:[#allocation36_spill] sm:$0xff] %v5633_v5  ;;  %v5641_v53 = vpop.f32.mrf.mxu1  ;;  %v1753_v45 = vmul.f32 %v5633_v5, %v5498_v29  ;;  %v1829_v49 = vsel %vm1266_vm1, %v1750_v30, 0.0  ;;  %v1817_v3 = vadd.f32 %v1816_v28, %v1815_v63  ;;  %v1800_v30 = vadd.f32 %v1799_v59, %v1798_v51 }
  0xe5   :  { %7865 = vst [vmem:[#allocation37_spill] sm:$0xff] %v5641_v53  ;;  %v5648_v0 = vpop.f32.mrf.mxu0  ;;  %v1761_v31 = vmul.f32 %v5641_v53, %v5508_v32  ;;  %v1830_v53 = vadd.f32 %v1829_v49, %v1828_v21 }
  0xe6   :  { %7866 = vst [vmem:[#allocation38_spill] sm:$0xff] %v5648_v0  ;;  %v5656_v57 = vpop.f32.mrf.mxu1  ;;  %v1752_v34 = vmul.f32 %v5498_v29, %v5648_v0  ;;  %v1759_v29 = vmul.f32 %v5609_v4, %v5511_v13  ;;  %v1888_v0 = vadd.f32 %v1887_v61, %v1886_v50  ;;  %v1874_v60 = vsel %vm1266_vm1, %v1753_v45, 0.0 }
  0xe7   :  { %7867 = vst [vmem:[#allocation39_spill] sm:$0xff] %v5656_v57  ;;  %v5662_v44 = vpop.f32.mrf.mxu0  ;;  %v1845_v45 = vadd.f32 %v1844_v9, %v1843_v7  ;;  %v1758_v50 = vmul.f32 %v5511_v13, %v5626_v48  ;;  %v1876_v63 = vsel %vm1266_vm1, %v1761_v31, 0.0 }
  0xe8   :  { %7868 = vst [vmem:[#allocation40_spill] sm:$0xff] %v5662_v44  ;;  %v1755_v42 = vmul.f32 %v5662_v44, %v5514_v14  ;;  %v5670_v6 = vpop.f32.mrf.mxu1  ;;  %v1859_v52 = vsel %vm1266_vm1, %v1752_v34, 0.0  ;;  %v1801_v34 = vsel %vm1266_vm1, %v1756_v24, 0.0 }
  0xe9   :  { %7869 = vst [vmem:[#allocation41_spill] sm:$0xff] %v5670_v6  ;;  %v5673_v5 = vpop.f32.mrf.mxu0  ;;  %v1763_v1 = vmul.f32 %v5670_v6, %v5517_v19  ;;  %v1760_v6 = vmul.f32 %v5508_v32, %v5656_v57  ;;  %v1860_v59 = vadd.f32 %v1859_v52, %v1858_v23  ;;  %v1802_v9 = vadd.f32 %v1801_v34, %v1800_v30 }
  0xea   :  { %7870 = vst [vmem:[#allocation42_spill] sm:$0xff] %v5673_v5  ;;  %v5681_v44 = vpop.f32.mrf.mxu1  ;;  %v1904_v56 = vsel %vm1266_vm1, %v1755_v42, 0.0  ;;  %v1754_v54 = vmul.f32 %v5514_v14, %v5673_v5  ;;  %v1846_v42 = vsel %vm1266_vm1, %v1759_v29, 0.0  ;;  %v1875_v14 = vadd.f32 %v1874_v60, %v1873_v47 }
  0xeb   :  { %7871 = vst [vmem:[#allocation43_spill] sm:$0xff] %v5681_v44  ;;  %v5687_v33 = vpop.f32.mrf.mxu0  ;;  %v1905_v7 = vadd.f32 %v1904_v56, %v1903_v62  ;;  %v1906_v13 = vsel %vm1266_vm1, %v1763_v1, 0.0  ;;  %v1847_v47 = vadd.f32 %v1846_v42, %v1845_v45  ;;  %v1831_v29 = vsel %vm1266_vm1, %v1758_v50, 0.0 }
  0xec   :  { %7872 = vst [vmem:[#allocation44_spill] sm:$0xff] %v5687_v33  ;;  %v5695_v55 = vpop.f32.mrf.mxu1  ;;  %v1889_v28 = vsel %vm1266_vm1, %v1754_v54, 0.0  ;;  %v1765_v24 = vmul.f32 %v5687_v33, %v5524_v25  ;;  %v1832_v49 = vadd.f32 %v1831_v29, %v1830_v53  ;;  %v1861_v60 = vsel %vm1266_vm1, %v1760_v6, 0.0 }
  0xed   :  { %7873 = vst [vmem:[#allocation45_spill] sm:$0xff] %v5695_v55  ;;  %v5699_v61 = vpop.f32.mrf.mxu0  ;;  %v1762_v31 = vmul.f32 %v5517_v19, %v5681_v44  ;;  %v1877_v56 = vadd.f32 %v1876_v63, %v1875_v14  ;;  %v1862_v1 = vadd.f32 %v1861_v60, %v1860_v59  ;;  %v1907_v54 = vadd.f32 %v1906_v13, %v1905_v7 }
  0xee   :  { %7874 = vst [vmem:[#allocation46_spill] sm:$0xff] %v5699_v61  ;;  %v5705_v4 = vpop.f32.mrf.mxu1  ;;  %v1764_v21 = vmul.f32 %v5524_v25, %v5699_v61  ;;  %v1890_v30 = vadd.f32 %v1889_v28, %v1888_v0  ;;  %v1818_v50 = vsel %vm1266_vm1, %v1765_v24, 0.0  ;;  %v1773_v53 = vmul.f32 %v5695_v55, %v5528_v36 }
  0xef   :  { %7875 = vst [vmem:[#allocation47_spill] sm:$0xff] %v5705_v4  ;;  %v5708_v51 = vpop.f32.mrf.mxu0  ;;  %v1891_v59 = vsel %vm1266_vm1, %v1762_v31, 0.0 }
  0xf0   :  { %7876 = vst [vmem:[#allocation48_spill] sm:$0xff] %v5708_v51  ;;  %v5716_v32 = vpop.f32.mrf.mxu1  ;;  %v1767_v23 = vmul.f32 %v5708_v51, %v5531_v38  ;;  %v1803_v6 = vsel %vm1266_vm1, %v1764_v21, 0.0  ;;  %v1892_v24 = vadd.f32 %v1891_v59, %v1890_v30  ;;  %v1819_v21 = vadd.f32 %v1818_v50, %v1817_v3 }
  0xf1   :  { %7877 = vst [vmem:[#allocation49_spill] sm:$0xff] %v5716_v32  ;;  %v5721_v62 = vpop.f32.mrf.mxu0  ;;  %v1775_v0 = vmul.f32 %v5716_v32, %v5534_v40  ;;  %v1804_v29 = vadd.f32 %v1803_v6, %v1802_v9  ;;  %v1820_v31 = vsel %vm1266_vm1, %v1773_v53, 0.0 }
  0xf2   :  { %7878 = vst [vmem:[#allocation50_spill] sm:$0xff] %v5721_v62  ;;  %v1766_v25 = vmul.f32 %v5531_v38, %v5721_v62  ;;  %v5728_v52 = vpop.f32.mrf.mxu1  ;;  %v1772_v38 = vmul.f32 %v5528_v36, %v5705_v4  ;;  %v1848_v42 = vsel %vm1266_vm1, %v1767_v23, 0.0 }
  0xf3   :  { %7879 = vst [vmem:[#allocation51_spill] sm:$0xff] %v5728_v52  ;;  %v5730_v45 = vpop.f32.mrf.mxu0  ;;  %v1774_v23 = vmul.f32 %v5534_v40, %v5728_v52  ;;  %v1850_v30 = vsel %vm1266_vm1, %v1775_v0, 0.0 }
  0xf4   :  { %7880 = vst [vmem:[#allocation52_spill] sm:$0xff] %v5730_v45  ;;  %v1769_v19 = vmul.f32 %v5730_v45, %v5542_v46  ;;  %v5738_v34 = vpop.f32.mrf.mxu1  ;;  %v1833_v14 = vsel %vm1266_vm1, %v1766_v25, 0.0  ;;  %v1849_v25 = vadd.f32 %v1848_v42, %v1847_v47 }
  0xf5   :  { %7881 = vst [vmem:[#allocation53_spill] sm:$0xff] %v5738_v34  ;;  %v5746_v63 = vpop.f32.mrf.mxu0  ;;  %v1777_v13 = vmul.f32 %v5738_v34, %v5551_v2 }
  0xf6   :  { %7882 = vst [vmem:[#allocation54_spill] sm:$0xff] %v5746_v63  ;;  %v1878_v7 = vsel %vm1266_vm1, %v1769_v19, 0.0  ;;  %v1768_v28 = vmul.f32 %v5542_v46, %v5746_v63  ;;  %v5754_v36 = vpop.f32.mrf.mxu1  ;;  %v1834_v19 = vadd.f32 %v1833_v14, %v1832_v49  ;;  %v1805_v46 = vsel %vm1266_vm1, %v1772_v38, 0.0 }
  0xf7   :  { %7883 = vst [vmem:[#allocation55_spill] sm:$0xff] %v5754_v36  ;;  %v5758_v60 = vpop.f32.mrf.mxu0  ;;  %v1879_v3 = vadd.f32 %v1878_v7, %v1877_v56  ;;  %v1880_v40 = vsel %vm1266_vm1, %v1777_v13, 0.0  ;;  %v1821_v38 = vadd.f32 %v1820_v31, %v1819_v21  ;;  %v1806_v42 = vadd.f32 %v1805_v46, %v1804_v29 }
  0xf8   :  { %7884 = vst [vmem:[#allocation56_spill] sm:$0xff] %v5758_v60  ;;  %v1771_v44 = vmul.f32 %v5758_v60, %v5560_v10  ;;  %v5763_v5 = vpop.f32.mrf.mxu1  ;;  %v1863_v9 = vsel %vm1266_vm1, %v1768_v28, 0.0  ;;  %v1835_v56 = vsel %vm1266_vm1, %v1774_v23, 0.0  ;;  %v1776_v0 = vmul.f32 %v5551_v2, %v5754_v36 }
  0xf9   :  { %7885 = vst [vmem:[#allocation57_spill] sm:$0xff] %v5763_v5  ;;  %v5768_v50 = vpop.f32.mrf.mxu0  ;;  %v1779_v47 = vmul.f32 %v5763_v5, %v5563_v12  ;;  %v1851_v59 = vadd.f32 %v1850_v30, %v1849_v25  ;;  %v1836_v7 = vadd.f32 %v1835_v56, %v1834_v19 }
  0xfa   :  { %7886 = vst [vmem:[#allocation58_spill] sm:$0xff] %v5768_v50  ;;  %v1908_v53 = vsel %vm1266_vm1, %v1771_v44, 0.0  ;;  %v1770_v49 = vmul.f32 %v5560_v10, %v5768_v50  ;;  %v5776_v6 = vpop.f32.mrf.mxu1  ;;  %v1864_v44 = vadd.f32 %v1863_v9, %v1862_v1  ;;  %v1881_v10 = vadd.f32 %v1880_v40, %v1879_v3 }
  0xfb   :  { %7887 = vst [vmem:[#allocation59_spill] sm:$0xff] %v5776_v6  ;;  %v5781_v14 = vpop.f32.mrf.mxu0  ;;  %v1909_v5 = vadd.f32 %v1908_v53, %v1907_v54  ;;  %v1910_v2 = vsel %vm1266_vm1, %v1779_v47, 0.0  ;;  %v1778_v31 = vmul.f32 %v5563_v12, %v5776_v6  ;;  %v1865_v54 = vsel %vm1266_vm1, %v1776_v0, 0.0 }
  0xfc   :  { %7888 = vst [vmem:[#allocation60_spill] sm:$0xff] %v5781_v14  ;;  %v1781_v13 = vmul.f32 %v5781_v14, %v5572_v15  ;;  %v5785_v28 = vpop.f32.mrf.mxu1  ;;  %v1893_v21 = vsel %vm1266_vm1, %v1770_v49, 0.0  ;;  %v1866_v40 = vadd.f32 %v1865_v54, %v1864_v44 }
  0xfd   :  { %7889 = vst [vmem:[#allocation61_spill] sm:$0xff] %v5785_v28  ;;  %v1789_v29 = vmul.f32 %v5785_v28, %v5575_v18  ;;  %v5790_v23 = vpop.f32.mrf.mxu0  ;;  %v1894_v53 = vadd.f32 %v1893_v21, %v1892_v24  ;;  %v1911_v49 = vadd.f32 %v1910_v2, %v1909_v5 }
  0xfe   :  { %7890 = vst [vmem:[#allocation62_spill] sm:$0xff] %v5790_v23  ;;  %v1822_v1 = vsel %vm1266_vm1, %v1781_v13, 0.0  ;;  %v1780_v25 = vmul.f32 %v5572_v15, %v5790_v23  ;;  %v5798_v19 = vpop.f32.mrf.mxu1 }
  0xff   :  { %7891 = vst [vmem:[#allocation63_spill] sm:$0xff] %v5798_v19  ;;  %v1823_v46 = vadd.f32 %v1822_v1, %v1821_v38  ;;  %v1824_v30 = vsel %vm1266_vm1, %v1789_v29, 0.0  ;;  %v1788_v3 = vmul.f32 %v5575_v18, %v5798_v19  ;;  %v5804_v9 = vpop.f32.mrf.mxu0  ;;  %v1895_v18 = vsel %vm1266_vm1, %v1778_v31, 0.0 }
 0x100   :  { %7892 = vst [vmem:[#allocation64_spill] sm:$0xff] %v5804_v9  ;;  %v1807_v12 = vsel %vm1266_vm1, %v1780_v25, 0.0  ;;  %v1783_v47 = vmul.f32 %v5804_v9, %v5580_v26  ;;  %v5809_v15 = vpop.f32.mrf.mxu1 }
 0x101   :  { %7893 = vst [vmem:[#allocation65_spill] sm:$0xff] %v5809_v15  ;;  %v5811_v56 = vadd.f32 %v1824_v30, %v1823_v46  ;;  %v1808_v38 = vadd.f32 %v1807_v12, %v1806_v42  ;;  %v1791_v0 = vmul.f32 %v5809_v15, %v5583_v27  ;;  %v5815_v13 = vpop.f32.mrf.mxu0  ;;  %v1809_v24 = vsel %vm1266_vm1, %v1788_v3, 0.0 }
 0x102   :  { %7894 = vst [vmem:[#allocation66_spill] sm:$0xff] %v5815_v13  ;;  %v1852_v44 = vsel %vm1266_vm1, %v1783_v47, 0.0  ;;  %v1782_v21 = vmul.f32 %v5580_v26, %v5815_v13  ;;  %v5822_v29 = vpop.f32.mrf.mxu1  ;;  %v1896_v30 = vadd.f32 %v1895_v18, %v1894_v53 }
 0x103   :  { %7895 = vst [vmem:[#allocation67_spill] sm:$0xff] %v5822_v29  ;;  %v1917_v5 = vmul.f32 %v5811_v56, %v5811_v56  ;;  %v5826_v42 = vadd.f32 %v1809_v24, %v1808_v38  ;;  %v1853_v2 = vadd.f32 %v1852_v44, %v1851_v59  ;;  %v1854_v1 = vsel %vm1266_vm1, %v1791_v0, 0.0  ;;  %v5829_v25 = vpop.f32.mrf.mxu0 }
 0x104   :  { %7896 = vst [vmem:[#allocation68_spill] sm:$0xff] %v5829_v25  ;;  %v1837_v31 = vsel %vm1266_vm1, %v1782_v21, 0.0  ;;  %v1790_v54 = vmul.f32 %v5583_v27, %v5822_v29  ;;  %v1785_v26 = vmul.f32 %v5829_v25, %v5586_v8  ;;  %v5836_v46 = vpop.f32.mrf.mxu1 }
 0x105   :  { %7897 = vst [vmem:[#allocation69_spill] sm:$0xff] %v5836_v46  ;;  %v1925_v3 = vsel %vm1266_vm1, %v1917_v5, 0.0  ;;  %v1916_v59 = vmul.f32 %v5826_v42, %v5826_v42  ;;  %v5841_v12 = vadd.f32 %v1854_v1, %v1853_v2  ;;  %v1838_v47 = vadd.f32 %v1837_v31, %v1836_v7  ;;  %v5843_v38 = vpop.f32.mrf.mxu0 }
 0x106   :  { %7898 = vst [vmem:[#allocation70_spill] sm:$0xff] %v5843_v38  ;;  %v1839_v0 = vsel %vm1266_vm1, %v1790_v54, 0.0  ;;  %v1882_v27 = vsel %vm1266_vm1, %v1785_v26, 0.0  ;;  %v1793_v24 = vmul.f32 %v5836_v46, %v5593_v41  ;;  %v1784_v53 = vmul.f32 %v5586_v8, %v5843_v38  ;;  %v5851_v18 = vpop.f32.mrf.mxu1 }
 0x107   :  { %7899 = vst [vmem:[#allocation71_spill] sm:$0xff] %v5851_v18  ;;  %v1924_v44 = vsel %vm1266_vm1, %v1916_v59, 0.0  ;;  %v1919_v21 = vmul.f32 %v5841_v12, %v5841_v12  ;;  %v5856_v7 = vadd.f32 %v1839_v0, %v1838_v47  ;;  %v1883_v5 = vadd.f32 %v1882_v27, %v1881_v10  ;;  %v5858_v2 = vpop.f32.mrf.mxu0 }
 0x108   :  { %7900 = vst [vmem:[#allocation72_spill] sm:$0xff] %v5858_v2  ;;  %v1926_v1 = vadd.f32 %v1925_v3, %v1924_v44  ;;  %v1884_v31 = vsel %vm1266_vm1, %v1793_v24, 0.0  ;;  %v1867_v54 = vsel %vm1266_vm1, %v1784_v53, 0.0  ;;  %v1792_v8 = vmul.f32 %v5593_v41, %v5851_v18  ;;  %v5864_v26 = vpop.f32.mrf.mxu1 }
 0x109   :  { %7901 = vst [vmem:[#allocation73_spill] sm:$0xff] %v5864_v26  ;;  %v1934_v59 = vsel %vm1266_vm1, %v1919_v21, 0.0  ;;  %v1918_v6 = vmul.f32 %v5856_v7, %v5856_v7  ;;  %v5869_v47 = vadd.f32 %v1884_v31, %v1883_v5  ;;  %v1868_v10 = vadd.f32 %v1867_v54, %v1866_v40  ;;  %v5871_v0 = vpop.f32.mrf.mxu0 }
 0x10a   :  { %7902 = vst [vmem:[#allocation74_spill] sm:$0xff] %v5871_v0  ;;  %v1927_v3 = vrot.slane %v1926_v1, 4  ;;  %v1869_v27 = vsel %vm1266_vm1, %v1792_v8, 0.0  ;;  %v1786_v24 = vmul.f32 %v5620_v39, %v5871_v0  ;;  %v1787_v41 = vmul.f32 %v5858_v2, %v5620_v39  ;;  %v5878_v53 = vpop.f32.mrf.mxu1 }
 0x10b   :  { %7903 = vst [vmem:[#allocation75_spill] sm:$0xff] %v5878_v53  ;;  %v1933_v44 = vsel %vm1266_vm1, %v1918_v6, 0.0  ;;  %v1921_v21 = vmul.f32 %v5869_v47, %v5869_v47  ;;  %v5883_v5 = vadd.f32 %v1869_v27, %v1868_v10  ;;  %v1794_v40 = vmul.f32 %v5629_v22, %v5878_v53 }
 0x10c   :  { %v1928_v31 = vadd.f32 %v1927_v3, %v1926_v1  ;;  %v1935_v54 = vadd.f32 %v1934_v59, %v1933_v44  ;;  %v1897_v8 = vsel %vm1266_vm1, %v1786_v24, 0.0  ;;  %v1912_v0 = vsel %vm1266_vm1, %v1787_v41, 0.0 }
 0x10d   :  { %v1920_v39 = vmul.f32 %v5883_v5, %v5883_v5  ;;  %v1898_v2 = vadd.f32 %v1897_v8, %v1896_v30  ;;  %v1913_v60 = vadd.f32 %v1912_v0, %v1911_v49  ;;  %v1795_v10 = vmul.f32 %v5864_v26, %v5629_v22 }
 0x10e   :  { %v1929_v6 = vrot.slane %v1928_v31, 2  ;;  %v1936_v50 = vrot.slane %v1935_v54, 4  ;;  %v1899_v27 = vsel %vm1266_vm1, %v1794_v40, 0.0  ;;  %v1943_v53 = vsel %vm1266_vm1, %v1921_v21, 0.0 }
 0x10f   :  { %v1942_v1 = vsel %vm1266_vm1, %v1920_v39, 0.0  ;;  %v5896_v59 = vadd.f32 %v1899_v27, %v1898_v2  ;;  %v1914_v44 = vsel %vm1266_vm1, %v1795_v10, 0.0 }
 0x110   :  { %v1930_v3 = vadd.f32 %v1929_v6, %v1928_v31  ;;  %v1937_v24 = vadd.f32 %v1936_v50, %v1935_v54  ;;  %v1944_v41 = vadd.f32 %v1943_v53, %v1942_v1  ;;  %v5899_v30 = vadd.f32 %v1914_v44, %v1913_v60 }
 0x111   :  { %v1922_v49 = vmul.f32 %v5896_v59, %v5896_v59 }
 0x112   :  { %v1931_v0 = vrot.slane %v1930_v3, 1  ;;  %v1938_v22 = vrot.slane %v1937_v24, 2  ;;  %v1945_v8 = vrot.slane %v1944_v41, 4  ;;  %v1923_v21 = vmul.f32 %v5899_v30, %v5899_v30 }
 0x113   :  { %v1951_v50 = vsel %vm1266_vm1, %v1922_v49, 0.0 }
 0x114   :  { %v5905_v40 = vadd.f32 %v1931_v0, %v1930_v3  ;;  %v1939_v2 = vadd.f32 %v1938_v22, %v1937_v24  ;;  %v1946_v39 = vadd.f32 %v1945_v8, %v1944_v41  ;;  %v1952_v60 = vsel %vm1266_vm1, %v1923_v21, 0.0 }
 0x115   :  { %v1953_v54 = vadd.f32 %v1952_v60, %v1951_v50 }
 0x116   :  { %4841 = vrsqrt.f32 %v5905_v40  ;;  %v1940_v53 = vrot.slane %v1939_v2, 1  ;;  %v1947_v31 = vrot.slane %v1946_v39, 2  ;;  %vm1966_vm3 = vcmp.eq.f32.partialorder %v5905_v40, inf }
 0x117   :  { %v1954_v27 = vrot.slane %v1953_v54, 4  ;;  %v1969_v8 = vand.u32 2147483648, %v5905_v40  ;;  %vm1968_vm4 = vcmp.eq.f32.partialorder %v5905_v40, 0.0  ;;  %v1960_v60 = vadd.f32 1.0, %v5905_v40 }
 0x118   :  { %v5910_v6 = vadd.f32 %v1940_v53, %v1939_v2  ;;  %v1948_v10 = vadd.f32 %v1947_v31, %v1946_v39 }
 0x119   :  { %v1955_v3 = vadd.f32 %v1954_v27, %v1953_v54 }
 0x11a   :  { %4843 = vrsqrt.f32 %v5910_v6  ;;  %v1949_v1 = vrot.slane %v1948_v10, 1  ;;  %vm1973_vm5 = vcmp.eq.f32.partialorder %v5910_v6, inf  ;;  %vm1975_vm6 = vcmp.eq.f32.partialorder %v5910_v6, 0.0 }
 0x11b   :  { %v1956_v24 = vrot.slane %v1955_v3, 2 }
 0x11c   :  { %v5913_v44 = vadd.f32 %v1949_v1, %v1948_v10  ;;  %v1976_v1 = vand.u32 2147483648, %v5910_v6 }
 0x11d   :  { %v1957_v41 = vadd.f32 %v1956_v24, %v1955_v3 }
 0x11e   :  { %4845 = vrsqrt.f32 %v5913_v44  ;;  %vm1980_vm7 = vcmp.eq.f32.partialorder %v5913_v44, inf  ;;  %v1983_v24 = vand.u32 2147483648, %v5913_v44  ;;  %vm1982_vm8 = vcmp.eq.f32.partialorder %v5913_v44, 0.0 }
 0x11f   :  { %v1958_v0 = vrot.slane %v1957_v41, 1 }
 0x121   :  { %v5919_v21 = vadd.f32 %v1958_v0, %v1957_v41 }
 0x123   :  { %v4842_v49 = vpop.eup %4841  ;;  %4847 = vrsqrt.f32 %v5919_v21  ;;  %vm1987_vm9 = vcmp.eq.f32.partialorder %v5919_v21, inf  ;;  %vm1989_vm10 = vcmp.eq.f32.partialorder %v5919_v21, 0.0 }
 0x124   :  { %v1965_v22 = vmul.f32 %v4842_v49, %v5905_v40 }
 0x126   :  { %v1967_v2 = vsel %vm1966_vm3, %v5905_v40, %v1965_v22 }
 0x127   :  { %v1970_v39 = vsel %vm1968_vm4, %v1969_v8, %v1967_v2  ;;  %v4844_v50 = vpop.eup %4843 }
 0x128   :  { %v1992_v53 = vadd.f32 6e-08, %v1970_v39  ;;  %v1972_v31 = vmul.f32 %v4844_v50, %v5910_v6  ;;  %v1961_v39 = vadd.f32 1.0, %v5910_v6 }
 0x12a   :  { %v1996_v54 = vmul.f32 %v1992_v53, %v1960_v60  ;;  %v1974_v27 = vsel %vm1973_vm5, %v5910_v6, %v1972_v31  ;;  %v1962_v60 = vadd.f32 1.0, %v5913_v44  ;;  %v1990_v53 = vand.u32 2147483648, %v5919_v21 }
 0x12b   :  { %v4846_v10 = vpop.eup %4845  ;;  %v1977_v41 = vsel %vm1975_vm6, %v1976_v1, %v1974_v27 }
 0x12c   :  { %4849 = vrcp.f32 %v1996_v54  ;;  %v1979_v3 = vmul.f32 %v4846_v10, %v5913_v44  ;;  %v1993_v22 = vadd.f32 6e-08, %v1977_v41 }
 0x12e   :  { %v1981_v49 = vsel %vm1980_vm7, %v5913_v44, %v1979_v3  ;;  %v1997_v31 = vmul.f32 %v1993_v22, %v1961_v39  ;;  %v1963_v3 = vadd.f32 1.0, %v5919_v21 }
 0x12f   :  { %v1984_v0 = vsel %vm1982_vm8, %v1983_v24, %v1981_v49 }
 0x130   :  { %v4848_v8 = vpop.eup %4847  ;;  %v1994_v2 = vadd.f32 6e-08, %v1984_v0  ;;  %4851 = vrcp.f32 %v1997_v31 }
 0x131   :  { %v1986_v50 = vmul.f32 %v4848_v8, %v5919_v21 }
 0x132   :  { %v1998_v10 = vmul.f32 %v1994_v2, %v1962_v60 }
 0x133   :  { %v1988_v54 = vsel %vm1987_vm9, %v5919_v21, %v1986_v50 }
 0x134   :  { %v1991_v27 = vsel %vm1989_vm10, %v1990_v53, %v1988_v54  ;;  %4853 = vrcp.f32 %v1998_v10  ;;  %v7904_v53 = vld [vmem:[#allocation28_spill] sm:$0xff] }
 0x135   :  { %v1995_v24 = vadd.f32 6e-08, %v1991_v27 }
 0x137   :  { %v1999_v49 = vmul.f32 %v1995_v24, %v1963_v3 }
 0x139   :  { %v4850_v1 = vpop.eup %4849  ;;  %4855 = vrcp.f32 %v1999_v49 }
 0x13a   :  { %v2004_v41 = vmul.f32 %v4850_v1, %v5905_v40 }
 0x13c   :  { %v2008_v0 = vmul.f32 %v2004_v41, %v5826_v42  ;;  %v2009_v8 = vmul.f32 %v2004_v41, %v5811_v56 }
 0x13e   :  { %v2016_v22 = vmul.f32 %v2008_v0, %v5444_v20  ;;  %v2017_v39 = vmul.f32 %v5432_v11, %v2009_v8  ;;  %v2024_v2 = vmul.f32 %v2008_v0, %v5446_v43  ;;  %v2025_v50 = vmul.f32 %v5434_v35, %v2009_v8 }
 0x13f   :  { %v2032_v60 = vmul.f32 %v2008_v0, %v5577_v16  ;;  %v2033_v40 = vmul.f32 %v7904_v53, %v2009_v8  ;;  %v2040_v31 = vmul.f32 %v2008_v0, %v5590_v58  ;;  %v2041_v42 = vmul.f32 %v5569_v17, %v2009_v8 }
 0x140   :  { %v2048_v56 = vmul.f32 %v2008_v0, %v5699_v61  ;;  %v2049_v54 = vmul.f32 %v5687_v33, %v2009_v8  ;;  %v2056_v10 = vmul.f32 %v2008_v0, %v5705_v4  ;;  %v2057_v27 = vmul.f32 %v5695_v55, %v2009_v8 }
 0x141   :  { %v2064_v1 = vmul.f32 %v2008_v0, %v5790_v23  ;;  %v2065_v3 = vmul.f32 %v5781_v14, %v2009_v8  ;;  %v2072_v24 = vmul.f32 %v2008_v0, %v5798_v19  ;;  %v2073_v41 = vmul.f32 %v5785_v28, %v2009_v8 }
 0x142   :  { %v2080_v49 = vsel %vm1266_vm1, %v2016_v22, 0.0  ;;  %v2081_v17 = vsel %vm1266_vm1, %v2017_v39, 0.0  ;;  %v2116_v61 = vsel %vm1266_vm1, %v2024_v2, 0.0  ;;  %v2117_v33 = vsel %vm1266_vm1, %v2025_v50, 0.0 }
 0x143   :  { %v2082_v58 = vadd.f32 %v2081_v17, %v2080_v49  ;;  %v2118_v4 = vadd.f32 %v2117_v33, %v2116_v61  ;;  %v2152_v55 = vsel %vm1266_vm1, %v2032_v60, 0.0  ;;  %v2153_v23 = vsel %vm1266_vm1, %v2033_v40, 0.0  ;;  %v4852_v40 = vpop.eup %4851 }
 0x144   :  { %v2154_v53 = vadd.f32 %v2153_v23, %v2152_v55  ;;  %v2188_v14 = vsel %vm1266_vm1, %v2040_v31, 0.0  ;;  %v2189_v0 = vsel %vm1266_vm1, %v2041_v42, 0.0  ;;  %v2224_v8 = vsel %vm1266_vm1, %v2048_v56, 0.0 }
 0x145   :  { %v2083_v22 = vrot.slane %v2082_v58, 4  ;;  %v2119_v28 = vrot.slane %v2118_v4, 4  ;;  %v2190_v39 = vadd.f32 %v2189_v0, %v2188_v14  ;;  %v2225_v2 = vsel %vm1266_vm1, %v2049_v54, 0.0  ;;  %v4854_v14 = vpop.eup %4853 }
 0x146   :  { %v2155_v19 = vrot.slane %v2154_v53, 4  ;;  %v2226_v50 = vadd.f32 %v2225_v2, %v2224_v8  ;;  %v2260_v17 = vsel %vm1266_vm1, %v2056_v10, 0.0  ;;  %v2261_v33 = vsel %vm1266_vm1, %v2057_v27, 0.0  ;;  %v4856_v2 = vpop.eup %4855 }
 0x147   :  { %v2084_v61 = vadd.f32 %v2083_v22, %v2082_v58  ;;  %v2120_v60 = vadd.f32 %v2119_v28, %v2118_v4  ;;  %v2191_v55 = vrot.slane %v2190_v39, 4  ;;  %v2262_v23 = vadd.f32 %v2261_v33, %v2260_v17 }
 0x148   :  { %v2156_v31 = vadd.f32 %v2155_v19, %v2154_v53  ;;  %v2227_v42 = vrot.slane %v2226_v50, 4  ;;  %v2296_v56 = vsel %vm1266_vm1, %v2064_v1, 0.0  ;;  %v2297_v49 = vsel %vm1266_vm1, %v2065_v3, 0.0 }
 0x149   :  { %v2085_v0 = vrot.slane %v2084_v61, 2  ;;  %v2121_v54 = vrot.slane %v2120_v60, 2  ;;  %v2192_v16 = vadd.f32 %v2191_v55, %v2190_v39  ;;  %v2263_v8 = vrot.slane %v2262_v23, 4 }
 0x14a   :  { %v2157_v10 = vrot.slane %v2156_v31, 2  ;;  %v2228_v35 = vadd.f32 %v2227_v42, %v2226_v50  ;;  %v2298_v27 = vadd.f32 %v2297_v49, %v2296_v56  ;;  %v2332_v58 = vsel %vm1266_vm1, %v2072_v24, 0.0 }
 0x14b   :  { %v2086_v4 = vadd.f32 %v2085_v0, %v2084_v61  ;;  %v2122_v28 = vadd.f32 %v2121_v54, %v2120_v60  ;;  %v2193_v22 = vrot.slane %v2192_v16, 2  ;;  %v2264_v19 = vadd.f32 %v2263_v8, %v2262_v23 }
 0x14c   :  { %v2158_v53 = vadd.f32 %v2157_v10, %v2156_v31  ;;  %v2229_v17 = vrot.slane %v2228_v35, 2  ;;  %v2299_v1 = vrot.slane %v2298_v27, 4  ;;  %v2333_v3 = vsel %vm1266_vm1, %v2073_v41, 0.0 }
 0x14d   :  { %v2087_v33 = vrot.slane %v2086_v4, 1  ;;  %v2123_v43 = vrot.slane %v2122_v28, 1  ;;  %v2194_v11 = vadd.f32 %v2193_v22, %v2192_v16  ;;  %v2265_v39 = vrot.slane %v2264_v19, 2  ;;  %v7908_v22 = vld [vmem:[#allocation17_spill] sm:$0xff] }
 0x14e   :  { %v2159_v55 = vrot.slane %v2158_v53, 1  ;;  %v2230_v20 = vadd.f32 %v2229_v17, %v2228_v35  ;;  %v2300_v26 = vadd.f32 %v2299_v1, %v2298_v27  ;;  %v2334_v50 = vadd.f32 %v2333_v3, %v2332_v58  ;;  %v7909_v17 = vld [vmem:[#allocation32_spill] sm:$0xff]  ;;  %v7910_v3 = vld [vmem:[#allocation33_spill] sm:$0xff] }
 0x14f   :  { %v5978_v42 = vadd.f32 %v2087_v33, %v2086_v4  ;;  %v5980_v24 = vadd.f32 %v2123_v43, %v2122_v28  ;;  %v2195_v61 = vrot.slane %v2194_v11, 1  ;;  %v2266_v60 = vadd.f32 %v2265_v39, %v2264_v19 }
 0x150   :  { %v5982_v23 = vadd.f32 %v2159_v55, %v2158_v53  ;;  %v2231_v31 = vrot.slane %v2230_v20, 1  ;;  %v2301_v56 = vrot.slane %v2300_v26, 2  ;;  %v2335_v49 = vrot.slane %v2334_v50, 4 }
 0x151   :  { %v5984_v41 = vadd.f32 %v2195_v61, %v2194_v11  ;;  %v2267_v0 = vrot.slane %v2266_v60, 1  ;;  %v2005_v16 = vmul.f32 %v4852_v40, %v5910_v6  ;;  %v2006_v35 = vmul.f32 %v4854_v14, %v5913_v44  ;;  %v7906_v40 = vld [vmem:[#allocation16_spill] sm:$0xff] }
 0x152   :  { %v5988_v54 = vadd.f32 %v2231_v31, %v2230_v20  ;;  %v2302_v8 = vadd.f32 %v2301_v56, %v2300_v26  ;;  %v2336_v10 = vadd.f32 %v2335_v49, %v2334_v50  ;;  %v5991_v43 = vmul.f32 %v4856_v2, %v5919_v21  ;;  %v7905_v26 = vld [vmem:[#allocation18_spill] sm:$0xff]  ;;  %v7907_v2 = vld [vmem:[#allocation19_spill] sm:$0xff] }
 0x153   :  { %v5993_v27 = vadd.f32 %v2267_v0, %v2266_v60  ;;  %v2010_v58 = vmul.f32 %v2005_v16, %v5856_v7  ;;  %v2011_v4 = vmul.f32 %v2005_v16, %v5841_v12  ;;  %v5998_v11 = vmul.f32 %v2006_v35, %v5883_v5 }
 0x154   :  { %v2303_v28 = vrot.slane %v2302_v8, 1  ;;  %v2337_v6 = vrot.slane %v2336_v10, 2  ;;  %v6001_v44 = vmul.f32 %v2006_v35, %v5869_v47  ;;  %v6005_v20 = vmul.f32 %v5991_v43, %v5896_v59 }
 0x155   :  { %v2018_v21 = vmul.f32 %v2010_v58, %v7905_v26  ;;  %v2019_v14 = vmul.f32 %v7906_v40, %v2011_v4  ;;  %v2026_v7 = vmul.f32 %v2010_v58, %v7907_v2  ;;  %v2027_v12 = vmul.f32 %v7908_v22, %v2011_v4 }
 0x156   :  { %v6011_v19 = vadd.f32 %v2303_v28, %v2302_v8  ;;  %v2338_v5 = vadd.f32 %v2337_v6, %v2336_v10  ;;  %v2034_v53 = vmul.f32 %v2010_v58, %v5617_v37  ;;  %v2035_v47 = vmul.f32 %v7909_v17, %v2011_v4 }
 0x157   :  { %v2042_v1 = vmul.f32 %v2010_v58, %v5626_v48  ;;  %v2043_v59 = vmul.f32 %v7910_v3, %v2011_v4  ;;  %v2050_v33 = vmul.f32 %v2010_v58, %v5721_v62  ;;  %v2051_v39 = vmul.f32 %v5708_v51, %v2011_v4  ;;  %v7928_v62 = vld [vmem:[#allocation59_spill] sm:$0xff]  ;;  %v7931_v48 = vld [vmem:[#allocation72_spill] sm:$0xff] }
 0x158   :  { %v2339_v55 = vrot.slane %v2338_v5, 1  ;;  %v2058_v50 = vmul.f32 %v2010_v58, %v5728_v52  ;;  %v2059_v61 = vmul.f32 %v5716_v32, %v2011_v4  ;;  %v2066_v60 = vmul.f32 %v2010_v58, %v5815_v13 }
 0x159   :  { %v2067_v31 = vmul.f32 %v5804_v9, %v2011_v4  ;;  %v2074_v56 = vmul.f32 %v2010_v58, %v5822_v29  ;;  %v2075_v49 = vmul.f32 %v5809_v15, %v2011_v4  ;;  %v2089_v0 = vsel %vm1266_vm1, %v2018_v21, 0.0 }
 0x15a   :  { %v6026_v16 = vadd.f32 %v2339_v55, %v2338_v5  ;;  %v2090_v35 = vsel %vm1266_vm1, %v2019_v14, 0.0  ;;  %v2125_v8 = vsel %vm1266_vm1, %v2026_v7, 0.0  ;;  %v2126_v10 = vsel %vm1266_vm1, %v2027_v12, 0.0 }
 0x15b   :  { %v2091_v28 = vadd.f32 %v2090_v35, %v2089_v0  ;;  %v2127_v6 = vadd.f32 %v2126_v10, %v2125_v8  ;;  %v2161_v13 = vsel %vm1266_vm1, %v2034_v53, 0.0  ;;  %v2162_v9 = vsel %vm1266_vm1, %v2035_v47, 0.0 }
 0x15c   :  { %v2163_v32 = vadd.f32 %v2162_v9, %v2161_v13  ;;  %v2197_v58 = vsel %vm1266_vm1, %v2042_v1, 0.0  ;;  %v2198_v4 = vsel %vm1266_vm1, %v2043_v59, 0.0  ;;  %v2233_v21 = vsel %vm1266_vm1, %v2050_v33, 0.0 }
 0x15d   :  { %v2092_v5 = vrot.slane %v2091_v28, 4  ;;  %v2128_v55 = vrot.slane %v2127_v6, 4  ;;  %v2199_v14 = vadd.f32 %v2198_v4, %v2197_v58  ;;  %v2234_v7 = vsel %vm1266_vm1, %v2051_v39, 0.0 }
 0x15e   :  { %v2164_v15 = vrot.slane %v2163_v32, 4  ;;  %v2235_v12 = vadd.f32 %v2234_v7, %v2233_v21  ;;  %v2269_v0 = vsel %vm1266_vm1, %v2058_v50, 0.0  ;;  %v2270_v53 = vsel %vm1266_vm1, %v2059_v61, 0.0 }
 0x15f   :  { %v2093_v47 = vadd.f32 %v2092_v5, %v2091_v28  ;;  %v2129_v9 = vadd.f32 %v2128_v55, %v2127_v6  ;;  %v2200_v13 = vrot.slane %v2199_v14, 4  ;;  %v2271_v1 = vadd.f32 %v2270_v53, %v2269_v0 }
 0x160   :  { %v2165_v35 = vadd.f32 %v2164_v15, %v2163_v32  ;;  %v2236_v59 = vrot.slane %v2235_v12, 4  ;;  %v2305_v33 = vsel %vm1266_vm1, %v2066_v60, 0.0  ;;  %v2306_v8 = vsel %vm1266_vm1, %v2067_v31, 0.0 }
 0x161   :  { %v2094_v10 = vrot.slane %v2093_v47, 2  ;;  %v2130_v58 = vrot.slane %v2129_v9, 2  ;;  %v2201_v39 = vadd.f32 %v2200_v13, %v2199_v14  ;;  %v2272_v4 = vrot.slane %v2271_v1, 4 }
 0x162   :  { %v2166_v21 = vrot.slane %v2165_v35, 2  ;;  %v2237_v7 = vadd.f32 %v2236_v59, %v2235_v12  ;;  %v2307_v50 = vadd.f32 %v2306_v8, %v2305_v33  ;;  %v2341_v61 = vsel %vm1266_vm1, %v2074_v56, 0.0 }
 0x163   :  { %v2095_v29 = vadd.f32 %v2094_v10, %v2093_v47  ;;  %v2131_v28 = vadd.f32 %v2130_v58, %v2129_v9  ;;  %v2202_v6 = vrot.slane %v2201_v39, 2  ;;  %v2273_v5 = vadd.f32 %v2272_v4, %v2271_v1 }
 0x164   :  { %v2167_v55 = vadd.f32 %v2166_v21, %v2165_v35  ;;  %v2238_v32 = vrot.slane %v2237_v7, 2  ;;  %v2308_v15 = vrot.slane %v2307_v50, 4  ;;  %v2342_v60 = vsel %vm1266_vm1, %v2075_v49, 0.0 }
 0x165   :  { %v2096_v0 = vrot.slane %v2095_v29, 1  ;;  %v2132_v31 = vrot.slane %v2131_v28, 1  ;;  %v2203_v53 = vadd.f32 %v2202_v6, %v2201_v39  ;;  %v2274_v52 = vrot.slane %v2273_v5, 2  ;;  %v7913_v6 = vld [vmem:[#allocation23_spill] sm:$0xff] }
 0x166   :  { %v2168_v14 = vrot.slane %v2167_v55, 1  ;;  %v2239_v13 = vadd.f32 %v2238_v32, %v2237_v7  ;;  %v2309_v51 = vadd.f32 %v2308_v15, %v2307_v50  ;;  %v2343_v12 = vadd.f32 %v2342_v60, %v2341_v61  ;;  %v7911_v50 = vld [vmem:[#allocation22_spill] sm:$0xff]  ;;  %v7916_v60 = vld [vmem:[#allocation36_spill] sm:$0xff] }
 0x167   :  { %v2097_v59 = vadd.f32 %v2096_v0, %v2095_v29  ;;  %v2133_v33 = vadd.f32 %v2132_v31, %v2131_v28  ;;  %v2204_v56 = vrot.slane %v2203_v53, 1  ;;  %v2275_v47 = vadd.f32 %v2274_v52, %v2273_v5  ;;  %v7915_v15 = vld [vmem:[#allocation38_spill] sm:$0xff] }
 0x168   :  { %v2169_v9 = vadd.f32 %v2168_v14, %v2167_v55  ;;  %v2240_v8 = vrot.slane %v2239_v13, 1  ;;  %v2310_v1 = vrot.slane %v2309_v51, 2  ;;  %v2344_v35 = vrot.slane %v2343_v12, 4 }
 0x169   :  { %v6043_v10 = vadd.f32 %v2204_v56, %v2203_v53  ;;  %v2276_v58 = vrot.slane %v2275_v47, 1  ;;  %v6047_v49 = vsel %vm2400_vm11, %v2097_v59, %v5978_v42  ;;  %v6051_v39 = vsel %vm2400_vm11, %v2133_v33, %v5980_v24  ;;  %v7912_v42 = vld [vmem:[#allocation20_spill] sm:$0xff]  ;;  %v7917_v53 = vld [vmem:[#allocation37_spill] sm:$0xff] }
 0x16a   :  { %v6053_v4 = vadd.f32 %v2240_v8, %v2239_v13  ;;  %v2311_v29 = vadd.f32 %v2310_v1, %v2309_v51  ;;  %v2345_v21 = vadd.f32 %v2344_v35, %v2343_v12  ;;  %v6057_v52 = vsel %vm2400_vm11, %v2169_v9, %v5982_v23  ;;  %v7914_v51 = vld [vmem:[#allocation21_spill] sm:$0xff] }
 0x16b   :  { %v6059_v7 = vadd.f32 %v2276_v58, %v2275_v47  ;;  %v2020_v61 = vmul.f32 %v5998_v11, %v7911_v50  ;;  %v2021_v28 = vmul.f32 %v7912_v42, %v6001_v44  ;;  %v2028_v24 = vmul.f32 %v5998_v11, %v7913_v6 }
 0x16c   :  { %v2312_v5 = vrot.slane %v2311_v29, 1  ;;  %v2346_v55 = vrot.slane %v2345_v21, 2  ;;  %v2029_v32 = vmul.f32 %v7914_v51, %v6001_v44  ;;  %v2036_v23 = vmul.f32 %v5998_v11, %v7915_v15 }
 0x16d   :  { %v2037_v0 = vmul.f32 %v7916_v60, %v6001_v44  ;;  %v2044_v31 = vmul.f32 %v5998_v11, %v5656_v57  ;;  %v2045_v14 = vmul.f32 %v7917_v53, %v6001_v44  ;;  %v2052_v13 = vmul.f32 %v5998_v11, %v5746_v63  ;;  %v7929_v57 = vld [vmem:[#allocation57_spill] sm:$0xff] }
 0x16e   :  { %v6079_v12 = vadd.f32 %v2312_v5, %v2311_v29  ;;  %v2347_v59 = vadd.f32 %v2346_v55, %v2345_v21  ;;  %v2053_v33 = vmul.f32 %v5730_v45, %v6001_v44  ;;  %v2060_v56 = vmul.f32 %v5998_v11, %v5754_v36 }
 0x16f   :  { %v2061_v47 = vmul.f32 %v5738_v34, %v6001_v44  ;;  %v2068_v9 = vmul.f32 %v5998_v11, %v5843_v38  ;;  %v2069_v8 = vmul.f32 %v5829_v25, %v6001_v44  ;;  %v2076_v1 = vmul.f32 %v5998_v11, %v5851_v18 }
 0x170   :  { %v2348_v35 = vrot.slane %v2347_v59, 1  ;;  %v2077_v58 = vmul.f32 %v5836_v46, %v6001_v44  ;;  %v2098_v29 = vsel %vm1266_vm1, %v2020_v61, 0.0  ;;  %v2099_v21 = vsel %vm1266_vm1, %v2021_v28, 0.0 }
 0x171   :  { %v2100_v5 = vadd.f32 %v2099_v21, %v2098_v29  ;;  %v2134_v55 = vsel %vm1266_vm1, %v2028_v24, 0.0  ;;  %v2135_v34 = vsel %vm1266_vm1, %v2029_v32, 0.0  ;;  %v2170_v38 = vsel %vm1266_vm1, %v2036_v23, 0.0 }
 0x172   :  { %v2349_v36 = vadd.f32 %v2348_v35, %v2347_v59  ;;  %v2136_v25 = vadd.f32 %v2135_v34, %v2134_v55  ;;  %v2171_v45 = vsel %vm1266_vm1, %v2037_v0, 0.0  ;;  %v2206_v11 = vsel %vm1266_vm1, %v2044_v31, 0.0 }
 0x173   :  { %v2101_v18 = vrot.slane %v2100_v5, 4  ;;  %v2172_v63 = vadd.f32 %v2171_v45, %v2170_v38  ;;  %v2207_v44 = vsel %vm1266_vm1, %v2045_v14, 0.0  ;;  %v2242_v61 = vsel %vm1266_vm1, %v2052_v13, 0.0 }
 0x174   :  { %v6106_v28 = vsel %vm2400_vm11, %v2349_v36, %v6026_v16  ;;  %v2137_v24 = vrot.slane %v2136_v25, 4  ;;  %v2208_v32 = vadd.f32 %v2207_v44, %v2206_v11  ;;  %v2243_v23 = vsel %vm1266_vm1, %v2053_v33, 0.0 }
 0x175   :  { %v2102_v59 = vadd.f32 %v2101_v18, %v2100_v5  ;;  %v2173_v34 = vrot.slane %v2172_v63, 4  ;;  %v2244_v35 = vadd.f32 %v2243_v23, %v2242_v61  ;;  %v2278_v0 = vsel %vm1266_vm1, %v2060_v56, 0.0 }
 0x176   :  { %v2138_v31 = vadd.f32 %v2137_v24, %v2136_v25  ;;  %v2209_v29 = vrot.slane %v2208_v32, 4  ;;  %v2279_v45 = vsel %vm1266_vm1, %v2061_v47, 0.0  ;;  %v2314_v38 = vsel %vm1266_vm1, %v2068_v9, 0.0 }
 0x177   :  { %v2103_v14 = vrot.slane %v2102_v59, 2  ;;  %v2174_v13 = vadd.f32 %v2173_v34, %v2172_v63  ;;  %v2245_v21 = vrot.slane %v2244_v35, 4  ;;  %v2280_v36 = vadd.f32 %v2279_v45, %v2278_v0 }
 0x178   :  { %v2139_v16 = vrot.slane %v2138_v31, 2  ;;  %v2210_v55 = vadd.f32 %v2209_v29, %v2208_v32  ;;  %v2315_v11 = vsel %vm1266_vm1, %v2069_v8, 0.0  ;;  %v2350_v18 = vsel %vm1266_vm1, %v2076_v1, 0.0 }
 0x179   :  { %v2104_v33 = vadd.f32 %v2103_v14, %v2102_v59  ;;  %v2175_v5 = vrot.slane %v2174_v13, 2  ;;  %v2246_v44 = vadd.f32 %v2245_v21, %v2244_v35  ;;  %v2281_v56 = vrot.slane %v2280_v36, 4 }
 0x17a   :  { %v2140_v25 = vadd.f32 %v2139_v16, %v2138_v31  ;;  %v2211_v61 = vrot.slane %v2210_v55, 2  ;;  %v2316_v24 = vadd.f32 %v2315_v11, %v2314_v38  ;;  %v2351_v47 = vsel %vm1266_vm1, %v2077_v58, 0.0 }
 0x17b   :  { %v2105_v9 = vrot.slane %v2104_v33, 1  ;;  %v2176_v23 = vadd.f32 %v2175_v5, %v2174_v13  ;;  %v2247_v63 = vrot.slane %v2246_v44, 2  ;;  %v2282_v34 = vadd.f32 %v2281_v56, %v2280_v36 }
 0x17c   :  { %v2141_v0 = vrot.slane %v2140_v25, 1  ;;  %v2212_v45 = vadd.f32 %v2211_v61, %v2210_v55  ;;  %v2317_v32 = vrot.slane %v2316_v24, 4  ;;  %v2352_v29 = vadd.f32 %v2351_v47, %v2350_v18 }
 0x17d   :  { %v6115_v8 = vadd.f32 %v2105_v9, %v2104_v33  ;;  %v2177_v1 = vrot.slane %v2176_v23, 1  ;;  %v2248_v59 = vadd.f32 %v2247_v63, %v2246_v44  ;;  %v2283_v14 = vrot.slane %v2282_v34, 2  ;;  %v7918_v33 = vld [vmem:[#allocation26_spill] sm:$0xff]  ;;  %v7921_v63 = vld [vmem:[#allocation25_spill] sm:$0xff] }
 0x17e   :  { %v6117_v35 = vadd.f32 %v2141_v0, %v2140_v25  ;;  %v2213_v31 = vrot.slane %v2212_v45, 1  ;;  %v2318_v21 = vadd.f32 %v2317_v32, %v2316_v24  ;;  %v2353_v38 = vrot.slane %v2352_v29, 4  ;;  %v7919_v25 = vld [vmem:[#allocation24_spill] sm:$0xff]  ;;  %v7920_v24 = vld [vmem:[#allocation27_spill] sm:$0xff] }
 0x17f   :  { %v6119_v16 = vadd.f32 %v2177_v1, %v2176_v23  ;;  %v2249_v58 = vrot.slane %v2248_v59, 1  ;;  %v2284_v13 = vadd.f32 %v2283_v14, %v2282_v34  ;;  %v2015_v36 = vmul.f32 %v5991_v43, %v5899_v30  ;;  %v7922_v30 = vld [vmem:[#allocation42_spill] sm:$0xff] }
 0x180   :  { %v6123_v55 = vadd.f32 %v2213_v31, %v2212_v45  ;;  %v2319_v11 = vrot.slane %v2318_v21, 2  ;;  %v2354_v18 = vadd.f32 %v2353_v38, %v2352_v29  ;;  %v2022_v5 = vmul.f32 %v6005_v20, %v7918_v33  ;;  %v7923_v45 = vld [vmem:[#allocation40_spill] sm:$0xff]  ;;  %v7924_v29 = vld [vmem:[#allocation43_spill] sm:$0xff] }
 0x181   :  { %v6127_v44 = vadd.f32 %v2249_v58, %v2248_v59  ;;  %v2285_v56 = vrot.slane %v2284_v13, 1  ;;  %v2023_v61 = vmul.f32 %v7919_v25, %v2015_v36  ;;  %v2030_v47 = vmul.f32 %v6005_v20, %v7920_v24  ;;  %v7925_v59 = vld [vmem:[#allocation41_spill] sm:$0xff]  ;;  %v7926_v58 = vld [vmem:[#allocation58_spill] sm:$0xff] }
 0x182   :  { %v2320_v9 = vadd.f32 %v2319_v11, %v2318_v21  ;;  %v2355_v23 = vrot.slane %v2354_v18, 2  ;;  %v2031_v34 = vmul.f32 %v7921_v63, %v2015_v36  ;;  %v2038_v43 = vmul.f32 %v6005_v20, %v7922_v30  ;;  %v7927_v11 = vld [vmem:[#allocation56_spill] sm:$0xff]  ;;  %v7932_v30 = vld [vmem:[#allocation75_spill] sm:$0xff] }
 0x183   :  { %v6135_v0 = vadd.f32 %v2285_v56, %v2284_v13  ;;  %v2039_v32 = vmul.f32 %v7923_v45, %v2015_v36  ;;  %v2046_v1 = vmul.f32 %v6005_v20, %v7924_v29  ;;  %v2047_v14 = vmul.f32 %v7925_v59, %v2015_v36  ;;  %v7930_v56 = vld [vmem:[#allocation74_spill] sm:$0xff] }
 0x184   :  { %v2321_v31 = vrot.slane %v2320_v9, 1  ;;  %v2356_v38 = vadd.f32 %v2355_v23, %v2354_v18  ;;  %v2054_v21 = vmul.f32 %v6005_v20, %v7926_v58  ;;  %v2055_v46 = vmul.f32 %v7927_v11, %v2015_v36  ;;  %v7933_v23 = vld [vmem:[#allocation73_spill] sm:$0xff] }
 0x185   :  { %v2062_v53 = vmul.f32 %v6005_v20, %v7928_v62  ;;  %v2063_v13 = vmul.f32 %v7929_v57, %v2015_v36  ;;  %v2070_v3 = vmul.f32 %v6005_v20, %v7930_v56  ;;  %v2071_v45 = vmul.f32 %v7931_v48, %v2015_v36 }
 0x186   :  { %v6150_v29 = vadd.f32 %v2321_v31, %v2320_v9  ;;  %v2357_v59 = vrot.slane %v2356_v38, 1  ;;  %v2078_v18 = vmul.f32 %v6005_v20, %v7932_v30  ;;  %v2079_v58 = vmul.f32 %v7933_v23, %v2015_v36 }
 0x187   :  { %v2107_v11 = vsel %vm1266_vm1, %v2022_v5, 0.0  ;;  %v2108_v60 = vsel %vm1266_vm1, %v2023_v61, 0.0  ;;  %v2143_v62 = vsel %vm1266_vm1, %v2030_v47, 0.0  ;;  %v2144_v57 = vsel %vm1266_vm1, %v2031_v34, 0.0 }
 0x188   :  { %v6159_v15 = vadd.f32 %v2357_v59, %v2356_v38  ;;  %v2109_v56 = vadd.f32 %v2108_v60, %v2107_v11  ;;  %v2145_v48 = vadd.f32 %v2144_v57, %v2143_v62  ;;  %v2179_v9 = vsel %vm1266_vm1, %v2038_v43, 0.0 }
 0x189   :  { %v2180_v31 = vsel %vm1266_vm1, %v2039_v32, 0.0  ;;  %v2215_v20 = vsel %vm1266_vm1, %v2046_v1, 0.0  ;;  %v2216_v36 = vsel %vm1266_vm1, %v2047_v14, 0.0  ;;  %v2251_v5 = vsel %vm1266_vm1, %v2054_v21, 0.0 }
 0x18a   :  { %v2110_v23 = vrot.slane %v2109_v56, 4  ;;  %v2146_v61 = vrot.slane %v2145_v48, 4  ;;  %v2181_v30 = vadd.f32 %v2180_v31, %v2179_v9  ;;  %v2217_v47 = vadd.f32 %v2216_v36, %v2215_v20 }
 0x18b   :  { %v2252_v34 = vsel %vm1266_vm1, %v2055_v46, 0.0  ;;  %v2287_v59 = vsel %vm1266_vm1, %v2062_v53, 0.0  ;;  %v2288_v57 = vsel %vm1266_vm1, %v2063_v13, 0.0  ;;  %v2323_v62 = vsel %vm1266_vm1, %v2070_v3, 0.0 }
 0x18c   :  { %v2111_v60 = vadd.f32 %v2110_v23, %v2109_v56  ;;  %v2147_v43 = vadd.f32 %v2146_v61, %v2145_v48  ;;  %v2182_v32 = vrot.slane %v2181_v30, 4  ;;  %v2218_v1 = vrot.slane %v2217_v47, 4 }
 0x18d   :  { %v2253_v14 = vadd.f32 %v2252_v34, %v2251_v5  ;;  %v2289_v38 = vadd.f32 %v2288_v57, %v2287_v59  ;;  %v2324_v21 = vsel %vm1266_vm1, %v2071_v45, 0.0  ;;  %v2359_v11 = vsel %vm1266_vm1, %v2078_v18, 0.0 }
 0x18e   :  { %v2112_v9 = vrot.slane %v2111_v60, 2  ;;  %v2148_v46 = vrot.slane %v2147_v43, 2  ;;  %v2183_v31 = vadd.f32 %v2182_v32, %v2181_v30  ;;  %v2219_v53 = vadd.f32 %v2218_v1, %v2217_v47 }
 0x18f   :  { %v2254_v20 = vrot.slane %v2253_v14, 4  ;;  %v2290_v13 = vrot.slane %v2289_v38, 4  ;;  %v2325_v36 = vadd.f32 %v2324_v21, %v2323_v62  ;;  %v2360_v3 = vsel %vm1266_vm1, %v2079_v58, 0.0 }
 0x190   :  { %v2113_v56 = vadd.f32 %v2112_v9, %v2111_v60  ;;  %v2149_v48 = vadd.f32 %v2148_v46, %v2147_v43  ;;  %v2184_v23 = vrot.slane %v2183_v31, 2  ;;  %v2220_v61 = vrot.slane %v2219_v53, 2 }
 0x191   :  { %v2255_v5 = vadd.f32 %v2254_v20, %v2253_v14  ;;  %v2291_v34 = vadd.f32 %v2290_v13, %v2289_v38  ;;  %v2326_v59 = vrot.slane %v2325_v36, 4  ;;  %v2361_v45 = vadd.f32 %v2360_v3, %v2359_v11 }
 0x192   :  { %v2114_v57 = vrot.slane %v2113_v56, 1  ;;  %v2150_v18 = vrot.slane %v2149_v48, 1  ;;  %v2185_v17 = vadd.f32 %v2184_v23, %v2183_v31  ;;  %v2221_v37 = vadd.f32 %v2220_v61, %v2219_v53 }
 0x193   :  { %v2256_v63 = vrot.slane %v2255_v5, 2  ;;  %v2292_v30 = vrot.slane %v2291_v34, 2  ;;  %v2327_v47 = vadd.f32 %v2326_v59, %v2325_v36  ;;  %v2362_v32 = vrot.slane %v2361_v45, 4 }
 0x194   :  { %v2115_v1 = vadd.f32 %v2114_v57, %v2113_v56  ;;  %v2151_v62 = vadd.f32 %v2150_v18, %v2149_v48  ;;  %v2186_v21 = vrot.slane %v2185_v17, 1  ;;  %v2222_v58 = vrot.slane %v2221_v37, 1  ;;  %v7935_v57 = vld [vmem:[#allocation5_spill] sm:$0xff]  ;;  %v7936_v18 = vld [vmem:[#allocation6_spill] sm:$0xff] }
 0x195   :  { %v2257_v60 = vadd.f32 %v2256_v63, %v2255_v5  ;;  %v2293_v43 = vadd.f32 %v2292_v30, %v2291_v34  ;;  %v2328_v9 = vrot.slane %v2327_v47, 2  ;;  %v2363_v46 = vadd.f32 %v2362_v32, %v2361_v45  ;;  %v7938_v32 = vld [vmem:[#allocation8_spill] sm:$0xff] }
 0x196   :  { %v2187_v14 = vadd.f32 %v2186_v21, %v2185_v17  ;;  %v2223_v38 = vadd.f32 %v2222_v58, %v2221_v37  ;;  %v2403_v11 = vsel %vm2402_vm12, %v6115_v8, %v6047_v49  ;;  %v2407_v31 = vsel %vm2402_vm12, %v6117_v35, %v6051_v39  ;;  %v7941_v58 = vld [vmem:[#allocation11_spill] sm:$0xff] }
 0x197   :  { %v2258_v53 = vrot.slane %v2257_v60, 1  ;;  %v2294_v20 = vrot.slane %v2293_v43, 1  ;;  %v2329_v13 = vadd.f32 %v2328_v9, %v2327_v47  ;;  %v2364_v36 = vrot.slane %v2363_v46, 2  ;;  %v7937_v47 = vld [vmem:[#allocation7_spill] sm:$0xff] }
 0x198   :  { %v2405_v3 = vsel %vm2404_vm13, %v2115_v1, %v2403_v11  ;;  %v2408_v63 = vsel %vm2404_vm13, %v2151_v62, %v2407_v31  ;;  %v2410_v37 = vsel %vm2402_vm12, %v6119_v16, %v6057_v52  ;;  %v2412_v17 = vsel %vm2400_vm11, %v6043_v10, %v5984_v41  ;;  %v7940_v62 = vld [vmem:[#allocation10_spill] sm:$0xff] }
 0x199   :  { %v2259_v49 = vadd.f32 %v2258_v53, %v2257_v60  ;;  %v2295_v8 = vadd.f32 %v2294_v20, %v2293_v43  ;;  %v2330_v56 = vrot.slane %v2329_v13, 1  ;;  %v2365_v39 = vadd.f32 %v2364_v36, %v2363_v46 }
 0x19a   :  { %v2411_v35 = vsel %vm2404_vm13, %v2187_v14, %v2410_v37  ;;  %v2413_v48 = vsel %vm2402_vm12, %v6123_v55, %v2412_v17  ;;  %v2415_v23 = vsel %vm2400_vm11, %v6053_v4, %v5988_v54  ;;  %v2418_v52 = vsel %vm2400_vm11, %v6059_v7, %v5993_v27 }
 0x19b   :  { %v2331_v16 = vadd.f32 %v2330_v56, %v2329_v13  ;;  %v2366_v61 = vrot.slane %v2365_v39, 1  ;;  %v2414_v41 = vsel %vm2404_vm13, %v2223_v38, %v2413_v48  ;;  %v2416_v10 = vsel %vm2402_vm12, %v6127_v44, %v2415_v23  ;;  %v7934_v44 = vld [vmem:[#allocation4_spill] sm:$0xff] }
 0x19c   :  { %v2417_v5 = vsel %vm2404_vm13, %v2259_v49, %v2416_v10  ;;  %v2419_v55 = vsel %vm2402_vm12, %v6135_v0, %v2418_v52  ;;  %v2421_v54 = vsel %vm2400_vm11, %v6079_v12, %v6011_v19  ;;  %v2425_v27 = vsel %vm2402_vm12, %v6159_v15, %v6106_v28  ;;  %v7939_v28 = vld [vmem:[#allocation9_spill] sm:$0xff] }
 0x19d   :  { %v2367_v4 = vadd.f32 %v2366_v61, %v2365_v39  ;;  %v2420_v7 = vsel %vm2404_vm13, %v2295_v8, %v2419_v55  ;;  %v2422_v34 = vsel %vm2402_vm12, %v6150_v29, %v2421_v54  ;;  %v2435_v59 = vadd.f32 %v2405_v3, %v7934_v44 }
 0x19e   :  { %v2423_v45 = vsel %vm2404_vm13, %v2331_v16, %v2422_v34  ;;  %v2436_v0 = vadd.f32 %v2408_v63, %v7935_v57  ;;  %v2437_v30 = vadd.f32 %v2411_v35, %v7936_v18  ;;  %v2438_v19 = vadd.f32 %v2414_v41, %v7937_v47 }
 0x19f   :  { %v2426_v12 = vsel %vm2404_vm13, %v2367_v4, %v2425_v27  ;;  %v2439_v15 = vadd.f32 %v2417_v5, %v7938_v32  ;;  %v2440_v1 = vadd.f32 %v2420_v7, %v7939_v28  ;;  %v2441_v21 = vadd.f32 %v2423_v45, %v7940_v62 }
 0x1a0   :  { %v2442_v29 = vadd.f32 %v2426_v12, %v7941_v58  ;;  %v6222_v60 = vadd.f32 %v2435_v59, %v7934_v44  ;;  %v6225_v43 = vadd.f32 %v2436_v0, %v7935_v57  ;;  %v6228_v9 = vadd.f32 %v2437_v30, %v7936_v18  ;;  %v7953_v57 = vld [vmem:[#allocation12_spill] sm:$0xff] }
 0x1a1   :  { %v6231_v46 = vadd.f32 %v2438_v19, %v7937_v47  ;;  %v6234_v14 = vadd.f32 %v2439_v15, %v7938_v32  ;;  %v6237_v38 = vadd.f32 %v2440_v1, %v7939_v28  ;;  %v6240_v11 = vadd.f32 %v2441_v21, %v7940_v62 }
 0x1a2   :  { %7942 = vst [vmem:[#allocation76_spill] sm:$0xff] %v6222_v60  ;;  %7943 = vst [vmem:[#allocation77_spill] sm:$0xff] %v6225_v43  ;;  %v6243_v31 = vadd.f32 %v2442_v29, %v7941_v58  ;;  %v2451_v53 = vsel %vm1299_vm2, %v6222_v60, -inf  ;;  %v2458_v20 = vsel %vm1299_vm2, %v6225_v43, -inf  ;;  %v2465_v13 = vsel %vm1299_vm2, %v6228_v9, -inf }
 0x1a3   :  { %7944 = vst [vmem:[#allocation78_spill] sm:$0xff] %v6228_v9  ;;  %7945 = vst [vmem:[#allocation79_spill] sm:$0xff] %v6231_v46  ;;  %v2452_v36 = vrot.slane %v2451_v53, 4  ;;  %v2459_v3 = vrot.slane %v2458_v20, 4  ;;  %v2466_v63 = vrot.slane %v2465_v13, 4  ;;  %v2472_v37 = vsel %vm1299_vm2, %v6231_v46, -inf }
 0x1a4   :  { %7946 = vst [vmem:[#allocation80_spill] sm:$0xff] %v6234_v14  ;;  %7947 = vst [vmem:[#allocation81_spill] sm:$0xff] %v6237_v38  ;;  %v2473_v17 = vrot.slane %v2472_v37, 4  ;;  %v2479_v49 = vsel %vm1299_vm2, %v6234_v14, -inf  ;;  %v2486_v8 = vsel %vm1299_vm2, %v6237_v38, -inf  ;;  %v2493_v56 = vsel %vm1299_vm2, %v6240_v11, -inf }
 0x1a5   :  { %7948 = vst [vmem:[#allocation82_spill] sm:$0xff] %v6240_v11  ;;  %7949 = vst [vmem:[#allocation83_spill] sm:$0xff] %v6243_v31  ;;  %v2453_v39 = vmax.f32 %v2451_v53, %v2452_v36  ;;  %v2460_v35 = vmax.f32 %v2458_v20, %v2459_v3  ;;  %v2467_v48 = vmax.f32 %v2465_v13, %v2466_v63  ;;  %v2480_v23 = vrot.slane %v2479_v49, 4 }
 0x1a6   :  { %v2474_v52 = vmax.f32 %v2472_v37, %v2473_v17  ;;  %v2487_v16 = vrot.slane %v2486_v8, 4  ;;  %v2494_v61 = vrot.slane %v2493_v56, 4  ;;  %v2500_v41 = vsel %vm1299_vm2, %v6243_v31, -inf }
 0x1a7   :  { %v2454_v10 = vrot.slane %v2453_v39, 2  ;;  %v2461_v5 = vrot.slane %v2460_v35, 2  ;;  %v2468_v55 = vrot.slane %v2467_v48, 2  ;;  %v2481_v54 = vmax.f32 %v2479_v49, %v2480_v23 }
 0x1a8   :  { %v2475_v27 = vrot.slane %v2474_v52, 2  ;;  %v2488_v4 = vmax.f32 %v2486_v8, %v2487_v16  ;;  %v2495_v7 = vmax.f32 %v2493_v56, %v2494_v61  ;;  %v2501_v34 = vrot.slane %v2500_v41, 4 }
 0x1a9   :  { %v2455_v59 = vmax.f32 %v2453_v39, %v2454_v10  ;;  %v2462_v45 = vmax.f32 %v2460_v35, %v2461_v5  ;;  %v2469_v0 = vmax.f32 %v2467_v48, %v2468_v55  ;;  %v2482_v30 = vrot.slane %v2481_v54, 2 }
 0x1aa   :  { %v2476_v19 = vmax.f32 %v2474_v52, %v2475_v27  ;;  %v2489_v12 = vrot.slane %v2488_v4, 2  ;;  %v2496_v15 = vrot.slane %v2495_v7, 2  ;;  %v2502_v1 = vmax.f32 %v2500_v41, %v2501_v34 }
 0x1ab   :  { %v2456_v21 = vrot.slane %v2455_v59, 1  ;;  %v2463_v29 = vrot.slane %v2462_v45, 1  ;;  %v2470_v53 = vrot.slane %v2469_v0, 1  ;;  %v2483_v20 = vmax.f32 %v2481_v54, %v2482_v30 }
 0x1ac   :  { %v2477_v13 = vrot.slane %v2476_v19, 1  ;;  %v2490_v36 = vmax.f32 %v2488_v4, %v2489_v12  ;;  %v2497_v3 = vmax.f32 %v2495_v7, %v2496_v15  ;;  %v2503_v63 = vrot.slane %v2502_v1, 2 }
 0x1ad   :  { %v2457_v37 = vmax.f32 %v2455_v59, %v2456_v21  ;;  %v2464_v17 = vmax.f32 %v2462_v45, %v2463_v29  ;;  %v2471_v49 = vmax.f32 %v2469_v0, %v2470_v53  ;;  %v2484_v8 = vrot.slane %v2483_v20, 1 }
 0x1ae   :  { %v2478_v56 = vmax.f32 %v2476_v19, %v2477_v13  ;;  %v2491_v39 = vrot.slane %v2490_v36, 1  ;;  %v2498_v35 = vrot.slane %v2497_v3, 1  ;;  %v2504_v48 = vmax.f32 %v2502_v1, %v2503_v63 }
 0x1af   :  { %v2485_v23 = vmax.f32 %v2483_v20, %v2484_v8  ;;  %v2507_v52 = vsub.f32 %v6222_v60, %v2457_v37  ;;  %v2508_v16 = vsub.f32 %v6225_v43, %v2464_v17  ;;  %v2509_v61 = vsub.f32 %v6228_v9, %v2471_v49  ;;  %v7961_v9 = vld [vmem:[#allocation28_spill] sm:$0xff]  ;;  %v7962_v60 = vld [vmem:[#allocation34_spill] sm:$0xff] }
 0x1b0   :  { %v2492_v41 = vmax.f32 %v2490_v36, %v2491_v39  ;;  %v2499_v10 = vmax.f32 %v2497_v3, %v2498_v35  ;;  %v2505_v5 = vrot.slane %v2504_v48, 1  ;;  %v2510_v55 = vsub.f32 %v6231_v46, %v2478_v56 }
 0x1b1   :  { %v2511_v54 = vsub.f32 %v6234_v14, %v2485_v23  ;;  %v2515_v27 = vmul.f32 1.442695, %v2507_v52  ;;  %v2517_v4 = vmul.f32 1.442695, %v2508_v16  ;;  %v2519_v7 = vmul.f32 1.442695, %v2509_v61 }
 0x1b2   :  { %v2506_v34 = vmax.f32 %v2504_v48, %v2505_v5  ;;  %v2512_v59 = vsub.f32 %v6237_v38, %v2492_v41  ;;  %v2513_v45 = vsub.f32 %v6240_v11, %v2499_v10  ;;  %v2521_v0 = vmul.f32 1.442695, %v2510_v55  ;;  %v7958_v38 = vld [vmem:[#allocation25_spill] sm:$0xff] }
 0x1b3   :  { %4857 = vpow2.f32 %v2515_v27  ;;  %v2523_v30 = vmul.f32 1.442695, %v2511_v54 }
 0x1b4   :  { %v2514_v19 = vsub.f32 %v6243_v31, %v2506_v34  ;;  %4859 = vpow2.f32 %v2517_v4  ;;  %v2525_v12 = vmul.f32 1.442695, %v2512_v59  ;;  %v2527_v15 = vmul.f32 1.442695, %v2513_v45 }
 0x1b5   :  { %4861 = vpow2.f32 %v2519_v7 }
 0x1b6   :  { %4863 = vpow2.f32 %v2521_v0  ;;  %v2529_v1 = vmul.f32 1.442695, %v2514_v19 }
 0x1b7   :  { %4865 = vpow2.f32 %v2523_v30 }
 0x1b8   :  { %4867 = vpow2.f32 %v2525_v12 }
 0x1b9   :  { %4869 = vpow2.f32 %v2527_v15 }
 0x1ba   :  { %4871 = vpow2.f32 %v2529_v1 }
 0x1c0   :  { %v6269_v21 = vpop.eup %4857 }
 0x1c1   :  { %v6271_v29 = vpop.eup %4859  ;;  %v2531_v53 = vsel %vm1299_vm2, %v6269_v21, 0.0 }
 0x1c2   :  { %v6275_v20 = vpop.eup %4861  ;;  %v2532_v13 = vrot.slane %v2531_v53, 4  ;;  %v2538_v36 = vsel %vm1299_vm2, %v6271_v29, 0.0 }
 0x1c3   :  { %v6279_v3 = vpop.eup %4863  ;;  %v2539_v63 = vrot.slane %v2538_v36, 4  ;;  %v2545_v37 = vsel %vm1299_vm2, %v6275_v20, 0.0 }
 0x1c4   :  { %v6283_v17 = vpop.eup %4865  ;;  %v2533_v49 = vadd.f32 %v2532_v13, %v2531_v53  ;;  %v2546_v8 = vrot.slane %v2545_v37, 4  ;;  %v2552_v56 = vsel %vm1299_vm2, %v6279_v3, 0.0 }
 0x1c5   :  { %v6287_v39 = vpop.eup %4867  ;;  %v2540_v35 = vadd.f32 %v2539_v63, %v2538_v36  ;;  %v2553_v48 = vrot.slane %v2552_v56, 4  ;;  %v2559_v23 = vsel %vm1299_vm2, %v6283_v17, 0.0 }
 0x1c6   :  { %v6291_v52 = vpop.eup %4869  ;;  %v2534_v16 = vrot.slane %v2533_v49, 2  ;;  %v2547_v61 = vadd.f32 %v2546_v8, %v2545_v37  ;;  %v2560_v41 = vrot.slane %v2559_v23, 4  ;;  %v2566_v10 = vsel %vm1299_vm2, %v6287_v39, 0.0 }
 0x1c7   :  { %v6295_v5 = vpop.eup %4871  ;;  %v2541_v55 = vrot.slane %v2540_v35, 2  ;;  %v2554_v54 = vadd.f32 %v2553_v48, %v2552_v56  ;;  %v2567_v27 = vrot.slane %v2566_v10, 4  ;;  %v2573_v4 = vsel %vm1299_vm2, %v6291_v52, 0.0 }
 0x1c8   :  { %v2535_v7 = vadd.f32 %v2534_v16, %v2533_v49  ;;  %v2548_v34 = vrot.slane %v2547_v61, 2  ;;  %v2561_v59 = vadd.f32 %v2560_v41, %v2559_v23  ;;  %v2574_v45 = vrot.slane %v2573_v4, 4 }
 0x1c9   :  { %v2542_v0 = vadd.f32 %v2541_v55, %v2540_v35  ;;  %v2555_v30 = vrot.slane %v2554_v54, 2  ;;  %v2568_v19 = vadd.f32 %v2567_v27, %v2566_v10  ;;  %v2580_v12 = vsel %vm1299_vm2, %v6295_v5, 0.0 }
 0x1ca   :  { %v2536_v15 = vrot.slane %v2535_v7, 1  ;;  %v2549_v1 = vadd.f32 %v2548_v34, %v2547_v61  ;;  %v2562_v53 = vrot.slane %v2561_v59, 2  ;;  %v2575_v13 = vadd.f32 %v2574_v45, %v2573_v4 }
 0x1cb   :  { %v2543_v36 = vrot.slane %v2542_v0, 1  ;;  %v2556_v63 = vadd.f32 %v2555_v30, %v2554_v54  ;;  %v2569_v37 = vrot.slane %v2568_v19, 2  ;;  %v2581_v8 = vrot.slane %v2580_v12, 4 }
 0x1cc   :  { %v2537_v56 = vadd.f32 %v2536_v15, %v2535_v7  ;;  %v2550_v48 = vrot.slane %v2549_v1, 1  ;;  %v2563_v49 = vadd.f32 %v2562_v53, %v2561_v59  ;;  %v2576_v16 = vrot.slane %v2575_v13, 2 }
 0x1cd   :  { %v2544_v23 = vadd.f32 %v2543_v36, %v2542_v0  ;;  %v2557_v41 = vrot.slane %v2556_v63, 1  ;;  %v2570_v35 = vadd.f32 %v2569_v37, %v2568_v19  ;;  %v2582_v55 = vadd.f32 %v2581_v8, %v2580_v12 }
 0x1ce   :  { %v2551_v10 = vadd.f32 %v2550_v48, %v2549_v1  ;;  %v2564_v27 = vrot.slane %v2563_v49, 1  ;;  %v2577_v58 = vadd.f32 %v2576_v16, %v2575_v13  ;;  %4873 = vrcp.f32 %v2537_v56 }
 0x1cf   :  { %v2558_v62 = vadd.f32 %v2557_v41, %v2556_v63  ;;  %v2571_v61 = vrot.slane %v2570_v35, 1  ;;  %v2583_v34 = vrot.slane %v2582_v55, 2  ;;  %4875 = vrcp.f32 %v2544_v23  ;;  %v7950_v63 = vld [vmem:[#allocation2_spill] sm:$0xff] }
 0x1d0   :  { %v2565_v4 = vadd.f32 %v2564_v27, %v2563_v49  ;;  %v2578_v54 = vrot.slane %v2577_v58, 1  ;;  %4877 = vrcp.f32 %v2551_v10 }
 0x1d1   :  { %v2572_v45 = vadd.f32 %v2571_v61, %v2570_v35  ;;  %v2584_v7 = vadd.f32 %v2583_v34, %v2582_v55  ;;  %4879 = vrcp.f32 %v2558_v62 }
 0x1d2   :  { %v2579_v59 = vadd.f32 %v2578_v54, %v2577_v58  ;;  %4881 = vrcp.f32 %v2565_v4 }
 0x1d3   :  { %v2585_v0 = vrot.slane %v2584_v7, 1  ;;  %4883 = vrcp.f32 %v2572_v45 }
 0x1d4   :  { %4885 = vrcp.f32 %v2579_v59 }
 0x1d5   :  { %v2586_v30 = vadd.f32 %v2585_v0, %v2584_v7 }
 0x1d7   :  { %4887 = vrcp.f32 %v2586_v30 }
 0x1db   :  { %v4874_v19 = vpop.eup %4873 }
 0x1dc   :  { %v4876_v12 = vpop.eup %4875  ;;  %v2595_v15 = vmul.f32 %v4874_v19, %v6269_v21 }
 0x1dd   :  { %v4878_v1 = vpop.eup %4877  ;;  %v2596_v53 = vmul.f32 %v4876_v12, %v6271_v29 }
 0x1de   :  { %v4880_v13 = vpop.eup %4879  ;;  %v2597_v36 = vmul.f32 %v4878_v1, %v6275_v20  ;;  %v2617_v37 = vrot.slane %v2595_v15, %v7950_v63 }
 0x1df   :  { %v4882_v62 = vpop.eup %4881  ;;  %v2598_v58 = vmul.f32 %v4880_v13, %v6279_v3  ;;  %v2641_v8 = vrot.slane %v2596_v53, %v7950_v63 }
 0x1e0   :  { %v4884_v56 = vpop.eup %4883  ;;  %v2599_v48 = vmul.f32 %v4882_v62, %v6283_v17  ;;  %v2618_v49 = vcombine.high %v2617_v37, %v2617_v37  ;;  %v2665_v16 = vrot.slane %v2597_v36, %v7950_v63  ;;  %v2625_v23 = vrot.slane %v2617_v37, %v7950_v63 }
 0x1e1   :  { %v4886_v21 = vpop.eup %4885  ;;  %v2642_v29 = vcombine.high %v2641_v8, %v2641_v8  ;;  %v2649_v41 = vrot.slane %v2641_v8, %v7950_v63  ;;  %v2689_v20 = vrot.slane %v2598_v58, %v7950_v63  ;;  %v2600_v3 = vmul.f32 %v4884_v56, %v6287_v39 }
 0x1e2   :  { %v2632_v35 = vrot.slane %v2618_v49, %v7950_v63  ;;  %v2666_v55 = vcombine.high %v2665_v16, %v2665_v16  ;;  %v2601_v10 = vmul.f32 %v4886_v21, %v6291_v52  ;;  %v2673_v34 = vrot.slane %v2665_v16, %v7950_v63 }
 0x1e3   :  { %v2656_v17 = vrot.slane %v2642_v29, %v7950_v63  ;;  %v2690_v27 = vcombine.high %v2689_v20, %v2689_v20  ;;  %v2697_v54 = vrot.slane %v2689_v20, %v7950_v63  ;;  %v2713_v45 = vrot.slane %v2599_v48, %v7950_v63 }
 0x1e4   :  { %v4888_v61 = vpop.eup %4887  ;;  %v2680_v4 = vrot.slane %v2666_v55, %v7950_v63  ;;  %v2633_v59 = vcombine.high %v2625_v23, %v2625_v23  ;;  %v2657_v0 = vcombine.high %v2649_v41, %v2649_v41  ;;  %v2634_v30 = vcombine.high %v2632_v35, %v2632_v35  ;;  %v7951_v55 = vld [vmem:[#allocation3_spill] sm:$0xff] }
 0x1e5   :  { %v2602_v7 = vmul.f32 %v4888_v61, %v6295_v5  ;;  %v2704_v39 = vrot.slane %v2690_v27, %v7950_v63  ;;  %v2714_v52 = vcombine.high %v2713_v45, %v2713_v45  ;;  %v2721_v19 = vrot.slane %v2713_v45, %v7950_v63 }
 0x1e6   :  { %v2658_v12 = vcombine.high %v2656_v17, %v2656_v17  ;;  %v2737_v15 = vrot.slane %v2600_v3, %v7950_v63  ;;  %v2761_v1 = vrot.slane %v2601_v10, %v7950_v63  ;;  %v2681_v13 = vcombine.high %v2673_v34, %v2673_v34 }
 0x1e7   :  { %v2785_v53 = vrot.slane %v2602_v7, %v7950_v63  ;;  %v2682_v36 = vcombine.high %v2680_v4, %v2680_v4  ;;  %v2705_v37 = vcombine.high %v2697_v54, %v2697_v54  ;;  %v2728_v5 = vrot.slane %v2714_v52, %v7950_v63 }
 0x1e8   :  { %v2738_v62 = vcombine.high %v2737_v15, %v2737_v15  ;;  %v2745_v58 = vrot.slane %v2737_v15, %v7950_v63  ;;  %v2762_v8 = vcombine.high %v2761_v1, %v2761_v1  ;;  %v2769_v56 = vrot.slane %v2761_v1, %v7950_v63 }
 0x1e9   :  { %v2706_v48 = vcombine.high %v2704_v39, %v2704_v39  ;;  %v2729_v49 = vcombine.high %v2721_v19, %v2721_v19  ;;  %v2786_v16 = vcombine.high %v2785_v53, %v2785_v53  ;;  %v2793_v21 = vrot.slane %v2785_v53, %v7950_v63 }
 0x1ea   :  { %v2752_v29 = vrot.slane %v2738_v62, %v7950_v63  ;;  %v2776_v20 = vrot.slane %v2762_v8, %v7950_v63  ;;  %v2806_v3 = vrot.slane %v2625_v23, %v7951_v55  ;;  %v2810_v10 = vrot.slane %v2632_v35, %v7951_v55 }
 0x1eb   :  { %v2730_v27 = vcombine.high %v2728_v5, %v2728_v5  ;;  %v2753_v61 = vcombine.high %v2745_v58, %v2745_v58  ;;  %v2800_v45 = vrot.slane %v2786_v16, %v7950_v63  ;;  %v2814_v7 = vrot.slane %v2633_v59, %v7951_v55 }
 0x1ec   :  { %v2777_v52 = vcombine.high %v2769_v56, %v2769_v56  ;;  %v2801_v15 = vcombine.high %v2793_v21, %v2793_v21  ;;  %v2818_v1 = vrot.slane %v2634_v30, %v7951_v55  ;;  %v2822_v53 = vrot.slane %v2649_v41, %v7951_v55 }
 0x1ed   :  { %v2754_v28 = vcombine.high %v2752_v29, %v2752_v29  ;;  %v2778_v62 = vcombine.high %v2776_v20, %v2776_v20  ;;  %v2826_v8 = vrot.slane %v2656_v17, %v7951_v55  ;;  %v2830_v23 = vrot.slane %v2657_v0, %v7951_v55 }
 0x1ee   :  { %v2802_v32 = vcombine.high %v2800_v45, %v2800_v45  ;;  %v2834_v35 = vrot.slane %v2658_v12, %v7951_v55  ;;  %v2838_v47 = vrot.slane %v2673_v34, %v7951_v55  ;;  %v2842_v16 = vrot.slane %v2680_v4, %v7951_v55 }
 0x1ef   :  { %v2846_v59 = vrot.slane %v2681_v13, %v7951_v55  ;;  %v2850_v63 = vrot.slane %v2682_v36, %v7951_v55  ;;  %v2854_v30 = vrot.slane %v2697_v54, %v7951_v55  ;;  %v2858_v41 = vrot.slane %v2704_v39, %v7951_v55 }
 0x1f0   :  { %v2862_v18 = vrot.slane %v2705_v37, %v7951_v55  ;;  %v2866_v17 = vrot.slane %v2706_v48, %v7951_v55  ;;  %v2870_v0 = vrot.slane %v2721_v19, %v7951_v55  ;;  %v2874_v12 = vrot.slane %v2728_v5, %v7951_v55 }
 0x1f1   :  { %v2878_v34 = vrot.slane %v2729_v49, %v7951_v55  ;;  %v2882_v4 = vrot.slane %v2730_v27, %v7951_v55  ;;  %v2886_v13 = vrot.slane %v2745_v58, %v7951_v55  ;;  %v2890_v36 = vrot.slane %v2752_v29, %v7951_v55 }
 0x1f2   :  { %v2894_v54 = vrot.slane %v2753_v61, %v7951_v55  ;;  %v2898_v39 = vrot.slane %v2754_v28, %v7951_v55  ;;  %v2902_v37 = vrot.slane %v2769_v56, %v7951_v55  ;;  %v2906_v48 = vrot.slane %v2776_v20, %v7951_v55  ;;  %v7952_v61 = vld [vmem:[#allocation14_spill] sm:$0xff] }
 0x1f3   :  { %v2910_v19 = vrot.slane %v2777_v52, %v7951_v55  ;;  %v2914_v5 = vrot.slane %v2778_v62, %v7951_v55  ;;  %v2918_v49 = vrot.slane %v2793_v21, %v7951_v55  ;;  %v2922_v27 = vrot.slane %v2800_v45, %v7951_v55 }
 0x1f4   :  { %v6364_v58 = vrot.slane %v2801_v15, %v7951_v55  ;;  %v6367_v29 = vrot.slane %v2802_v32, %v7951_v55  ;;  %v2963_v28 = vmul.f32 %v2806_v3, %v7952_v61  ;;  %v6371_v56 = vmul.f32 %v7953_v57, %v2806_v3  ;;  %v7955_v3 = vld [vmem:[#allocation15_spill] sm:$0xff]  ;;  %v7956_v55 = vld [vmem:[#allocation13_spill] sm:$0xff] }
 0x1f5   :  { %v6374_v20 = vmul.f32 %v2810_v10, %v7905_v26  ;;  %v6377_v52 = vmul.f32 %v7906_v40, %v2810_v10  ;;  %v6380_v21 = vmul.f32 %v2814_v7, %v7911_v50  ;;  %v6383_v45 = vmul.f32 %v7912_v42, %v2814_v7 }
 0x1f6   :  { %v6386_v32 = vmul.f32 %v2818_v1, %v7918_v33  ;;  %v6389_v15 = vmul.f32 %v7919_v25, %v2818_v1  ;;  %v2971_v62 = vmul.f32 %v2822_v53, %v7955_v3  ;;  %v6393_v31 = vmul.f32 %v7956_v55, %v2822_v53  ;;  %v7960_v53 = vld [vmem:[#allocation30_spill] sm:$0xff] }
 0x1f7   :  { %v6396_v10 = vmul.f32 %v2826_v8, %v7907_v2  ;;  %v6399_v44 = vmul.f32 %v7908_v22, %v2826_v8  ;;  %v6402_v7 = vmul.f32 %v2830_v23, %v7913_v6  ;;  %v6405_v11 = vmul.f32 %v7914_v51, %v2830_v23  ;;  %v7963_v8 = vld [vmem:[#allocation32_spill] sm:$0xff]  ;;  %v7964_v6 = vld [vmem:[#allocation38_spill] sm:$0xff]  ;;  %v7970_v22 = vld [vmem:[#allocation31_spill] sm:$0xff] }
 0x1f8   :  { %7954 = vst [vmem:[#allocation84_spill] sm:$0xff] %v6389_v15  ;;  %v6408_v1 = vmul.f32 %v2834_v35, %v7920_v24  ;;  %v6411_v14 = vmul.f32 %v7958_v38, %v2834_v35  ;;  %v2979_v46 = vmul.f32 %v2838_v47, %v7960_v53  ;;  %v2980_v43 = vmul.f32 %v7961_v9, %v2838_v47  ;;  %v7965_v23 = vld [vmem:[#allocation36_spill] sm:$0xff]  ;;  %v7966_v24 = vld [vmem:[#allocation42_spill] sm:$0xff]  ;;  %v7971_v9 = vld [vmem:[#allocation29_spill] sm:$0xff] }
 0x1f9   :  { %v6416_v25 = vmul.f32 %v2842_v16, %v7962_v60  ;;  %v6419_v33 = vmul.f32 %v7963_v8, %v2842_v16  ;;  %v6422_v42 = vmul.f32 %v2846_v59, %v7964_v6  ;;  %v6425_v51 = vmul.f32 %v7965_v23, %v2846_v59  ;;  %v7968_v35 = vld [vmem:[#allocation40_spill] sm:$0xff]  ;;  %v7972_v2 = vld [vmem:[#allocation35_spill] sm:$0xff]  ;;  %v7973_v16 = vld [vmem:[#allocation33_spill] sm:$0xff] }
 0x1fa   :  { %7957 = vst [vmem:[#allocation85_spill] sm:$0xff] %v6408_v1  ;;  %7959 = vst [vmem:[#allocation86_spill] sm:$0xff] %v6411_v14  ;;  %v6428_v50 = vmul.f32 %v2850_v63, %v7966_v24  ;;  %v6431_v38 = vmul.f32 %v7968_v35, %v2850_v63  ;;  %v2987_v47 = vmul.f32 %v2854_v30, %v7970_v22  ;;  %v7974_v6 = vld [vmem:[#allocation39_spill] sm:$0xff]  ;;  %v7975_v59 = vld [vmem:[#allocation37_spill] sm:$0xff] }
 0x1fb   :  { %v2988_v60 = vmul.f32 %v7971_v9, %v2854_v30  ;;  %v6436_v40 = vmul.f32 %v2858_v41, %v7972_v2  ;;  %v6439_v8 = vmul.f32 %v7973_v16, %v2858_v41  ;;  %v6442_v26 = vmul.f32 %v2862_v18, %v7974_v6  ;;  %v7976_v24 = vld [vmem:[#allocation43_spill] sm:$0xff]  ;;  %v7978_v63 = vld [vmem:[#allocation41_spill] sm:$0xff]  ;;  %v7980_v22 = vld [vmem:[#allocation46_spill] sm:$0xff] }
 0x1fc   :  { %7967 = vst [vmem:[#allocation87_spill] sm:$0xff] %v6428_v50  ;;  %7969 = vst [vmem:[#allocation88_spill] sm:$0xff] %v6431_v38  ;;  %v6445_v23 = vmul.f32 %v7975_v59, %v2862_v18  ;;  %v6448_v53 = vmul.f32 %v2866_v17, %v7976_v24  ;;  %v6451_v35 = vmul.f32 %v7978_v63, %v2866_v17  ;;  %v7981_v9 = vld [vmem:[#allocation44_spill] sm:$0xff]  ;;  %v7982_v55 = vld [vmem:[#allocation50_spill] sm:$0xff] }
 0x1fd   :  { %v2995_v30 = vmul.f32 %v2870_v0, %v7980_v22  ;;  %v2996_v2 = vmul.f32 %v7981_v9, %v2870_v0  ;;  %v2997_v3 = vmul.f32 %v2874_v12, %v7982_v55  ;;  %v7983_v41 = vld [vmem:[#allocation48_spill] sm:$0xff]  ;;  %v7984_v6 = vld [vmem:[#allocation54_spill] sm:$0xff]  ;;  %v7990_v22 = vld [vmem:[#allocation47_spill] sm:$0xff] }
 0x1fe   :  { %7977 = vst [vmem:[#allocation89_spill] sm:$0xff] %v6448_v53  ;;  %7979 = vst [vmem:[#allocation90_spill] sm:$0xff] %v6451_v35  ;;  %v6457_v16 = vmul.f32 %v7983_v41, %v2874_v12  ;;  %v6460_v57 = vmul.f32 %v2878_v34, %v7984_v6  ;;  %v7985_v18 = vld [vmem:[#allocation52_spill] sm:$0xff]  ;;  %v7986_v24 = vld [vmem:[#allocation58_spill] sm:$0xff]  ;;  %v3003_v35 = vmul.f32 %v2886_v13, %v7990_v22 }
 0x1ff   :  { %v6463_v59 = vmul.f32 %v7985_v18, %v2878_v34  ;;  %v6466_v61 = vmul.f32 %v2882_v4, %v7986_v24  ;;  %v7988_v17 = vld [vmem:[#allocation56_spill] sm:$0xff]  ;;  %v7991_v0 = vld [vmem:[#allocation45_spill] sm:$0xff]  ;;  %v7992_v55 = vld [vmem:[#allocation51_spill] sm:$0xff] }
 0x200   :  { %v6469_v63 = vmul.f32 %v7988_v17, %v2882_v4  ;;  %v3004_v9 = vmul.f32 %v7991_v0, %v2886_v13  ;;  %v3005_v38 = vmul.f32 %v2890_v36, %v7992_v55  ;;  %v7993_v12 = vld [vmem:[#allocation49_spill] sm:$0xff]  ;;  %v7994_v6 = vld [vmem:[#allocation55_spill] sm:$0xff]  ;;  %v8000_v22 = vld [vmem:[#allocation62_spill] sm:$0xff] }
 0x201   :  { %7987 = vst [vmem:[#allocation91_spill] sm:$0xff] %v6466_v61  ;;  %v6475_v41 = vmul.f32 %v7993_v12, %v2890_v36  ;;  %v6478_v14 = vmul.f32 %v2894_v54, %v7994_v6  ;;  %v7995_v34 = vld [vmem:[#allocation53_spill] sm:$0xff]  ;;  %v7996_v24 = vld [vmem:[#allocation59_spill] sm:$0xff]  ;;  %v8001_v13 = vld [vmem:[#allocation60_spill] sm:$0xff] }
 0x202   :  { %7989 = vst [vmem:[#allocation92_spill] sm:$0xff] %v6469_v63  ;;  %v6481_v18 = vmul.f32 %v7995_v34, %v2894_v54  ;;  %v6484_v15 = vmul.f32 %v2898_v39, %v7996_v24  ;;  %v7998_v4 = vld [vmem:[#allocation57_spill] sm:$0xff]  ;;  %v3011_v63 = vmul.f32 %v2902_v37, %v8000_v22  ;;  %v3012_v0 = vmul.f32 %v8001_v13, %v2902_v37  ;;  %v8002_v55 = vld [vmem:[#allocation66_spill] sm:$0xff]  ;;  %v8003_v36 = vld [vmem:[#allocation64_spill] sm:$0xff] }
 0x203   :  { %v6487_v17 = vmul.f32 %v7998_v4, %v2898_v39  ;;  %v3013_v61 = vmul.f32 %v2906_v48, %v8002_v55  ;;  %v3014_v12 = vmul.f32 %v8003_v36, %v2906_v48  ;;  %v8004_v53 = vld [vmem:[#allocation70_spill] sm:$0xff]  ;;  %v8005_v50 = vld [vmem:[#allocation68_spill] sm:$0xff]  ;;  %v8008_v4 = vld [vmem:[#allocation63_spill] sm:$0xff]  ;;  %v3028_v36 = vsel %vm1266_vm1, %v2971_v62, 0.0 }
 0x204   :  { %7997 = vst [vmem:[#allocation93_spill] sm:$0xff] %v6484_v15  ;;  %v6494_v6 = vmul.f32 %v2910_v19, %v8004_v53  ;;  %v6497_v54 = vmul.f32 %v8005_v50, %v2910_v19  ;;  %v8006_v34 = vld [vmem:[#allocation74_spill] sm:$0xff]  ;;  %v8007_v15 = vld [vmem:[#allocation72_spill] sm:$0xff]  ;;  %v3019_v22 = vmul.f32 %v2918_v49, %v8008_v4  ;;  %v8010_v13 = vld [vmem:[#allocation67_spill] sm:$0xff]  ;;  %v3027_v53 = vsel %vm1266_vm1, %v2963_v28, 0.0 }
 0x205   :  { %7999 = vst [vmem:[#allocation94_spill] sm:$0xff] %v6487_v17  ;;  %v6500_v24 = vmul.f32 %v2914_v5, %v8006_v34  ;;  %v6503_v39 = vmul.f32 %v8007_v15, %v2914_v5  ;;  %v8009_v17 = vld [vmem:[#allocation61_spill] sm:$0xff]  ;;  %v3021_v55 = vmul.f32 %v2922_v27, %v8010_v13  ;;  %v8012_v19 = vld [vmem:[#allocation71_spill] sm:$0xff]  ;;  %v3030_v28 = vsel %vm1266_vm1, %v2979_v46, 0.0 }
 0x206   :  { %v3020_v37 = vmul.f32 %v8009_v17, %v2918_v49  ;;  %v8011_v1 = vld [vmem:[#allocation65_spill] sm:$0xff]  ;;  %v6513_v50 = vmul.f32 %v6364_v58, %v8012_v19  ;;  %v8014_v15 = vld [vmem:[#allocation75_spill] sm:$0xff]  ;;  %v3029_v49 = vadd.f32 %v3028_v36, %v3027_v53  ;;  %v3032_v62 = vsel %vm1266_vm1, %v2987_v47, 0.0 }
 0x207   :  { %v3022_v48 = vmul.f32 %v8011_v1, %v2922_v27  ;;  %v8013_v34 = vld [vmem:[#allocation69_spill] sm:$0xff]  ;;  %v6521_v4 = vmul.f32 %v6367_v29, %v8014_v15  ;;  %v3042_v19 = vsel %vm1266_vm1, %v6371_v56, 0.0  ;;  %v3043_v15 = vsel %vm1266_vm1, %v6393_v31, 0.0 }
 0x208   :  { %v6517_v5 = vmul.f32 %v8013_v34, %v6364_v58  ;;  %v8015_v13 = vld [vmem:[#allocation73_spill] sm:$0xff]  ;;  %v3031_v1 = vadd.f32 %v3030_v28, %v3029_v49  ;;  %v3034_v58 = vsel %vm1266_vm1, %v2995_v30, 0.0  ;;  %v3036_v34 = vsel %vm1266_vm1, %v3003_v35, 0.0 }
 0x209   :  { %v6525_v27 = vmul.f32 %v8015_v13, %v6367_v29  ;;  %v3038_v53 = vsel %vm1266_vm1, %v3011_v63, 0.0  ;;  %v3040_v29 = vsel %vm1266_vm1, %v3019_v22, 0.0  ;;  %v3044_v36 = vadd.f32 %v3043_v15, %v3042_v19 }
 0x20a   :  { %v3045_v46 = vsel %vm1266_vm1, %v2980_v43, 0.0  ;;  %v3033_v13 = vadd.f32 %v3032_v62, %v3031_v1  ;;  %v3047_v47 = vsel %vm1266_vm1, %v2988_v60, 0.0  ;;  %v3057_v56 = vsel %vm1266_vm1, %v6374_v20, 0.0 }
 0x20b   :  { %v3058_v30 = vsel %vm1266_vm1, %v6396_v10, 0.0  ;;  %v3046_v35 = vadd.f32 %v3045_v46, %v3044_v36  ;;  %v3049_v49 = vsel %vm1266_vm1, %v2996_v2, 0.0  ;;  %v3051_v31 = vsel %vm1266_vm1, %v3004_v9, 0.0 }
 0x20c   :  { %v3059_v63 = vadd.f32 %v3058_v30, %v3057_v56  ;;  %v3035_v28 = vadd.f32 %v3034_v58, %v3033_v13  ;;  %v3053_v22 = vsel %vm1266_vm1, %v3012_v0, 0.0  ;;  %v3055_v43 = vsel %vm1266_vm1, %v3020_v37, 0.0 }
 0x20d   :  { %v3060_v60 = vsel %vm1266_vm1, %v6416_v25, 0.0  ;;  %v3048_v15 = vadd.f32 %v3047_v47, %v3046_v35  ;;  %v3062_v20 = vsel %vm1266_vm1, %v6436_v40, 0.0  ;;  %v3072_v10 = vsel %vm1266_vm1, %v6377_v52, 0.0 }
 0x20e   :  { %v3061_v1 = vadd.f32 %v3060_v60, %v3059_v63  ;;  %v3037_v2 = vadd.f32 %v3036_v34, %v3035_v28  ;;  %v3064_v9 = vsel %vm1266_vm1, %v2997_v3, 0.0  ;;  %v3066_v13 = vsel %vm1266_vm1, %v3005_v38, 0.0 }
 0x20f   :  { %v3073_v0 = vsel %vm1266_vm1, %v6399_v44, 0.0  ;;  %v3050_v37 = vadd.f32 %v3049_v49, %v3048_v15  ;;  %v3068_v25 = vsel %vm1266_vm1, %v3013_v61, 0.0  ;;  %v3070_v36 = vsel %vm1266_vm1, %v3021_v55, 0.0 }
 0x210   :  { %v3063_v19 = vadd.f32 %v3062_v20, %v3061_v1  ;;  %v3074_v62 = vadd.f32 %v3073_v0, %v3072_v10  ;;  %v3039_v58 = vadd.f32 %v3038_v53, %v3037_v2  ;;  %v3075_v40 = vsel %vm1266_vm1, %v6419_v33, 0.0  ;;  %v8016_v10 = vld [vmem:[#allocation85_spill] sm:$0xff] }
 0x211   :  { %v3077_v52 = vsel %vm1266_vm1, %v6439_v8, 0.0  ;;  %v3052_v3 = vadd.f32 %v3051_v31, %v3050_v37  ;;  %v3087_v44 = vsel %vm1266_vm1, %v6380_v21, 0.0  ;;  %v3079_v46 = vsel %vm1266_vm1, %v6457_v16, 0.0 }
 0x212   :  { %v3065_v34 = vadd.f32 %v3064_v9, %v3063_v19  ;;  %v3076_v38 = vadd.f32 %v3075_v40, %v3074_v62  ;;  %v3081_v61 = vsel %vm1266_vm1, %v6475_v41, 0.0  ;;  %v3083_v55 = vsel %vm1266_vm1, %v3014_v12, 0.0  ;;  %v8019_v19 = vld [vmem:[#allocation91_spill] sm:$0xff]  ;;  %v8021_v40 = vld [vmem:[#allocation86_spill] sm:$0xff] }
 0x213   :  { %v3088_v33 = vsel %vm1266_vm1, %v6402_v7, 0.0  ;;  %v3085_v8 = vsel %vm1266_vm1, %v3022_v48, 0.0  ;;  %v6573_v30 = vadd.f32 %v3040_v29, %v3039_v58  ;;  %v3054_v35 = vadd.f32 %v3053_v22, %v3052_v3  ;;  %v8022_v3 = vld [vmem:[#allocation93_spill] sm:$0xff] }
 0x214   :  { %v3067_v53 = vadd.f32 %v3066_v13, %v3065_v34  ;;  %v3078_v47 = vadd.f32 %v3077_v52, %v3076_v38  ;;  %v3089_v56 = vadd.f32 %v3088_v33, %v3087_v44  ;;  %v3090_v21 = vsel %vm1266_vm1, %v6422_v42, 0.0  ;;  %v8023_v33 = vld [vmem:[#allocation88_spill] sm:$0xff] }
 0x215   :  { %v3092_v16 = vsel %vm1266_vm1, %v6442_v26, 0.0  ;;  %v3094_v7 = vsel %vm1266_vm1, %v6460_v57, 0.0  ;;  %v3096_v31 = vsel %vm1266_vm1, %v6478_v14, 0.0  ;;  %v3098_v48 = vsel %vm1266_vm1, %v6494_v6, 0.0 }
 0x216   :  { %v3069_v41 = vadd.f32 %v3068_v25, %v3067_v53  ;;  %v3080_v49 = vadd.f32 %v3079_v46, %v3078_v47  ;;  %v3091_v12 = vadd.f32 %v3090_v21, %v3089_v56  ;;  %v3102_v29 = vsel %vm1266_vm1, %v6383_v45, 0.0  ;;  %v8020_v25 = vld [vmem:[#allocation84_spill] sm:$0xff]  ;;  %v8024_v56 = vld [vmem:[#allocation90_spill] sm:$0xff] }
 0x217   :  { %v3103_v42 = vsel %vm1266_vm1, %v6405_v11, 0.0  ;;  %v3100_v28 = vsel %vm1266_vm1, %v6513_v50, 0.0  ;;  %v6591_v60 = vadd.f32 %v3055_v43, %v3054_v35  ;;  %v3105_v14 = vsel %vm1266_vm1, %v6425_v51, 0.0 }
 0x218   :  { %v3082_v63 = vadd.f32 %v3081_v61, %v3080_v49  ;;  %v3093_v26 = vadd.f32 %v3092_v16, %v3091_v12  ;;  %v3104_v22 = vadd.f32 %v3103_v42, %v3102_v29  ;;  %v6593_v57 = vadd.f32 %v3070_v36, %v3069_v41 }
 0x219   :  { %v3107_v6 = vsel %vm1266_vm1, %v6445_v23, 0.0  ;;  %v3109_v11 = vsel %vm1266_vm1, %v6463_v59, 0.0  ;;  %v3117_v1 = vsel %vm1266_vm1, %v6386_v32, 0.0  ;;  %v3111_v43 = vsel %vm1266_vm1, %v6481_v18, 0.0  ;;  %v8017_v59 = vld [vmem:[#allocation87_spill] sm:$0xff]  ;;  %v8018_v32 = vld [vmem:[#allocation89_spill] sm:$0xff] }
 0x21a   :  { %v3095_v45 = vadd.f32 %v3094_v7, %v3093_v26  ;;  %v3106_v15 = vadd.f32 %v3105_v14, %v3104_v22  ;;  %v3084_v50 = vadd.f32 %v3083_v55, %v3082_v63  ;;  %v3113_v20 = vsel %vm1266_vm1, %v6497_v54, 0.0  ;;  %v8026_v14 = vld [vmem:[#allocation94_spill] sm:$0xff] }
 0x21b   :  { %v3118_v51 = vsel %vm1266_vm1, %v8016_v10, 0.0  ;;  %v3115_v9 = vsel %vm1266_vm1, %v6517_v5, 0.0  ;;  %v3120_v0 = vsel %vm1266_vm1, %v8017_v59, 0.0  ;;  %v3122_v37 = vsel %vm1266_vm1, %v8018_v32, 0.0 }
 0x21c   :  { %v3097_v2 = vadd.f32 %v3096_v31, %v3095_v45  ;;  %v3108_v23 = vadd.f32 %v3107_v6, %v3106_v15  ;;  %v3119_v13 = vadd.f32 %v3118_v51, %v3117_v1  ;;  %v3124_v18 = vsel %vm1266_vm1, %v8019_v19, 0.0 }
 0x21d   :  { %v3132_v54 = vsel %vm1266_vm1, %v8020_v25, 0.0  ;;  %v3133_v52 = vsel %vm1266_vm1, %v8021_v40, 0.0  ;;  %v6621_v5 = vadd.f32 %v3085_v8, %v3084_v50  ;;  %v3126_v34 = vsel %vm1266_vm1, %v8022_v3, 0.0  ;;  %v8025_v8 = vld [vmem:[#allocation92_spill] sm:$0xff] }
 0x21e   :  { %v3099_v62 = vadd.f32 %v3098_v48, %v3097_v2  ;;  %v3110_v58 = vadd.f32 %v3109_v11, %v3108_v23  ;;  %v3121_v36 = vadd.f32 %v3120_v0, %v3119_v13  ;;  %v3128_v38 = vsel %vm1266_vm1, %v6500_v24, 0.0 }
 0x21f   :  { %v3134_v44 = vadd.f32 %v3133_v52, %v3132_v54  ;;  %v3135_v53 = vsel %vm1266_vm1, %v8023_v33, 0.0  ;;  %v3137_v35 = vsel %vm1266_vm1, %v8024_v56, 0.0  ;;  %v3139_v21 = vsel %vm1266_vm1, %v8025_v8, 0.0 }
 0x220   :  { %v6627_v46 = vadd.f32 %v3100_v28, %v3099_v62  ;;  %v3112_v61 = vadd.f32 %v3111_v43, %v3110_v58  ;;  %v3123_v55 = vadd.f32 %v3122_v37, %v3121_v36  ;;  %v3147_v16 = vmul.f32 %v6573_v30, %v6573_v30 }
 0x221   :  { %v3136_v47 = vadd.f32 %v3135_v53, %v3134_v44  ;;  %v3148_v49 = vmul.f32 %v6591_v60, %v6591_v60  ;;  %v3149_v12 = vmul.f32 %v6593_v57, %v6593_v57  ;;  %v3150_v31 = vmul.f32 %v6621_v5, %v6621_v5 }
 0x222   :  { %v3114_v41 = vadd.f32 %v3113_v20, %v3112_v61  ;;  %v3125_v24 = vadd.f32 %v3124_v18, %v3123_v55  ;;  %v3151_v48 = vmul.f32 %v6627_v46, %v6627_v46  ;;  %v3155_v29 = vsel %vm1266_vm1, %v3147_v16, 0.0 }
 0x223   :  { %v3138_v7 = vadd.f32 %v3137_v35, %v3136_v47  ;;  %v3156_v26 = vsel %vm1266_vm1, %v3148_v49, 0.0  ;;  %v3164_v28 = vsel %vm1266_vm1, %v3149_v12, 0.0  ;;  %v3141_v6 = vsel %vm1266_vm1, %v8026_v14, 0.0 }
 0x224   :  { %v6646_v42 = vadd.f32 %v3115_v9, %v3114_v41  ;;  %v3127_v63 = vadd.f32 %v3126_v34, %v3125_v24  ;;  %v3157_v45 = vadd.f32 %v3156_v26, %v3155_v29  ;;  %v3165_v15 = vsel %vm1266_vm1, %v3150_v31, 0.0 }
 0x225   :  { %v3140_v22 = vadd.f32 %v3139_v21, %v3138_v7  ;;  %v3166_v50 = vadd.f32 %v3165_v15, %v3164_v28  ;;  %v3173_v43 = vsel %vm1266_vm1, %v3151_v48, 0.0  ;;  %v3130_v20 = vsel %vm1266_vm1, %v6521_v4, 0.0 }
 0x226   :  { %v3129_v11 = vadd.f32 %v3128_v38, %v3127_v63  ;;  %v3152_v1 = vmul.f32 %v6646_v42, %v6646_v42  ;;  %v3158_v51 = vrot.slane %v3157_v45, 4  ;;  %v3143_v23 = vsel %vm1266_vm1, %v6503_v39, 0.0 }
 0x227   :  { %v3142_v10 = vadd.f32 %v3141_v6, %v3140_v22  ;;  %v3167_v9 = vrot.slane %v3166_v50, 4  ;;  %v3145_v37 = vsel %vm1266_vm1, %v6525_v27, 0.0 }
 0x228   :  { %v6658_v2 = vadd.f32 %v3130_v20, %v3129_v11  ;;  %v3174_v13 = vsel %vm1266_vm1, %v3152_v1, 0.0  ;;  %v3159_v0 = vadd.f32 %v3158_v51, %v3157_v45 }
 0x229   :  { %v3144_v59 = vadd.f32 %v3143_v23, %v3142_v10  ;;  %v3175_v32 = vadd.f32 %v3174_v13, %v3173_v43  ;;  %v3168_v4 = vadd.f32 %v3167_v9, %v3166_v50 }
 0x22a   :  { %v3153_v19 = vmul.f32 %v6658_v2, %v6658_v2  ;;  %v3160_v25 = vrot.slane %v3159_v0, 2 }
 0x22b   :  { %v6667_v18 = vadd.f32 %v3145_v37, %v3144_v59  ;;  %v3176_v54 = vrot.slane %v3175_v32, 4  ;;  %v3169_v62 = vrot.slane %v3168_v4, 2 }
 0x22c   :  { %v3161_v58 = vadd.f32 %v3160_v25, %v3159_v0  ;;  %v3182_v40 = vsel %vm1266_vm1, %v3153_v19, 0.0 }
 0x22d   :  { %v3154_v39 = vmul.f32 %v6667_v18, %v6667_v18  ;;  %v3177_v36 = vadd.f32 %v3176_v54, %v3175_v32  ;;  %v3170_v52 = vadd.f32 %v3169_v62, %v3168_v4 }
 0x22e   :  { %v3162_v3 = vrot.slane %v3161_v58, 1 }
 0x22f   :  { %v3178_v34 = vrot.slane %v3177_v36, 2  ;;  %v3183_v27 = vsel %vm1266_vm1, %v3154_v39, 0.0  ;;  %v3171_v38 = vrot.slane %v3170_v52, 1 }
 0x230   :  { %v3184_v44 = vadd.f32 %v3183_v27, %v3182_v40  ;;  %v3163_v61 = vadd.f32 %v3162_v3, %v3161_v58 }
 0x231   :  { %v3179_v55 = vadd.f32 %v3178_v34, %v3177_v36  ;;  %v3172_v33 = vadd.f32 %v3171_v38, %v3170_v52  ;;  %v8027_v38 = vld [vmem:[#allocation14_spill] sm:$0xff] }
 0x232   :  { %v3185_v53 = vrot.slane %v3184_v44, 4  ;;  %4889 = vrsqrt.f32 %v3163_v61  ;;  %vm3197_vm14 = vcmp.eq.f32.partialorder %v3163_v61, inf  ;;  %v3200_v7 = vand.u32 2147483648, %v3163_v61 }
 0x233   :  { %v3180_v47 = vrot.slane %v3179_v55, 1  ;;  %4891 = vrsqrt.f32 %v3172_v33  ;;  %vm3199_vm15 = vcmp.eq.f32.partialorder %v3163_v61, 0.0  ;;  %v3191_v63 = vadd.f32 1.0, %v3163_v61 }
 0x234   :  { %v3186_v56 = vadd.f32 %v3185_v53, %v3184_v44  ;;  %vm3204_vm0 = vcmp.eq.f32.partialorder %v3172_v33, inf  ;;  %v3207_v28 = vand.u32 2147483648, %v3172_v33  ;;  %vm3206_vm3 = vcmp.eq.f32.partialorder %v3172_v33, 0.0 }
 0x235   :  { %v3181_v35 = vadd.f32 %v3180_v47, %v3179_v55  ;;  %v3192_v45 = vadd.f32 1.0, %v3172_v33 }
 0x236   :  { %v3187_v8 = vrot.slane %v3186_v56, 2 }
 0x237   :  { %4893 = vrsqrt.f32 %v3181_v35  ;;  %vm3211_vm4 = vcmp.eq.f32.partialorder %v3181_v35, inf  ;;  %v3214_v11 = vand.u32 2147483648, %v3181_v35  ;;  %vm3213_vm5 = vcmp.eq.f32.partialorder %v3181_v35, 0.0 }
 0x238   :  { %v3188_v21 = vadd.f32 %v3187_v8, %v3186_v56  ;;  %v3193_v10 = vadd.f32 1.0, %v3181_v35 }
 0x23a   :  { %v3189_v16 = vrot.slane %v3188_v21, 1 }
 0x23c   :  { %v6673_v41 = vadd.f32 %v3189_v16, %v3188_v21  ;;  %v8033_v21 = vld [vmem:[#allocation16_spill] sm:$0xff] }
 0x23e   :  { %4895 = vrsqrt.f32 %v6673_v41  ;;  %vm3218_vm6 = vcmp.eq.f32.partialorder %v6673_v41, inf  ;;  %v3221_v0 = vand.u32 2147483648, %v6673_v41  ;;  %vm3220_vm7 = vcmp.eq.f32.partialorder %v6673_v41, 0.0 }
 0x23f   :  { %v4890_v24 = vpop.eup %4889  ;;  %v3194_v19 = vadd.f32 1.0, %v6673_v41 }
 0x240   :  { %v3196_v49 = vmul.f32 %v4890_v24, %v3163_v61  ;;  %v4892_v12 = vpop.eup %4891  ;;  %v8034_v24 = vld [vmem:[#allocation19_spill] sm:$0xff] }
 0x241   :  { %v3203_v48 = vmul.f32 %v4892_v12, %v3172_v33  ;;  %v8035_v12 = vld [vmem:[#allocation17_spill] sm:$0xff] }
 0x242   :  { %v3198_v31 = vsel %vm3197_vm14, %v3163_v61, %v3196_v49 }
 0x243   :  { %v3201_v26 = vsel %vm3199_vm15, %v3200_v7, %v3198_v31  ;;  %v3205_v22 = vsel %vm3204_vm0, %v3172_v33, %v3203_v48 }
 0x244   :  { %v4894_v29 = vpop.eup %4893  ;;  %v3223_v6 = vadd.f32 6e-08, %v3201_v26  ;;  %v3208_v15 = vsel %vm3206_vm3, %v3207_v28, %v3205_v22  ;;  %v8039_v26 = vld [vmem:[#allocation20_spill] sm:$0xff]  ;;  %v8040_v22 = vld [vmem:[#allocation23_spill] sm:$0xff] }
 0x245   :  { %v3210_v14 = vmul.f32 %v4894_v29, %v3181_v35  ;;  %v3224_v50 = vadd.f32 6e-08, %v3208_v15  ;;  %v8038_v29 = vld [vmem:[#allocation22_spill] sm:$0xff]  ;;  %v8042_v15 = vld [vmem:[#allocation32_spill] sm:$0xff] }
 0x246   :  { %v3227_v43 = vmul.f32 %v3223_v6, %v3191_v63  ;;  %v8041_v6 = vld [vmem:[#allocation21_spill] sm:$0xff] }
 0x247   :  { %v3212_v1 = vsel %vm3211_vm4, %v3181_v35, %v3210_v14  ;;  %v3228_v23 = vmul.f32 %v3224_v50, %v3192_v45 }
 0x248   :  { %v3215_v20 = vsel %vm3213_vm5, %v3214_v11, %v3212_v1  ;;  %4897 = vrcp.f32 %v3227_v43  ;;  %v8043_v1 = vld [vmem:[#allocation38_spill] sm:$0xff]  ;;  %v8044_v43 = vld [vmem:[#allocation36_spill] sm:$0xff] }
 0x249   :  { %v3225_v51 = vadd.f32 6e-08, %v3215_v20  ;;  %4899 = vrcp.f32 %v3228_v23 }
 0x24b   :  { %v4896_v9 = vpop.eup %4895  ;;  %v3229_v13 = vmul.f32 %v3225_v51, %v3193_v10  ;;  %v8045_v10 = vld [vmem:[#allocation31_spill] sm:$0xff] }
 0x24c   :  { %v3217_v59 = vmul.f32 %v4896_v9, %v6673_v41  ;;  %v8046_v9 = vld [vmem:[#allocation29_spill] sm:$0xff] }
 0x24d   :  { %4901 = vrcp.f32 %v3229_v13 }
 0x24e   :  { %v3219_v32 = vsel %vm3218_vm6, %v6673_v41, %v3217_v59  ;;  %v8047_v59 = vld [vmem:[#allocation35_spill] sm:$0xff] }
 0x24f   :  { %v3222_v37 = vsel %vm3220_vm7, %v3221_v0, %v3219_v32  ;;  %v8048_v32 = vld [vmem:[#allocation33_spill] sm:$0xff] }
 0x250   :  { %v3226_v4 = vadd.f32 6e-08, %v3222_v37 }
 0x252   :  { %v3230_v25 = vmul.f32 %v3226_v4, %v3194_v19  ;;  %v8049_v19 = vld [vmem:[#allocation39_spill] sm:$0xff] }
 0x254   :  { %4903 = vrcp.f32 %v3230_v25 }
 0x255   :  { %v4898_v54 = vpop.eup %4897 }
 0x256   :  { %v3235_v62 = vmul.f32 %v4898_v54, %v3163_v61  ;;  %v4900_v39 = vpop.eup %4899  ;;  %v8028_v61 = vld [vmem:[#allocation12_spill] sm:$0xff]  ;;  %v8050_v54 = vld [vmem:[#allocation37_spill] sm:$0xff] }
 0x257   :  { %v3236_v58 = vmul.f32 %v4900_v39, %v3172_v33  ;;  %v8030_v33 = vld [vmem:[#allocation13_spill] sm:$0xff]  ;;  %v8051_v39 = vld [vmem:[#allocation46_spill] sm:$0xff] }
 0x258   :  { %v6683_v36 = vmul.f32 %v3235_v62, %v6573_v30  ;;  %v6686_v40 = vmul.f32 %v3235_v62, %v6591_v60  ;;  %v8029_v30 = vld [vmem:[#allocation15_spill] sm:$0xff] }
 0x259   :  { %v6689_v34 = vmul.f32 %v3236_v58, %v6593_v57  ;;  %v6692_v27 = vmul.f32 %v3236_v58, %v6621_v5  ;;  %v8031_v57 = vld [vmem:[#allocation30_spill] sm:$0xff] }
 0x25a   :  { %v4902_v52 = vpop.eup %4901  ;;  %v6696_v44 = vmul.f32 %v6683_v36, %v8027_v38  ;;  %v6700_v55 = vmul.f32 %v8028_v61, %v6686_v40  ;;  %v6704_v60 = vmul.f32 %v6683_v36, %v8029_v30  ;;  %v6708_v53 = vmul.f32 %v8030_v33, %v6686_v40 }
 0x25b   :  { %v3237_v3 = vmul.f32 %v4902_v52, %v3181_v35  ;;  %v6712_v5 = vmul.f32 %v6683_v36, %v8031_v57  ;;  %v8032_v35 = vld [vmem:[#allocation18_spill] sm:$0xff]  ;;  %v6722_v16 = vmul.f32 %v8033_v21, %v6692_v27  ;;  %v6726_v49 = vmul.f32 %v6689_v34, %v8034_v24  ;;  %v8052_v52 = vld [vmem:[#allocation44_spill] sm:$0xff]  ;;  %v8070_v24 = vld [vmem:[#allocation25_spill] sm:$0xff] }
 0x25c   :  { %v6718_v8 = vmul.f32 %v6689_v34, %v8032_v35  ;;  %v6730_v7 = vmul.f32 %v8035_v12, %v6692_v27  ;;  %v6754_v11 = vmul.f32 %v8042_v15, %v6692_v27  ;;  %v6764_v51 = vmul.f32 %v6683_v36, %v8045_v10 }
 0x25d   :  { %v3243_v47 = vmul.f32 %v3237_v3, %v6627_v46  ;;  %v3244_v56 = vmul.f32 %v3237_v3, %v6646_v42  ;;  %v8036_v46 = vld [vmem:[#allocation28_spill] sm:$0xff]  ;;  %v8037_v42 = vld [vmem:[#allocation34_spill] sm:$0xff]  ;;  %v6768_v13 = vmul.f32 %v8046_v9, %v6686_v40  ;;  %v6772_v0 = vmul.f32 %v6689_v34, %v8047_v59 }
 0x25e   :  { %v6734_v31 = vmul.f32 %v8036_v46, %v6686_v40  ;;  %v6738_v48 = vmul.f32 %v6689_v34, %v8037_v42  ;;  %v6776_v37 = vmul.f32 %v8048_v32, %v6692_v27  ;;  %v6787_v58 = vmul.f32 %v6683_v36, %v8051_v39  ;;  %v8053_v59 = vld [vmem:[#allocation50_spill] sm:$0xff]  ;;  %v8063_v46 = vld [vmem:[#allocation55_spill] sm:$0xff] }
 0x25f   :  { %v6741_v63 = vmul.f32 %v3243_v47, %v8038_v29  ;;  %v6744_v28 = vmul.f32 %v8039_v26, %v3244_v56  ;;  %v6747_v14 = vmul.f32 %v3243_v47, %v8040_v22  ;;  %v6750_v45 = vmul.f32 %v8041_v6, %v3244_v56  ;;  %v8068_v6 = vld [vmem:[#allocation24_spill] sm:$0xff] }
 0x260   :  { %v6757_v50 = vmul.f32 %v3243_v47, %v8043_v1  ;;  %v6760_v20 = vmul.f32 %v8044_v43, %v3244_v56  ;;  %v6779_v4 = vmul.f32 %v3243_v47, %v8049_v19  ;;  %v6783_v62 = vmul.f32 %v8050_v54, %v3244_v56  ;;  %v8054_v19 = vld [vmem:[#allocation48_spill] sm:$0xff] }
 0x261   :  { %v4904_v23 = vpop.eup %4903  ;;  %v6791_v3 = vmul.f32 %v8052_v52, %v6686_v40  ;;  %v6795_v32 = vmul.f32 %v6689_v34, %v8053_v59  ;;  %v6799_v9 = vmul.f32 %v8054_v19, %v6692_v27  ;;  %v8056_v54 = vld [vmem:[#allocation52_spill] sm:$0xff]  ;;  %v8057_v52 = vld [vmem:[#allocation47_spill] sm:$0xff]  ;;  %v8058_v59 = vld [vmem:[#allocation45_spill] sm:$0xff] }
 0x262   :  { %v3238_v25 = vmul.f32 %v4904_v23, %v6673_v41  ;;  %v8055_v41 = vld [vmem:[#allocation54_spill] sm:$0xff]  ;;  %v6805_v10 = vmul.f32 %v8056_v54, %v3244_v56  ;;  %v6811_v1 = vmul.f32 %v6683_v36, %v8057_v52  ;;  %v6815_v15 = vmul.f32 %v8058_v59, %v6686_v40  ;;  %v8059_v19 = vld [vmem:[#allocation51_spill] sm:$0xff] }
 0x263   :  { %v6802_v23 = vmul.f32 %v3243_v47, %v8055_v41  ;;  %v6819_v42 = vmul.f32 %v6689_v34, %v8059_v19  ;;  %v8061_v41 = vld [vmem:[#allocation49_spill] sm:$0xff]  ;;  %v8067_v52 = vld [vmem:[#allocation26_spill] sm:$0xff]  ;;  %v8069_v59 = vld [vmem:[#allocation27_spill] sm:$0xff] }
 0x264   :  { %v3245_v39 = vmul.f32 %v3238_v25, %v6658_v2  ;;  %v3246_v43 = vmul.f32 %v3238_v25, %v6667_v18  ;;  %v6823_v54 = vmul.f32 %v8061_v41, %v6692_v27  ;;  %v6826_v2 = vmul.f32 %v3243_v47, %v8063_v46  ;;  %v8065_v18 = vld [vmem:[#allocation53_spill] sm:$0xff]  ;;  %v8071_v19 = vld [vmem:[#allocation42_spill] sm:$0xff]  ;;  %v8072_v41 = vld [vmem:[#allocation40_spill] sm:$0xff] }
 0x265   :  { %8060 = vst [vmem:[#allocation85_spill] sm:$0xff] %v6819_v42  ;;  %v6829_v25 = vmul.f32 %v8065_v18, %v3244_v56  ;;  %v8073_v46 = vld [vmem:[#allocation43_spill] sm:$0xff]  ;;  %v8074_v18 = vld [vmem:[#allocation41_spill] sm:$0xff]  ;;  %v8093_v42 = vld [vmem:[#allocation72_spill] sm:$0xff] }
 0x266   :  { %8062 = vst [vmem:[#allocation87_spill] sm:$0xff] %v6823_v54  ;;  %8064 = vst [vmem:[#allocation89_spill] sm:$0xff] %v6826_v2  ;;  %v3253_v57 = vmul.f32 %v3245_v39, %v8067_v52  ;;  %v3254_v22 = vmul.f32 %v8068_v6, %v3246_v43  ;;  %v3261_v12 = vmul.f32 %v3245_v39, %v8069_v59  ;;  %v8075_v52 = vld [vmem:[#allocation58_spill] sm:$0xff]  ;;  %v8076_v6 = vld [vmem:[#allocation56_spill] sm:$0xff] }
 0x267   :  { %8066 = vst [vmem:[#allocation91_spill] sm:$0xff] %v6829_v25  ;;  %v6835_v33 = vmul.f32 %v8070_v24, %v3246_v43  ;;  %v6838_v30 = vmul.f32 %v3245_v39, %v8071_v19  ;;  %v6841_v26 = vmul.f32 %v8072_v41, %v3246_v43  ;;  %v6844_v29 = vmul.f32 %v3245_v39, %v8073_v46  ;;  %v8077_v24 = vld [vmem:[#allocation59_spill] sm:$0xff]  ;;  %v8079_v19 = vld [vmem:[#allocation57_spill] sm:$0xff]  ;;  %v8081_v41 = vld [vmem:[#allocation62_spill] sm:$0xff] }
 0x268   :  { %v6847_v21 = vmul.f32 %v8074_v18, %v3246_v43  ;;  %v6850_v35 = vmul.f32 %v3245_v39, %v8075_v52  ;;  %v6853_v59 = vmul.f32 %v8076_v6, %v3246_v43  ;;  %v6856_v61 = vmul.f32 %v3245_v39, %v8077_v24  ;;  %v8083_v46 = vld [vmem:[#allocation60_spill] sm:$0xff]  ;;  %v8085_v2 = vld [vmem:[#allocation66_spill] sm:$0xff] }
 0x269   :  { %v6859_v38 = vmul.f32 %v8079_v19, %v3246_v43  ;;  %v6863_v25 = vmul.f32 %v6683_v36, %v8081_v41  ;;  %v6867_v18 = vmul.f32 %v8083_v46, %v6686_v40  ;;  %v6871_v52 = vmul.f32 %v6689_v34, %v8085_v2  ;;  %v8086_v6 = vld [vmem:[#allocation64_spill] sm:$0xff]  ;;  %v8088_v24 = vld [vmem:[#allocation70_spill] sm:$0xff] }
 0x26a   :  { %8078 = vst [vmem:[#allocation84_spill] sm:$0xff] %v6856_v61  ;;  %v6875_v54 = vmul.f32 %v8086_v6, %v6692_v27  ;;  %v6878_v61 = vmul.f32 %v3243_v47, %v8088_v24  ;;  %v8089_v19 = vld [vmem:[#allocation68_spill] sm:$0xff]  ;;  %v8091_v41 = vld [vmem:[#allocation74_spill] sm:$0xff]  ;;  %v6887_v46 = vmul.f32 %v8093_v42, %v3246_v43  ;;  %v6895_v6 = vmul.f32 %v8009_v17, %v6686_v40  ;;  %v8100_v42 = vld [vmem:[#allocation69_spill] sm:$0xff] }
 0x26b   :  { %8080 = vst [vmem:[#allocation86_spill] sm:$0xff] %v6859_v38  ;;  %8082 = vst [vmem:[#allocation93_spill] sm:$0xff] %v6863_v25  ;;  %v6881_v38 = vmul.f32 %v8089_v19, %v3244_v56  ;;  %v6884_v25 = vmul.f32 %v3245_v39, %v8091_v41  ;;  %v8098_v19 = vld [vmem:[#allocation65_spill] sm:$0xff]  ;;  %v8099_v41 = vld [vmem:[#allocation71_spill] sm:$0xff] }
 0x26c   :  { %8084 = vst [vmem:[#allocation88_spill] sm:$0xff] %v6867_v18  ;;  %8087 = vst [vmem:[#allocation90_spill] sm:$0xff] %v6875_v54  ;;  %v8095_v18 = vld [vmem:[#allocation63_spill] sm:$0xff] }
 0x26d   :  { %8090 = vst [vmem:[#allocation92_spill] sm:$0xff] %v6881_v38  ;;  %8092 = vst [vmem:[#allocation94_spill] sm:$0xff] %v6884_v25  ;;  %v6891_v2 = vmul.f32 %v6683_v36, %v8095_v18  ;;  %v8097_v54 = vld [vmem:[#allocation67_spill] sm:$0xff]  ;;  %v6903_v38 = vmul.f32 %v8098_v19, %v6692_v27  ;;  %v6906_v25 = vmul.f32 %v3243_v47, %v8099_v41  ;;  %v3320_v27 = vsel %vm1266_vm1, %v6718_v8, 0.0 }
 0x26e   :  { %8094 = vst [vmem:[#allocation95_spill] sm:$0xff] %v6887_v46  ;;  %v6899_v24 = vmul.f32 %v6689_v34, %v8097_v54  ;;  %v6909_v46 = vmul.f32 %v8100_v42, %v3244_v56  ;;  %v8102_v36 = vld [vmem:[#allocation75_spill] sm:$0xff]  ;;  %v3311_v34 = vsel %vm1266_vm1, %v6696_v44, 0.0  ;;  %v3312_v54 = vsel %vm1266_vm1, %v6700_v55, 0.0 }
 0x26f   :  { %8096 = vst [vmem:[#allocation96_spill] sm:$0xff] %v6891_v2  ;;  %v6912_v18 = vmul.f32 %v3245_v39, %v8102_v36  ;;  %v8104_v2 = vld [vmem:[#allocation73_spill] sm:$0xff]  ;;  %v3321_v47 = vsel %vm1266_vm1, %v6722_v16, 0.0  ;;  %v3313_v56 = vadd.f32 %v3312_v54, %v3311_v34  ;;  %v3329_v39 = vsel %vm1266_vm1, %v6741_v63, 0.0 }
 0x270   :  { %8101 = vst [vmem:[#allocation97_spill] sm:$0xff] %v6909_v46  ;;  %v6915_v40 = vmul.f32 %v8104_v2, %v3246_v43  ;;  %v3322_v42 = vadd.f32 %v3321_v47, %v3320_v27  ;;  %v3330_v43 = vsel %vm1266_vm1, %v6744_v28, 0.0  ;;  %v3338_v44 = vsel %vm1266_vm1, %v3253_v57, 0.0 }
 0x271   :  { %8103 = vst [vmem:[#allocation98_spill] sm:$0xff] %v6912_v18  ;;  %v3331_v2 = vadd.f32 %v3330_v43, %v3329_v39  ;;  %v3339_v36 = vsel %vm1266_vm1, %v3254_v22, 0.0  ;;  %v3347_v55 = vsel %vm1266_vm1, %v6704_v60, 0.0  ;;  %v3314_v8 = vrot.slane %v3313_v56, 4 }
 0x272   :  { %8105 = vst [vmem:[#allocation99_spill] sm:$0xff] %v6915_v40  ;;  %v3323_v41 = vrot.slane %v3322_v42, 4  ;;  %v3340_v19 = vadd.f32 %v3339_v36, %v3338_v44  ;;  %v3348_v16 = vsel %vm1266_vm1, %v6708_v53, 0.0  ;;  %v3356_v63 = vsel %vm1266_vm1, %v6726_v49, 0.0 }
 0x273   :  { %v3332_v54 = vrot.slane %v3331_v2, 4  ;;  %v3349_v34 = vadd.f32 %v3348_v16, %v3347_v55  ;;  %v3357_v28 = vsel %vm1266_vm1, %v6730_v7, 0.0  ;;  %v3315_v57 = vadd.f32 %v3314_v8, %v3313_v56 }
 0x274   :  { %v3324_v27 = vadd.f32 %v3323_v41, %v3322_v42  ;;  %v3341_v22 = vrot.slane %v3340_v19, 4  ;;  %v3358_v47 = vadd.f32 %v3357_v28, %v3356_v63  ;;  %v3365_v36 = vsel %vm1266_vm1, %v6747_v14, 0.0 }
 0x275   :  { %v3333_v39 = vadd.f32 %v3332_v54, %v3331_v2  ;;  %v3350_v60 = vrot.slane %v3349_v34, 4  ;;  %v3366_v53 = vsel %vm1266_vm1, %v6750_v45, 0.0  ;;  %v3316_v43 = vrot.slane %v3315_v57, 2 }
 0x276   :  { %v3325_v44 = vrot.slane %v3324_v27, 2  ;;  %v3342_v55 = vadd.f32 %v3341_v22, %v3340_v19  ;;  %v3359_v16 = vrot.slane %v3358_v47, 4  ;;  %v3367_v40 = vadd.f32 %v3366_v53, %v3365_v36 }
 0x277   :  { %v3334_v49 = vrot.slane %v3333_v39, 2  ;;  %v3351_v17 = vadd.f32 %v3350_v60, %v3349_v34  ;;  %v3374_v7 = vsel %vm1266_vm1, %v3261_v12, 0.0  ;;  %v3317_v42 = vadd.f32 %v3316_v43, %v3315_v57 }
 0x278   :  { %v3326_v41 = vadd.f32 %v3325_v44, %v3324_v27  ;;  %v3343_v56 = vrot.slane %v3342_v55, 2  ;;  %v3360_v2 = vadd.f32 %v3359_v16, %v3358_v47  ;;  %v3368_v63 = vrot.slane %v3367_v40, 4 }
 0x279   :  { %v3335_v8 = vadd.f32 %v3334_v49, %v3333_v39  ;;  %v3352_v54 = vrot.slane %v3351_v17, 2  ;;  %v3375_v14 = vsel %vm1266_vm1, %v6835_v33, 0.0  ;;  %v3318_v45 = vrot.slane %v3317_v42, 1 }
 0x27a   :  { %v3327_v28 = vrot.slane %v3326_v41, 1  ;;  %v3344_v18 = vadd.f32 %v3343_v56, %v3342_v55  ;;  %v3361_v19 = vrot.slane %v3360_v2, 2  ;;  %v3369_v34 = vadd.f32 %v3368_v63, %v3367_v40 }
 0x27b   :  { %v3336_v22 = vrot.slane %v3335_v8, 1  ;;  %v3353_v46 = vadd.f32 %v3352_v54, %v3351_v17  ;;  %v3376_v60 = vadd.f32 %v3375_v14, %v3374_v7  ;;  %v6946_v36 = vadd.f32 %v3318_v45, %v3317_v42 }
 0x27c   :  { %v6948_v12 = vadd.f32 %v3327_v28, %v3326_v41  ;;  %v3345_v57 = vrot.slane %v3344_v18, 1  ;;  %v3362_v27 = vadd.f32 %v3361_v19, %v3360_v2  ;;  %v3370_v53 = vrot.slane %v3369_v34, 2 }
 0x27d   :  { %v6950_v47 = vadd.f32 %v3336_v22, %v3335_v8  ;;  %v3354_v39 = vrot.slane %v3353_v46, 1  ;;  %v3377_v43 = vrot.slane %v3376_v60, 4  ;;  %v3383_v55 = vsel %vm1266_vm1, %v6712_v5, 0.0 }
 0x27e   :  { %v6952_v33 = vadd.f32 %v3345_v57, %v3344_v18  ;;  %v3363_v44 = vrot.slane %v3362_v27, 1  ;;  %v3384_v17 = vsel %vm1266_vm1, %v6734_v31, 0.0  ;;  %v3371_v16 = vadd.f32 %v3370_v53, %v3369_v34 }
 0x27f   :  { %v6958_v40 = vadd.f32 %v3354_v39, %v3353_v46  ;;  %v3378_v49 = vadd.f32 %v3377_v43, %v3376_v60  ;;  %v3385_v7 = vadd.f32 %v3384_v17, %v3383_v55  ;;  %v3392_v41 = vsel %vm1266_vm1, %v6738_v48, 0.0 }
 0x280   :  { %v6960_v42 = vadd.f32 %v3363_v44, %v3362_v27  ;;  %v3393_v18 = vsel %vm1266_vm1, %v6754_v11, 0.0  ;;  %v3401_v56 = vsel %vm1266_vm1, %v6757_v50, 0.0  ;;  %v3372_v5 = vrot.slane %v3371_v16, 1 }
 0x281   :  { %v3379_v2 = vrot.slane %v3378_v49, 2  ;;  %v3386_v8 = vrot.slane %v3385_v7, 4  ;;  %v3394_v31 = vadd.f32 %v3393_v18, %v3392_v41  ;;  %v3402_v46 = vsel %vm1266_vm1, %v6760_v20, 0.0 }
 0x282   :  { %v3410_v54 = vsel %vm1266_vm1, %v6838_v30, 0.0  ;;  %v3411_v63 = vsel %vm1266_vm1, %v6841_v26, 0.0  ;;  %v3419_v48 = vsel %vm1266_vm1, %v6764_v51, 0.0  ;;  %v6976_v11 = vadd.f32 %v3372_v5, %v3371_v16 }
 0x283   :  { %v3380_v14 = vadd.f32 %v3379_v2, %v3378_v49  ;;  %v3387_v50 = vadd.f32 %v3386_v8, %v3385_v7  ;;  %v3395_v45 = vrot.slane %v3394_v31, 4  ;;  %v3403_v28 = vadd.f32 %v3402_v46, %v3401_v56 }
 0x284   :  { %v3412_v19 = vadd.f32 %v3411_v63, %v3410_v54  ;;  %v3420_v22 = vsel %vm1266_vm1, %v6768_v13, 0.0  ;;  %v3428_v20 = vsel %vm1266_vm1, %v6772_v0, 0.0  ;;  %v3429_v51 = vsel %vm1266_vm1, %v6776_v37, 0.0 }
 0x285   :  { %v3381_v30 = vrot.slane %v3380_v14, 1  ;;  %v3388_v34 = vrot.slane %v3387_v50, 2  ;;  %v3396_v60 = vadd.f32 %v3395_v45, %v3394_v31  ;;  %v3421_v26 = vadd.f32 %v3420_v22, %v3419_v48 }
 0x286   :  { %v3404_v57 = vrot.slane %v3403_v28, 4  ;;  %v3413_v27 = vrot.slane %v3412_v19, 4  ;;  %v3437_v39 = vsel %vm1266_vm1, %v6779_v4, 0.0  ;;  %v3430_v0 = vadd.f32 %v3429_v51, %v3428_v20 }
 0x287   :  { %v6986_v53 = vadd.f32 %v3381_v30, %v3380_v14  ;;  %v3389_v43 = vadd.f32 %v3388_v34, %v3387_v50  ;;  %v3397_v44 = vrot.slane %v3396_v60, 2  ;;  %v3422_v13 = vrot.slane %v3421_v26, 4 }
 0x288   :  { %v3405_v55 = vadd.f32 %v3404_v57, %v3403_v28  ;;  %v3414_v17 = vadd.f32 %v3413_v27, %v3412_v19  ;;  %v3438_v16 = vsel %vm1266_vm1, %v6783_v62, 0.0  ;;  %v3431_v5 = vrot.slane %v3430_v0, 4 }
 0x289   :  { %v3390_v49 = vrot.slane %v3389_v43, 1  ;;  %v3398_v7 = vadd.f32 %v3397_v44, %v3396_v60  ;;  %v3423_v41 = vadd.f32 %v3422_v13, %v3421_v26  ;;  %v3439_v18 = vadd.f32 %v3438_v16, %v3437_v39 }
 0x28a   :  { %v3406_v56 = vrot.slane %v3405_v55, 2  ;;  %v3415_v37 = vrot.slane %v3414_v17, 2  ;;  %v3446_v4 = vsel %vm1266_vm1, %v6844_v29, 0.0  ;;  %v3432_v48 = vadd.f32 %v3431_v5, %v3430_v0 }
 0x28b   :  { %v6992_v2 = vadd.f32 %v3390_v49, %v3389_v43  ;;  %v3399_v8 = vrot.slane %v3398_v7, 1  ;;  %v3424_v31 = vrot.slane %v3423_v41, 2  ;;  %v3440_v46 = vrot.slane %v3439_v18, 4 }
 0x28c   :  { %v3407_v54 = vadd.f32 %v3406_v56, %v3405_v55  ;;  %v3416_v63 = vadd.f32 %v3415_v37, %v3414_v17  ;;  %v3447_v62 = vsel %vm1266_vm1, %v6847_v21, 0.0  ;;  %v3433_v20 = vrot.slane %v3432_v48, 2 }
 0x28d   :  { %v6996_v14 = vadd.f32 %v3399_v8, %v3398_v7  ;;  %v3425_v50 = vadd.f32 %v3424_v31, %v3423_v41  ;;  %v3441_v45 = vadd.f32 %v3440_v46, %v3439_v18  ;;  %v3448_v28 = vadd.f32 %v3447_v62, %v3446_v4 }
 0x28e   :  { %v3408_v19 = vrot.slane %v3407_v54, 1  ;;  %v3417_v22 = vrot.slane %v3416_v63, 1  ;;  %v3455_v29 = vsel %vm1266_vm1, %v6787_v58, 0.0  ;;  %v3456_v26 = vsel %vm1266_vm1, %v6791_v3, 0.0 }
 0x28f   :  { %v3426_v30 = vrot.slane %v3425_v50, 1  ;;  %v3442_v34 = vrot.slane %v3441_v45, 2  ;;  %v3449_v60 = vrot.slane %v3448_v28, 4  ;;  %v3434_v27 = vadd.f32 %v3433_v20, %v3432_v48  ;;  %v8106_v48 = vld [vmem:[#allocation85_spill] sm:$0xff] }
 0x290   :  { %v7002_v57 = vadd.f32 %v3408_v19, %v3407_v54  ;;  %v7004_v21 = vadd.f32 %v3417_v22, %v3416_v63  ;;  %v3457_v51 = vadd.f32 %v3456_v26, %v3455_v29  ;;  %v3464_v13 = vsel %vm1266_vm1, %v6795_v32, 0.0  ;;  %v8107_v22 = vld [vmem:[#allocation87_spill] sm:$0xff]  ;;  %v8108_v29 = vld [vmem:[#allocation89_spill] sm:$0xff] }
 0x291   :  { %v7006_v39 = vadd.f32 %v3426_v30, %v3425_v50  ;;  %v3443_v43 = vadd.f32 %v3442_v34, %v3441_v45  ;;  %v3450_v44 = vadd.f32 %v3449_v60, %v3448_v28  ;;  %v3435_v58 = vrot.slane %v3434_v27, 1 }
 0x292   :  { %v3458_v55 = vrot.slane %v3457_v51, 4  ;;  %v3465_v17 = vsel %vm1266_vm1, %v6799_v9, 0.0  ;;  %v3473_v3 = vsel %vm1266_vm1, %v6802_v23, 0.0  ;;  %v3474_v7 = vsel %vm1266_vm1, %v6805_v10, 0.0 }
 0x293   :  { %v3444_v0 = vrot.slane %v3443_v43, 1  ;;  %v3451_v16 = vrot.slane %v3450_v44, 2  ;;  %v3466_v49 = vadd.f32 %v3465_v17, %v3464_v13  ;;  %v7016_v41 = vadd.f32 %v3435_v58, %v3434_v27 }
 0x294   :  { %v3459_v18 = vadd.f32 %v3458_v55, %v3457_v51  ;;  %v3475_v56 = vadd.f32 %v3474_v7, %v3473_v3  ;;  %v3482_v32 = vsel %vm1266_vm1, %v6850_v35, 0.0  ;;  %v3483_v23 = vsel %vm1266_vm1, %v6853_v59, 0.0  ;;  %v8109_v51 = vld [vmem:[#allocation91_spill] sm:$0xff]  ;;  %v8111_v7 = vld [vmem:[#allocation86_spill] sm:$0xff] }
 0x295   :  { %v7020_v37 = vadd.f32 %v3444_v0, %v3443_v43  ;;  %v3452_v5 = vadd.f32 %v3451_v16, %v3450_v44  ;;  %v3467_v9 = vrot.slane %v3466_v49, 4  ;;  %v3484_v31 = vadd.f32 %v3483_v23, %v3482_v32  ;;  %v8110_v44 = vld [vmem:[#allocation84_spill] sm:$0xff] }
 0x296   :  { %v3460_v4 = vrot.slane %v3459_v18, 2  ;;  %v3476_v8 = vrot.slane %v3475_v56, 4  ;;  %v3491_v10 = vsel %vm1266_vm1, %v6811_v1, 0.0  ;;  %v3492_v63 = vsel %vm1266_vm1, %v6815_v15, 0.0 }
 0x297   :  { %v3453_v46 = vrot.slane %v3452_v5, 1  ;;  %v3468_v54 = vadd.f32 %v3467_v9, %v3466_v49  ;;  %v3500_v35 = vsel %vm1266_vm1, %v8106_v48, 0.0  ;;  %v3485_v45 = vrot.slane %v3484_v31, 4 }
 0x298   :  { %v3461_v62 = vadd.f32 %v3460_v4, %v3459_v18  ;;  %v3477_v50 = vadd.f32 %v3476_v8, %v3475_v56  ;;  %v3493_v28 = vadd.f32 %v3492_v63, %v3491_v10  ;;  %v3501_v20 = vsel %vm1266_vm1, %v8107_v22, 0.0 }
 0x299   :  { %v7030_v19 = vadd.f32 %v3453_v46, %v3452_v5  ;;  %v3469_v59 = vrot.slane %v3468_v54, 2  ;;  %v3509_v1 = vsel %vm1266_vm1, %v8108_v29, 0.0  ;;  %v3486_v60 = vadd.f32 %v3485_v45, %v3484_v31  ;;  %v8112_v31 = vld [vmem:[#allocation93_spill] sm:$0xff] }
 0x29a   :  { %v3462_v30 = vrot.slane %v3461_v62, 1  ;;  %v3478_v34 = vrot.slane %v3477_v50, 2  ;;  %v3494_v15 = vrot.slane %v3493_v28, 4  ;;  %v3502_v27 = vadd.f32 %v3501_v20, %v3500_v35 }
 0x29b   :  { %v3470_v26 = vadd.f32 %v3469_v59, %v3468_v54  ;;  %v3510_v43 = vsel %vm1266_vm1, %v8109_v51, 0.0  ;;  %v3518_v13 = vsel %vm1266_vm1, %v8110_v44, 0.0  ;;  %v3487_v17 = vrot.slane %v3486_v60, 2 }
 0x29c   :  { %v7040_v58 = vadd.f32 %v3462_v30, %v3461_v62  ;;  %v3479_v55 = vadd.f32 %v3478_v34, %v3477_v50  ;;  %v3495_v3 = vadd.f32 %v3494_v15, %v3493_v28  ;;  %v3503_v16 = vrot.slane %v3502_v27, 4  ;;  %v8113_v50 = vld [vmem:[#allocation88_spill] sm:$0xff]  ;;  %v8114_v34 = vld [vmem:[#allocation90_spill] sm:$0xff] }
 0x29d   :  { %v3471_v0 = vrot.slane %v3470_v26, 1  ;;  %v3511_v49 = vadd.f32 %v3510_v43, %v3509_v1  ;;  %v3519_v18 = vsel %vm1266_vm1, %v8111_v7, 0.0  ;;  %v3488_v32 = vadd.f32 %v3487_v17, %v3486_v60  ;;  %v8116_v17 = vld [vmem:[#allocation94_spill] sm:$0xff] }
 0x29e   :  { %v3480_v56 = vrot.slane %v3479_v55, 1  ;;  %v3496_v5 = vrot.slane %v3495_v3, 2  ;;  %v3520_v9 = vadd.f32 %v3519_v18, %v3518_v13  ;;  %v3504_v4 = vadd.f32 %v3503_v16, %v3502_v27  ;;  %v8115_v13 = vld [vmem:[#allocation92_spill] sm:$0xff] }
 0x29f   :  { %v7044_v23 = vadd.f32 %v3471_v0, %v3470_v26  ;;  %v3512_v8 = vrot.slane %v3511_v49, 4  ;;  %v3527_v10 = vsel %vm1266_vm1, %v8112_v31, 0.0  ;;  %v3489_v54 = vrot.slane %v3488_v32, 1 }
 0x2a0   :  { %v7048_v46 = vadd.f32 %v3480_v56, %v3479_v55  ;;  %v3497_v63 = vadd.f32 %v3496_v5, %v3495_v3  ;;  %v3521_v48 = vrot.slane %v3520_v9, 4  ;;  %v3505_v35 = vrot.slane %v3504_v4, 2  ;;  %v8117_v56 = vld [vmem:[#allocation95_spill] sm:$0xff]  ;;  %v8118_v5 = vld [vmem:[#allocation96_spill] sm:$0xff] }
 0x2a1   :  { %v3513_v62 = vadd.f32 %v3512_v8, %v3511_v49  ;;  %v3528_v45 = vsel %vm1266_vm1, %v8113_v50, 0.0  ;;  %v3536_v28 = vsel %vm1266_vm1, %v6871_v52, 0.0  ;;  %v7054_v59 = vadd.f32 %v3489_v54, %v3488_v32 }
 0x2a2   :  { %v3498_v22 = vrot.slane %v3497_v63, 1  ;;  %v3522_v20 = vadd.f32 %v3521_v48, %v3520_v9  ;;  %v3529_v29 = vadd.f32 %v3528_v45, %v3527_v10  ;;  %v3506_v1 = vadd.f32 %v3505_v35, %v3504_v4 }
 0x2a3   :  { %v3514_v30 = vrot.slane %v3513_v62, 2  ;;  %v3537_v60 = vsel %vm1266_vm1, %v8114_v34, 0.0  ;;  %v3545_v15 = vsel %vm1266_vm1, %v6878_v61, 0.0  ;;  %v3546_v55 = vsel %vm1266_vm1, %v8115_v13, 0.0 }
 0x2a4   :  { %v7060_v26 = vadd.f32 %v3498_v22, %v3497_v63  ;;  %v3523_v27 = vrot.slane %v3522_v20, 2  ;;  %v3530_v51 = vrot.slane %v3529_v29, 4  ;;  %v3538_v43 = vadd.f32 %v3537_v60, %v3536_v28 }
 0x2a5   :  { %v3507_v44 = vrot.slane %v3506_v1, 1  ;;  %v3515_v52 = vadd.f32 %v3514_v30, %v3513_v62  ;;  %v3554_v3 = vsel %vm1266_vm1, %v8116_v17, 0.0  ;;  %v3547_v7 = vadd.f32 %v3546_v55, %v3545_v15 }
 0x2a6   :  { %v3524_v0 = vadd.f32 %v3523_v27, %v3522_v20  ;;  %v3531_v16 = vadd.f32 %v3530_v51, %v3529_v29  ;;  %v3539_v49 = vrot.slane %v3538_v43, 4  ;;  %v3555_v32 = vsel %vm1266_vm1, %v8117_v56, 0.0 }
 0x2a7   :  { %v7066_v18 = vadd.f32 %v3507_v44, %v3506_v1  ;;  %v3516_v61 = vrot.slane %v3515_v52, 1  ;;  %v3563_v9 = vsel %vm1266_vm1, %v8118_v5, 0.0  ;;  %v3548_v10 = vrot.slane %v3547_v7, 4 }
 0x2a8   :  { %v3525_v4 = vrot.slane %v3524_v0, 1  ;;  %v3532_v8 = vrot.slane %v3531_v16, 2  ;;  %v3540_v31 = vadd.f32 %v3539_v49, %v3538_v43  ;;  %v3556_v63 = vadd.f32 %v3555_v32, %v3554_v3  ;;  %v8120_v43 = vld [vmem:[#allocation98_spill] sm:$0xff] }
 0x2a9   :  { %v7072_v54 = vadd.f32 %v3516_v61, %v3515_v52  ;;  %v3564_v48 = vsel %vm1266_vm1, %v6895_v6, 0.0  ;;  %v3572_v35 = vsel %vm1266_vm1, %v6899_v24, 0.0  ;;  %v3549_v28 = vadd.f32 %v3548_v10, %v3547_v7  ;;  %v8119_v24 = vld [vmem:[#allocation97_spill] sm:$0xff] }
 0x2aa   :  { %v7078_v62 = vadd.f32 %v3525_v4, %v3524_v0  ;;  %v3533_v50 = vadd.f32 %v3532_v8, %v3531_v16  ;;  %v3541_v45 = vrot.slane %v3540_v31, 2  ;;  %v3557_v22 = vrot.slane %v3556_v63, 4 }
 0x2ab   :  { %v3565_v20 = vadd.f32 %v3564_v48, %v3563_v9  ;;  %v3573_v29 = vsel %vm1266_vm1, %v6903_v38, 0.0  ;;  %v3581_v1 = vsel %vm1266_vm1, %v6906_v25, 0.0  ;;  %v3550_v60 = vrot.slane %v3549_v28, 2  ;;  %v8121_v25 = vld [vmem:[#allocation99_spill] sm:$0xff] }
 0x2ac   :  { %v3534_v30 = vrot.slane %v3533_v50, 1  ;;  %v3542_v34 = vadd.f32 %v3541_v45, %v3540_v31  ;;  %v3574_v6 = vadd.f32 %v3573_v29, %v3572_v35  ;;  %v3558_v15 = vadd.f32 %v3557_v22, %v3556_v63 }
 0x2ad   :  { %v3566_v27 = vrot.slane %v3565_v20, 4  ;;  %v3582_v51 = vsel %vm1266_vm1, %v8119_v24, 0.0  ;;  %v3590_v44 = vsel %vm1266_vm1, %v8120_v43, 0.0  ;;  %v3551_v55 = vadd.f32 %v3550_v60, %v3549_v28 }
 0x2ae   :  { %v3535_v52 = vadd.f32 %v3534_v30, %v3533_v50  ;;  %v3543_v13 = vrot.slane %v3542_v34, 1  ;;  %v3575_v17 = vrot.slane %v3574_v6, 4  ;;  %v3559_v38 = vrot.slane %v3558_v15, 2 }
 0x2af   :  { %v3567_v3 = vadd.f32 %v3566_v27, %v3565_v20  ;;  %v3583_v0 = vadd.f32 %v3582_v51, %v3581_v1  ;;  %v3591_v16 = vsel %vm1266_vm1, %v8121_v25, 0.0  ;;  %v3552_v7 = vrot.slane %v3551_v55, 1  ;;  %v8127_v25 = vld [vmem:[#allocation81_spill] sm:$0xff] }
 0x2b0   :  { %v3544_v49 = vadd.f32 %v3543_v13, %v3542_v34  ;;  %v3576_v61 = vadd.f32 %v3575_v17, %v3574_v6  ;;  %v3592_v56 = vadd.f32 %v3591_v16, %v3590_v44  ;;  %v3560_v32 = vadd.f32 %v3559_v38, %v3558_v15  ;;  %v8123_v13 = vld [vmem:[#allocation77_spill] sm:$0xff] }
 0x2b1   :  { %v3568_v5 = vrot.slane %v3567_v3, 2  ;;  %v3584_v9 = vrot.slane %v3583_v0, 4  ;;  %v3631_v4 = vsel %vm2400_vm11, %v6948_v12, %v6946_v36  ;;  %v3553_v8 = vadd.f32 %v3552_v7, %v3551_v55 }
 0x2b2   :  { %v3577_v31 = vrot.slane %v3576_v61, 2  ;;  %v3593_v10 = vrot.slane %v3592_v56, 4  ;;  %v3632_v63 = vsel %vm2402_vm12, %v6950_v47, %v3631_v4  ;;  %v3561_v48 = vrot.slane %v3560_v32, 1 }
 0x2b3   :  { %v3569_v35 = vadd.f32 %v3568_v5, %v3567_v3  ;;  %v3585_v50 = vadd.f32 %v3584_v9, %v3583_v0  ;;  %v3633_v45 = vsel %vm2404_vm13, %v6952_v33, %v3632_v63  ;;  %v3634_v20 = vsel %vm2400_vm11, %v6960_v42, %v6958_v40  ;;  %v8126_v3 = vld [vmem:[#allocation80_spill] sm:$0xff]  ;;  %v8131_v9 = vld [vmem:[#allocation5_spill] sm:$0xff] }
 0x2b4   :  { %v3578_v28 = vadd.f32 %v3577_v31, %v3576_v61  ;;  %v3594_v22 = vadd.f32 %v3593_v10, %v3592_v56  ;;  %v3637_v36 = vsel %vm2400_vm11, %v6996_v14, %v6992_v2  ;;  %v3562_v12 = vadd.f32 %v3561_v48, %v3560_v32  ;;  %v8129_v61 = vld [vmem:[#allocation4_spill] sm:$0xff]  ;;  %v8130_v32 = vld [vmem:[#allocation83_spill] sm:$0xff] }
 0x2b5   :  { %v3570_v29 = vrot.slane %v3569_v35, 1  ;;  %v3586_v1 = vrot.slane %v3585_v50, 2  ;;  %v3635_v47 = vsel %vm2402_vm12, %v6976_v11, %v3634_v20  ;;  %v3638_v60 = vsel %vm2402_vm12, %v7002_v57, %v3637_v36  ;;  %v8133_v10 = vld [vmem:[#allocation7_spill] sm:$0xff]  ;;  %v8134_v48 = vld [vmem:[#allocation8_spill] sm:$0xff] }
 0x2b6   :  { %v3579_v30 = vrot.slane %v3578_v28, 1  ;;  %v3595_v34 = vrot.slane %v3594_v22, 2  ;;  %v3636_v33 = vsel %vm2404_vm13, %v6986_v53, %v3635_v47  ;;  %v3639_v42 = vsel %vm2404_vm13, %v7004_v21, %v3638_v60  ;;  %v8137_v36 = vld [vmem:[#allocation11_spill] sm:$0xff] }
 0x2b7   :  { %v3571_v6 = vadd.f32 %v3570_v29, %v3569_v35  ;;  %v3587_v40 = vadd.f32 %v3586_v1, %v3585_v50  ;;  %v3640_v2 = vsel %vm2400_vm11, %v7016_v41, %v7006_v39  ;;  %v3643_v53 = vsel %vm2400_vm11, %v7044_v23, %v7040_v58  ;;  %v8135_v50 = vld [vmem:[#allocation9_spill] sm:$0xff] }
 0x2b8   :  { %v3580_v14 = vadd.f32 %v3579_v30, %v3578_v28  ;;  %v3596_v15 = vadd.f32 %v3595_v34, %v3594_v22  ;;  %v3641_v11 = vsel %vm2402_vm12, %v7020_v37, %v3640_v2  ;;  %v3644_v21 = vsel %vm2402_vm12, %v7048_v46, %v3643_v53  ;;  %v8136_v28 = vld [vmem:[#allocation10_spill] sm:$0xff] }
 0x2b9   :  { %v3588_v27 = vrot.slane %v3587_v40, 1  ;;  %v3642_v57 = vsel %vm2404_vm13, %v7030_v19, %v3641_v11  ;;  %v3646_v39 = vsel %vm2400_vm11, %v7066_v18, %v7060_v26  ;;  %v3645_v24 = vsel %vm2404_vm13, %v7054_v59, %v3644_v21  ;;  %v8122_v18 = vld [vmem:[#allocation76_spill] sm:$0xff] }
 0x2ba   :  { %v3597_v41 = vrot.slane %v3596_v15, 1  ;;  %v3647_v37 = vsel %vm2402_vm12, %v7072_v54, %v3646_v39  ;;  %v3649_v58 = vsel %vm2400_vm11, %v3544_v49, %v3535_v52  ;;  %v3652_v46 = vsel %vm2400_vm11, %v3580_v14, %v3571_v6  ;;  %v8124_v54 = vld [vmem:[#allocation78_spill] sm:$0xff]  ;;  %v8125_v52 = vld [vmem:[#allocation79_spill] sm:$0xff] }
 0x2bb   :  { %v3589_v23 = vadd.f32 %v3588_v27, %v3587_v40  ;;  %v3648_v19 = vsel %vm2404_vm13, %v7078_v62, %v3647_v37  ;;  %v3650_v51 = vsel %vm2402_vm12, %v3553_v8, %v3649_v58  ;;  %v3663_v44 = vadd.f32 %v3633_v45, %v8122_v18  ;;  %v8128_v49 = vld [vmem:[#allocation82_spill] sm:$0xff] }
 0x2bc   :  { %v3598_v43 = vadd.f32 %v3597_v41, %v3596_v15  ;;  %v3651_v26 = vsel %vm2404_vm13, %v3562_v12, %v3650_v51  ;;  %v3664_v59 = vadd.f32 %v3636_v33, %v8123_v13  ;;  %v3665_v17 = vadd.f32 %v3639_v42, %v8124_v54  ;;  %v8132_v8 = vld [vmem:[#allocation6_spill] sm:$0xff] }
 0x2bd   :  { %v3653_v55 = vsel %vm2402_vm12, %v3589_v23, %v3652_v46  ;;  %v3666_v38 = vadd.f32 %v3642_v57, %v8125_v52  ;;  %v3667_v0 = vadd.f32 %v3645_v24, %v8126_v3  ;;  %v3668_v16 = vadd.f32 %v3648_v19, %v8127_v25 }
 0x2be   :  { %v3654_v62 = vsel %vm2404_vm13, %v3598_v43, %v3653_v55  ;;  %v3669_v7 = vadd.f32 %v3651_v26, %v8128_v49  ;;  %v7146_v56 = vadd.f32 %v3663_v44, %v8129_v61  ;;  %v7150_v4 = vadd.f32 %v3664_v59, %v8131_v9 }
 0x2bf   :  { %v3670_v5 = vadd.f32 %v3654_v62, %v8130_v32  ;;  %v7153_v31 = vadd.f32 %v3665_v17, %v8132_v8  ;;  %v7156_v63 = vadd.f32 %v3666_v38, %v8133_v10  ;;  %v7159_v35 = vadd.f32 %v3667_v0, %v8134_v48 }
 0x2c0   :  { %v7162_v45 = vadd.f32 %v3668_v16, %v8135_v50  ;;  %v7165_v22 = vadd.f32 %v3669_v7, %v8136_v28  ;;  %v3679_v20 = vsel %vm1299_vm2, %v7146_v56, -inf  ;;  %v3686_v1 = vsel %vm1299_vm2, %v7150_v4, -inf }
 0x2c1   :  { %v7170_v12 = vadd.f32 %v3670_v5, %v8137_v36  ;;  %v3680_v29 = vrot.slane %v3679_v20, 4  ;;  %v3693_v47 = vsel %vm1299_vm2, %v7153_v31, -inf  ;;  %v3687_v30 = vrot.slane %v3686_v1, 4 }
 0x2c2   :  { %v3694_v34 = vrot.slane %v3693_v47, 4  ;;  %v3700_v33 = vsel %vm1299_vm2, %v7156_v63, -inf  ;;  %v3707_v60 = vsel %vm1299_vm2, %v7159_v35, -inf  ;;  %v3714_v2 = vsel %vm1299_vm2, %v7162_v45, -inf }
 0x2c3   :  { %v3681_v6 = vmax.f32 %v3679_v20, %v3680_v29  ;;  %v3701_v40 = vrot.slane %v3700_v33, 4  ;;  %v3708_v42 = vrot.slane %v3707_v60, 4  ;;  %v3688_v14 = vmax.f32 %v3686_v1, %v3687_v30 }
 0x2c4   :  { %v3695_v15 = vmax.f32 %v3693_v47, %v3694_v34  ;;  %v3715_v11 = vrot.slane %v3714_v2, 4  ;;  %v3721_v53 = vsel %vm1299_vm2, %v7165_v22, -inf  ;;  %v3728_v58 = vsel %vm1299_vm2, %v7170_v12, -inf }
 0x2c5   :  { %v3682_v27 = vrot.slane %v3681_v6, 2  ;;  %v3702_v57 = vmax.f32 %v3700_v33, %v3701_v40  ;;  %v3709_v21 = vmax.f32 %v3707_v60, %v3708_v42  ;;  %v3722_v39 = vrot.slane %v3721_v53, 4 }
 0x2c6   :  { %v3689_v41 = vrot.slane %v3688_v14, 2  ;;  %v3696_v24 = vrot.slane %v3695_v15, 2  ;;  %v3716_v37 = vmax.f32 %v3714_v2, %v3715_v11  ;;  %v3729_v44 = vrot.slane %v3728_v58, 4 }
 0x2c7   :  { %v3683_v23 = vmax.f32 %v3681_v6, %v3682_v27  ;;  %v3703_v19 = vrot.slane %v3702_v57, 2  ;;  %v3710_v51 = vrot.slane %v3709_v21, 2  ;;  %v3723_v46 = vmax.f32 %v3721_v53, %v3722_v39 }
 0x2c8   :  { %v3690_v43 = vmax.f32 %v3688_v14, %v3689_v41  ;;  %v3697_v26 = vmax.f32 %v3695_v15, %v3696_v24  ;;  %v3717_v18 = vrot.slane %v3716_v37, 2  ;;  %v3730_v3 = vmax.f32 %v3728_v58, %v3729_v44 }
 0x2c9   :  { %v3684_v13 = vrot.slane %v3683_v23, 1  ;;  %v3704_v59 = vmax.f32 %v3702_v57, %v3703_v19  ;;  %v3711_v55 = vmax.f32 %v3709_v21, %v3710_v51  ;;  %v3724_v54 = vrot.slane %v3723_v46, 2 }
 0x2ca   :  { %v3691_v17 = vrot.slane %v3690_v43, 1  ;;  %v3698_v52 = vrot.slane %v3697_v26, 1  ;;  %v3718_v38 = vmax.f32 %v3716_v37, %v3717_v18  ;;  %v3731_v32 = vrot.slane %v3730_v3, 2 }
 0x2cb   :  { %v3685_v0 = vmax.f32 %v3683_v23, %v3684_v13  ;;  %v3705_v62 = vrot.slane %v3704_v59, 1  ;;  %v3712_v25 = vrot.slane %v3711_v55, 1  ;;  %v3725_v16 = vmax.f32 %v3723_v46, %v3724_v54 }
 0x2cc   :  { %v3692_v49 = vmax.f32 %v3690_v43, %v3691_v17  ;;  %v3699_v7 = vmax.f32 %v3697_v26, %v3698_v52  ;;  %v3719_v61 = vrot.slane %v3718_v38, 1  ;;  %v3732_v50 = vmax.f32 %v3730_v3, %v3731_v32 }
 0x2cd   :  { %v3706_v5 = vmax.f32 %v3704_v59, %v3705_v62  ;;  %v3713_v9 = vmax.f32 %v3711_v55, %v3712_v25  ;;  %v3726_v8 = vrot.slane %v3725_v16, 1  ;;  %v3735_v10 = vsub.f32 %v7146_v56, %v3685_v0 }
 0x2ce   :  { %v3720_v48 = vmax.f32 %v3718_v38, %v3719_v61  ;;  %v3736_v28 = vsub.f32 %v7150_v4, %v3692_v49  ;;  %v3737_v20 = vsub.f32 %v7153_v31, %v3699_v7  ;;  %v3733_v30 = vrot.slane %v3732_v50, 1 }
 0x2cf   :  { %v3727_v36 = vmax.f32 %v3725_v16, %v3726_v8  ;;  %v3738_v29 = vsub.f32 %v7156_v63, %v3706_v5  ;;  %v3739_v1 = vsub.f32 %v7159_v35, %v3713_v9  ;;  %v3743_v47 = vmul.f32 1.442695, %v3735_v10 }
 0x2d0   :  { %v3740_v34 = vsub.f32 %v7162_v45, %v3720_v48  ;;  %v3745_v33 = vmul.f32 1.442695, %v3736_v28  ;;  %v3747_v60 = vmul.f32 1.442695, %v3737_v20  ;;  %v3734_v42 = vmax.f32 %v3732_v50, %v3733_v30 }
 0x2d1   :  { %v3741_v6 = vsub.f32 %v7165_v22, %v3727_v36  ;;  %4905 = vpow2.f32 %v3743_v47  ;;  %v3749_v56 = vmul.f32 1.442695, %v3738_v29  ;;  %v3751_v40 = vmul.f32 1.442695, %v3739_v1 }
 0x2d2   :  { %4907 = vpow2.f32 %v3745_v33  ;;  %v3753_v4 = vmul.f32 1.442695, %v3740_v34  ;;  %v3742_v63 = vsub.f32 %v7170_v12, %v3734_v42 }
 0x2d3   :  { %4909 = vpow2.f32 %v3747_v60  ;;  %v3755_v31 = vmul.f32 1.442695, %v3741_v6 }
 0x2d4   :  { %4911 = vpow2.f32 %v3749_v56  ;;  %v3757_v35 = vmul.f32 1.442695, %v3742_v63 }
 0x2d5   :  { %4913 = vpow2.f32 %v3751_v40 }
 0x2d6   :  { %4915 = vpow2.f32 %v3753_v4 }
 0x2d7   :  { %4917 = vpow2.f32 %v3755_v31 }
 0x2d8   :  { %4919 = vpow2.f32 %v3757_v35 }
 0x2de   :  { %v7194_v45 = vpop.eup %4905 }
 0x2df   :  { %v7196_v2 = vpop.eup %4907  ;;  %v3759_v22 = vsel %vm1299_vm2, %v7194_v45, 0.0 }
 0x2e0   :  { %v7200_v14 = vpop.eup %4909  ;;  %v3760_v15 = vrot.slane %v3759_v22, 4  ;;  %v3766_v11 = vsel %vm1299_vm2, %v7196_v2, 0.0 }
 0x2e1   :  { %v7204_v12 = vpop.eup %4911  ;;  %v3767_v53 = vrot.slane %v3766_v11, 4  ;;  %v3773_v27 = vsel %vm1299_vm2, %v7200_v14, 0.0 }
 0x2e2   :  { %v7208_v57 = vpop.eup %4913  ;;  %v3761_v21 = vadd.f32 %v3760_v15, %v3759_v22  ;;  %v3774_v39 = vrot.slane %v3773_v27, 4  ;;  %v3780_v41 = vsel %vm1299_vm2, %v7204_v12, 0.0 }
 0x2e3   :  { %v7212_v24 = vpop.eup %4915  ;;  %v3768_v37 = vadd.f32 %v3767_v53, %v3766_v11  ;;  %v3781_v58 = vrot.slane %v3780_v41, 4  ;;  %v3787_v23 = vsel %vm1299_vm2, %v7208_v57, 0.0 }
 0x2e4   :  { %v7216_v19 = vpop.eup %4917  ;;  %v3762_v51 = vrot.slane %v3761_v21, 2  ;;  %v3775_v46 = vadd.f32 %v3774_v39, %v3773_v27  ;;  %v3788_v43 = vrot.slane %v3787_v23, 4  ;;  %v3794_v26 = vsel %vm1299_vm2, %v7212_v24, 0.0 }
 0x2e5   :  { %v7220_v18 = vpop.eup %4919  ;;  %v3769_v44 = vrot.slane %v3768_v37, 2  ;;  %v3782_v13 = vadd.f32 %v3781_v58, %v3780_v41  ;;  %v3795_v59 = vrot.slane %v3794_v26, 4  ;;  %v3801_v55 = vsel %vm1299_vm2, %v7216_v19, 0.0  ;;  %v8138_v41 = vld [vmem:[#allocation2_spill] sm:$0xff] }
 0x2e6   :  { %v3763_v54 = vadd.f32 %v3762_v51, %v3761_v21  ;;  %v3776_v17 = vrot.slane %v3775_v46, 2  ;;  %v3789_v52 = vadd.f32 %v3788_v43, %v3787_v23  ;;  %v3802_v38 = vrot.slane %v3801_v55, 4 }
 0x2e7   :  { %v3770_v3 = vadd.f32 %v3769_v44, %v3768_v37  ;;  %v3783_v0 = vrot.slane %v3782_v13, 2  ;;  %v3796_v62 = vadd.f32 %v3795_v59, %v3794_v26  ;;  %v3808_v25 = vsel %vm1299_vm2, %v7220_v18, 0.0 }
 0x2e8   :  { %v3764_v16 = vrot.slane %v3763_v54, 1  ;;  %v3777_v49 = vadd.f32 %v3776_v17, %v3775_v46  ;;  %v3790_v7 = vrot.slane %v3789_v52, 2  ;;  %v3803_v61 = vadd.f32 %v3802_v38, %v3801_v55 }
 0x2e9   :  { %v3771_v32 = vrot.slane %v3770_v3, 1  ;;  %v3784_v5 = vadd.f32 %v3783_v0, %v3782_v13  ;;  %v3797_v9 = vrot.slane %v3796_v62, 2  ;;  %v3809_v8 = vrot.slane %v3808_v25, 4 }
 0x2ea   :  { %v3765_v10 = vadd.f32 %v3764_v16, %v3763_v54  ;;  %v3778_v48 = vrot.slane %v3777_v49, 1  ;;  %v3791_v50 = vadd.f32 %v3790_v7, %v3789_v52  ;;  %v3804_v28 = vrot.slane %v3803_v61, 2 }
 0x2eb   :  { %v3772_v20 = vadd.f32 %v3771_v32, %v3770_v3  ;;  %v3785_v36 = vrot.slane %v3784_v5, 1  ;;  %v3798_v29 = vadd.f32 %v3797_v9, %v3796_v62  ;;  %v3810_v1 = vadd.f32 %v3809_v8, %v3808_v25 }
 0x2ec   :  { %v3779_v47 = vadd.f32 %v3778_v48, %v3777_v49  ;;  %v3792_v30 = vrot.slane %v3791_v50, 1  ;;  %v3805_v34 = vadd.f32 %v3804_v28, %v3803_v61  ;;  %4921 = vrcp.f32 %v3765_v10 }
 0x2ed   :  { %v3786_v33 = vadd.f32 %v3785_v36, %v3784_v5  ;;  %v3799_v60 = vrot.slane %v3798_v29, 1  ;;  %v3811_v6 = vrot.slane %v3810_v1, 2  ;;  %4923 = vrcp.f32 %v3772_v20 }
 0x2ee   :  { %v3793_v56 = vadd.f32 %v3792_v30, %v3791_v50  ;;  %v3806_v40 = vrot.slane %v3805_v34, 1  ;;  %4925 = vrcp.f32 %v3779_v47 }
 0x2ef   :  { %v3800_v42 = vadd.f32 %v3799_v60, %v3798_v29  ;;  %v3812_v4 = vadd.f32 %v3811_v6, %v3810_v1  ;;  %4927 = vrcp.f32 %v3786_v33 }
 0x2f0   :  { %v3807_v31 = vadd.f32 %v3806_v40, %v3805_v34  ;;  %4929 = vrcp.f32 %v3793_v56  ;;  %v8139_v56 = vld [vmem:[#allocation3_spill] sm:$0xff] }
 0x2f1   :  { %v3813_v63 = vrot.slane %v3812_v4, 1  ;;  %4931 = vrcp.f32 %v3800_v42 }
 0x2f2   :  { %4933 = vrcp.f32 %v3807_v31 }
 0x2f3   :  { %v3814_v35 = vadd.f32 %v3813_v63, %v3812_v4 }
 0x2f5   :  { %4935 = vrcp.f32 %v3814_v35 }
 0x2f9   :  { %v4922_v22 = vpop.eup %4921 }
 0x2fa   :  { %v4924_v15 = vpop.eup %4923  ;;  %v3823_v11 = vmul.f32 %v4922_v22, %v7194_v45 }
 0x2fb   :  { %v4926_v53 = vpop.eup %4925  ;;  %v3824_v27 = vmul.f32 %v4924_v15, %v7196_v2 }
 0x2fc   :  { %v4928_v21 = vpop.eup %4927  ;;  %v3825_v39 = vmul.f32 %v4926_v53, %v7200_v14  ;;  %v3845_v37 = vrot.slane %v3823_v11, %v8138_v41 }
 0x2fd   :  { %v4930_v58 = vpop.eup %4929  ;;  %v3826_v23 = vmul.f32 %v4928_v21, %v7204_v12  ;;  %v3869_v51 = vrot.slane %v3824_v27, %v8138_v41 }
 0x2fe   :  { %v4932_v46 = vpop.eup %4931  ;;  %v3827_v43 = vmul.f32 %v4930_v58, %v7208_v57  ;;  %v3846_v26 = vcombine.high %v3845_v37, %v3845_v37  ;;  %v3893_v44 = vrot.slane %v3825_v39, %v8138_v41  ;;  %v3853_v13 = vrot.slane %v3845_v37, %v8138_v41 }
 0x2ff   :  { %v4934_v45 = vpop.eup %4933  ;;  %v3870_v2 = vcombine.high %v3869_v51, %v3869_v51  ;;  %v3877_v59 = vrot.slane %v3869_v51, %v8138_v41  ;;  %v3917_v14 = vrot.slane %v3826_v23, %v8138_v41  ;;  %v3828_v12 = vmul.f32 %v4932_v46, %v7212_v24 }
 0x300   :  { %v3860_v55 = vrot.slane %v3846_v26, %v8138_v41  ;;  %v3894_v54 = vcombine.high %v3893_v44, %v3893_v44  ;;  %v3829_v17 = vmul.f32 %v4934_v45, %v7216_v19  ;;  %v3901_v3 = vrot.slane %v3893_v44, %v8138_v41 }
 0x301   :  { %v3884_v57 = vrot.slane %v3870_v2, %v8138_v41  ;;  %v3918_v52 = vcombine.high %v3917_v14, %v3917_v14  ;;  %v3925_v62 = vrot.slane %v3917_v14, %v8138_v41  ;;  %v3941_v25 = vrot.slane %v3827_v43, %v8138_v41 }
 0x302   :  { %v4936_v38 = vpop.eup %4935  ;;  %v3908_v0 = vrot.slane %v3894_v54, %v8138_v41  ;;  %v3861_v49 = vcombine.high %v3853_v13, %v3853_v13  ;;  %v3885_v7 = vcombine.high %v3877_v59, %v3877_v59  ;;  %v3862_v61 = vcombine.high %v3860_v55, %v3860_v55 }
 0x303   :  { %v3830_v16 = vmul.f32 %v4936_v38, %v7220_v18  ;;  %v3932_v24 = vrot.slane %v3918_v52, %v8138_v41  ;;  %v3942_v19 = vcombine.high %v3941_v25, %v3941_v25  ;;  %v3949_v32 = vrot.slane %v3941_v25, %v8138_v41 }
 0x304   :  { %v3886_v5 = vcombine.high %v3884_v57, %v3884_v57  ;;  %v3965_v9 = vrot.slane %v3828_v12, %v8138_v41  ;;  %v3989_v8 = vrot.slane %v3829_v17, %v8138_v41  ;;  %v3909_v48 = vcombine.high %v3901_v3, %v3901_v3 }
 0x305   :  { %v4013_v10 = vrot.slane %v3830_v16, %v8138_v41  ;;  %v3910_v50 = vcombine.high %v3908_v0, %v3908_v0  ;;  %v3933_v28 = vcombine.high %v3925_v62, %v3925_v62  ;;  %v3956_v18 = vrot.slane %v3942_v19, %v8138_v41 }
 0x306   :  { %v3966_v20 = vcombine.high %v3965_v9, %v3965_v9  ;;  %v3973_v36 = vrot.slane %v3965_v9, %v8138_v41  ;;  %v3990_v29 = vcombine.high %v3989_v8, %v3989_v8  ;;  %v3997_v1 = vrot.slane %v3989_v8, %v8138_v41  ;;  %v8143_v9 = vld [vmem:[#allocation16_spill] sm:$0xff] }
 0x307   :  { %v3934_v47 = vcombine.high %v3932_v24, %v3932_v24  ;;  %v3957_v30 = vcombine.high %v3949_v32, %v3949_v32  ;;  %v4014_v34 = vcombine.high %v4013_v10, %v4013_v10  ;;  %v4021_v33 = vrot.slane %v4013_v10, %v8138_v41  ;;  %v8144_v10 = vld [vmem:[#allocation22_spill] sm:$0xff] }
 0x308   :  { %v3980_v60 = vrot.slane %v3966_v20, %v8138_v41  ;;  %v4004_v6 = vrot.slane %v3990_v29, %v8138_v41  ;;  %v4034_v40 = vrot.slane %v3853_v13, %v8139_v56  ;;  %v4038_v42 = vrot.slane %v3860_v55, %v8139_v56 }
 0x309   :  { %v3958_v4 = vcombine.high %v3956_v18, %v3956_v18  ;;  %v3981_v31 = vcombine.high %v3973_v36, %v3973_v36  ;;  %v4028_v63 = vrot.slane %v4014_v34, %v8138_v41  ;;  %v4042_v35 = vrot.slane %v3861_v49, %v8139_v56 }
 0x30a   :  { %v4005_v22 = vcombine.high %v3997_v1, %v3997_v1  ;;  %v4029_v15 = vcombine.high %v4021_v33, %v4021_v33  ;;  %v4046_v11 = vrot.slane %v3862_v61, %v8139_v56  ;;  %v4050_v53 = vrot.slane %v3877_v59, %v8139_v56 }
 0x30b   :  { %v3982_v27 = vcombine.high %v3980_v60, %v3980_v60  ;;  %v4006_v21 = vcombine.high %v4004_v6, %v4004_v6  ;;  %v4054_v39 = vrot.slane %v3884_v57, %v8139_v56  ;;  %v4058_v37 = vrot.slane %v3885_v7, %v8139_v56  ;;  %v8140_v7 = vld [vmem:[#allocation14_spill] sm:$0xff] }
 0x30c   :  { %v4030_v58 = vcombine.high %v4028_v63, %v4028_v63  ;;  %v4062_v23 = vrot.slane %v3886_v5, %v8139_v56  ;;  %v4066_v51 = vrot.slane %v3901_v3, %v8139_v56  ;;  %v4070_v41 = vrot.slane %v3908_v0, %v8139_v56 }
 0x30d   :  { %v4074_v46 = vrot.slane %v3909_v48, %v8139_v56  ;;  %v4078_v43 = vrot.slane %v3910_v50, %v8139_v56  ;;  %v4082_v26 = vrot.slane %v3925_v62, %v8139_v56  ;;  %v4086_v44 = vrot.slane %v3932_v24, %v8139_v56  ;;  %v8141_v24 = vld [vmem:[#allocation12_spill] sm:$0xff] }
 0x30e   :  { %v4090_v45 = vrot.slane %v3933_v28, %v8139_v56  ;;  %v4094_v13 = vrot.slane %v3934_v47, %v8139_v56  ;;  %v4098_v2 = vrot.slane %v3949_v32, %v8139_v56  ;;  %v4102_v59 = vrot.slane %v3956_v18, %v8139_v56  ;;  %v8142_v32 = vld [vmem:[#allocation18_spill] sm:$0xff]  ;;  %v8145_v50 = vld [vmem:[#allocation20_spill] sm:$0xff] }
 0x30f   :  { %v4106_v14 = vrot.slane %v3957_v30, %v8139_v56  ;;  %v4110_v55 = vrot.slane %v3958_v4, %v8139_v56  ;;  %v4114_v54 = vrot.slane %v3973_v36, %v8139_v56  ;;  %v4118_v12 = vrot.slane %v3980_v60, %v8139_v56  ;;  %v8146_v18 = vld [vmem:[#allocation26_spill] sm:$0xff]  ;;  %v8147_v36 = vld [vmem:[#allocation24_spill] sm:$0xff]  ;;  %v8150_v30 = vld [vmem:[#allocation13_spill] sm:$0xff] }
 0x310   :  { %v4122_v17 = vrot.slane %v3981_v31, %v8139_v56  ;;  %v4126_v57 = vrot.slane %v3982_v27, %v8139_v56  ;;  %v4130_v52 = vrot.slane %v3997_v1, %v8139_v56  ;;  %v4134_v38 = vrot.slane %v4004_v6, %v8139_v56  ;;  %v8149_v1 = vld [vmem:[#allocation15_spill] sm:$0xff]  ;;  %v8152_v6 = vld [vmem:[#allocation17_spill] sm:$0xff]  ;;  %v8160_v27 = vld [vmem:[#allocation28_spill] sm:$0xff] }
 0x311   :  { %v4138_v3 = vrot.slane %v4005_v22, %v8139_v56  ;;  %v4142_v0 = vrot.slane %v4006_v21, %v8139_v56  ;;  %v4146_v62 = vrot.slane %v4021_v33, %v8139_v56  ;;  %v4150_v25 = vrot.slane %v4028_v63, %v8139_v56  ;;  %v8151_v33 = vld [vmem:[#allocation19_spill] sm:$0xff]  ;;  %v8154_v4 = vld [vmem:[#allocation21_spill] sm:$0xff] }
 0x312   :  { %v7289_v16 = vrot.slane %v4029_v15, %v8139_v56  ;;  %v7292_v49 = vrot.slane %v4030_v58, %v8139_v56  ;;  %v4191_v61 = vmul.f32 %v4034_v40, %v8140_v7  ;;  %v7296_v19 = vmul.f32 %v8141_v24, %v4034_v40  ;;  %v8153_v40 = vld [vmem:[#allocation23_spill] sm:$0xff]  ;;  %v8157_v22 = vld [vmem:[#allocation25_spill] sm:$0xff]  ;;  %v8161_v58 = vld [vmem:[#allocation34_spill] sm:$0xff] }
 0x313   :  { %v7299_v5 = vmul.f32 %v4038_v42, %v8142_v32  ;;  %v7302_v8 = vmul.f32 %v8143_v9, %v4038_v42  ;;  %v7305_v48 = vmul.f32 %v4042_v35, %v8144_v10  ;;  %v7308_v28 = vmul.f32 %v8145_v50, %v4042_v35  ;;  %v8155_v63 = vld [vmem:[#allocation27_spill] sm:$0xff]  ;;  %v8163_v32 = vld [vmem:[#allocation38_spill] sm:$0xff] }
 0x314   :  { %v7311_v20 = vmul.f32 %v4046_v11, %v8146_v18  ;;  %v7314_v29 = vmul.f32 %v8147_v36, %v4046_v11  ;;  %v4199_v47 = vmul.f32 %v4050_v53, %v8149_v1  ;;  %v7318_v34 = vmul.f32 %v8150_v30, %v4050_v53  ;;  %v8159_v11 = vld [vmem:[#allocation30_spill] sm:$0xff]  ;;  %v8169_v1 = vld [vmem:[#allocation31_spill] sm:$0xff]  ;;  %v8170_v30 = vld [vmem:[#allocation29_spill] sm:$0xff] }
 0x315   :  { %v7321_v60 = vmul.f32 %v4054_v39, %v8151_v33  ;;  %v7324_v56 = vmul.f32 %v8152_v6, %v4054_v39  ;;  %v7327_v42 = vmul.f32 %v4058_v37, %v8153_v40  ;;  %v7330_v31 = vmul.f32 %v8154_v4, %v4058_v37  ;;  %v8162_v39 = vld [vmem:[#allocation32_spill] sm:$0xff]  ;;  %v8165_v50 = vld [vmem:[#allocation42_spill] sm:$0xff]  ;;  %v8171_v6 = vld [vmem:[#allocation35_spill] sm:$0xff] }
 0x316   :  { %8148 = vst [vmem:[#allocation85_spill] sm:$0xff] %v7314_v29  ;;  %v7333_v35 = vmul.f32 %v4062_v23, %v8155_v63  ;;  %v7336_v15 = vmul.f32 %v8157_v22, %v4062_v23  ;;  %v4207_v53 = vmul.f32 %v4066_v51, %v8159_v11  ;;  %v4208_v21 = vmul.f32 %v8160_v27, %v4066_v51  ;;  %v8164_v37 = vld [vmem:[#allocation36_spill] sm:$0xff]  ;;  %v8173_v63 = vld [vmem:[#allocation39_spill] sm:$0xff] }
 0x317   :  { %v7341_v7 = vmul.f32 %v4070_v41, %v8161_v58  ;;  %v7344_v24 = vmul.f32 %v8162_v39, %v4070_v41  ;;  %v7347_v9 = vmul.f32 %v4074_v46, %v8163_v32  ;;  %v7350_v10 = vmul.f32 %v8164_v37, %v4074_v46  ;;  %v8167_v23 = vld [vmem:[#allocation40_spill] sm:$0xff]  ;;  %v8172_v41 = vld [vmem:[#allocation33_spill] sm:$0xff]  ;;  %v8175_v27 = vld [vmem:[#allocation43_spill] sm:$0xff] }
 0x318   :  { %8156 = vst [vmem:[#allocation87_spill] sm:$0xff] %v7333_v35  ;;  %8158 = vst [vmem:[#allocation89_spill] sm:$0xff] %v7336_v15  ;;  %v7353_v18 = vmul.f32 %v4078_v43, %v8165_v50  ;;  %v7356_v36 = vmul.f32 %v8167_v23, %v4078_v43  ;;  %v4215_v51 = vmul.f32 %v4082_v26, %v8169_v1  ;;  %v8174_v46 = vld [vmem:[#allocation37_spill] sm:$0xff]  ;;  %v8179_v32 = vld [vmem:[#allocation46_spill] sm:$0xff] }
 0x319   :  { %v4216_v33 = vmul.f32 %v8170_v30, %v4082_v26  ;;  %v7361_v40 = vmul.f32 %v4086_v44, %v8171_v6  ;;  %v7364_v4 = vmul.f32 %v8172_v41, %v4086_v44  ;;  %v7367_v22 = vmul.f32 %v4090_v45, %v8173_v63  ;;  %v8177_v43 = vld [vmem:[#allocation41_spill] sm:$0xff]  ;;  %v8180_v37 = vld [vmem:[#allocation44_spill] sm:$0xff]  ;;  %v8181_v23 = vld [vmem:[#allocation50_spill] sm:$0xff] }
 0x31a   :  { %8166 = vst [vmem:[#allocation91_spill] sm:$0xff] %v7353_v18  ;;  %8168 = vst [vmem:[#allocation84_spill] sm:$0xff] %v7356_v36  ;;  %v7370_v11 = vmul.f32 %v8174_v46, %v4090_v45  ;;  %v7373_v58 = vmul.f32 %v4094_v13, %v8175_v27  ;;  %v7376_v39 = vmul.f32 %v8177_v43, %v4094_v13  ;;  %v8182_v44 = vld [vmem:[#allocation48_spill] sm:$0xff]  ;;  %v8183_v6 = vld [vmem:[#allocation54_spill] sm:$0xff] }
 0x31b   :  { %v4223_v26 = vmul.f32 %v4098_v2, %v8179_v32  ;;  %v4224_v50 = vmul.f32 %v8180_v37, %v4098_v2  ;;  %v4225_v1 = vmul.f32 %v4102_v59, %v8181_v23  ;;  %v7382_v30 = vmul.f32 %v8182_v44, %v4102_v59  ;;  %v8184_v45 = vld [vmem:[#allocation52_spill] sm:$0xff]  ;;  %v8185_v46 = vld [vmem:[#allocation58_spill] sm:$0xff]  ;;  %v8189_v32 = vld [vmem:[#allocation47_spill] sm:$0xff] }
 0x31c   :  { %8176 = vst [vmem:[#allocation86_spill] sm:$0xff] %v7373_v58  ;;  %8178 = vst [vmem:[#allocation93_spill] sm:$0xff] %v7376_v39  ;;  %v7385_v41 = vmul.f32 %v4106_v14, %v8183_v6  ;;  %v7388_v63 = vmul.f32 %v8184_v45, %v4106_v14  ;;  %v7391_v27 = vmul.f32 %v4110_v55, %v8185_v46  ;;  %v8187_v13 = vld [vmem:[#allocation56_spill] sm:$0xff]  ;;  %v8190_v2 = vld [vmem:[#allocation45_spill] sm:$0xff] }
 0x31d   :  { %v7394_v43 = vmul.f32 %v8187_v13, %v4110_v55  ;;  %v4231_v39 = vmul.f32 %v4114_v54, %v8189_v32  ;;  %v4232_v37 = vmul.f32 %v8190_v2, %v4114_v54  ;;  %v8191_v23 = vld [vmem:[#allocation51_spill] sm:$0xff]  ;;  %v8192_v59 = vld [vmem:[#allocation49_spill] sm:$0xff]  ;;  %v8199_v32 = vld [vmem:[#allocation62_spill] sm:$0xff] }
 0x31e   :  { %8186 = vst [vmem:[#allocation88_spill] sm:$0xff] %v7391_v27  ;;  %v4233_v36 = vmul.f32 %v4118_v12, %v8191_v23  ;;  %v7400_v44 = vmul.f32 %v8192_v59, %v4118_v12  ;;  %v8193_v6 = vld [vmem:[#allocation55_spill] sm:$0xff]  ;;  %v8194_v14 = vld [vmem:[#allocation53_spill] sm:$0xff]  ;;  %v8200_v54 = vld [vmem:[#allocation60_spill] sm:$0xff] }
 0x31f   :  { %8188 = vst [vmem:[#allocation90_spill] sm:$0xff] %v7394_v43  ;;  %v7403_v15 = vmul.f32 %v4122_v17, %v8193_v6  ;;  %v7406_v45 = vmul.f32 %v8194_v14, %v4122_v17  ;;  %v8195_v46 = vld [vmem:[#allocation59_spill] sm:$0xff]  ;;  %v8197_v55 = vld [vmem:[#allocation57_spill] sm:$0xff]  ;;  %v4239_v43 = vmul.f32 %v4130_v52, %v8199_v32  ;;  %v4240_v2 = vmul.f32 %v8200_v54, %v4130_v52  ;;  %v8201_v23 = vld [vmem:[#allocation66_spill] sm:$0xff] }
 0x320   :  { %v7409_v29 = vmul.f32 %v4126_v57, %v8195_v46  ;;  %v7412_v13 = vmul.f32 %v8197_v55, %v4126_v57  ;;  %v4241_v27 = vmul.f32 %v4134_v38, %v8201_v23  ;;  %v8202_v12 = vld [vmem:[#allocation64_spill] sm:$0xff]  ;;  %v8203_v58 = vld [vmem:[#allocation70_spill] sm:$0xff]  ;;  %v8207_v55 = vld [vmem:[#allocation63_spill] sm:$0xff] }
 0x321   :  { %v4242_v59 = vmul.f32 %v8202_v12, %v4134_v38  ;;  %v7419_v6 = vmul.f32 %v4138_v3, %v8203_v58  ;;  %v8204_v18 = vld [vmem:[#allocation68_spill] sm:$0xff]  ;;  %v8205_v14 = vld [vmem:[#allocation74_spill] sm:$0xff]  ;;  %v4247_v32 = vmul.f32 %v4146_v62, %v8207_v55  ;;  %v8209_v54 = vld [vmem:[#allocation67_spill] sm:$0xff]  ;;  %v4255_v58 = vsel %vm1266_vm1, %v4191_v61, 0.0 }
 0x322   :  { %8196 = vst [vmem:[#allocation92_spill] sm:$0xff] %v7409_v29  ;;  %8198 = vst [vmem:[#allocation94_spill] sm:$0xff] %v7412_v13  ;;  %v7422_v17 = vmul.f32 %v8204_v18, %v4138_v3  ;;  %v7425_v46 = vmul.f32 %v4142_v0, %v8205_v14  ;;  %v8206_v29 = vld [vmem:[#allocation72_spill] sm:$0xff]  ;;  %v8208_v13 = vld [vmem:[#allocation61_spill] sm:$0xff]  ;;  %v4249_v23 = vmul.f32 %v4150_v25, %v8209_v54  ;;  %v4256_v12 = vsel %vm1266_vm1, %v4199_v47, 0.0 }
 0x323   :  { %v7428_v57 = vmul.f32 %v8206_v29, %v4142_v0  ;;  %v4248_v52 = vmul.f32 %v8208_v13, %v4146_v62  ;;  %v8210_v35 = vld [vmem:[#allocation65_spill] sm:$0xff]  ;;  %v8211_v3 = vld [vmem:[#allocation71_spill] sm:$0xff]  ;;  %v4257_v62 = vadd.f32 %v4256_v12, %v4255_v58  ;;  %v4258_v61 = vsel %vm1266_vm1, %v4207_v53, 0.0 }
 0x324   :  { %v4250_v38 = vmul.f32 %v8210_v35, %v4150_v25  ;;  %v7438_v18 = vmul.f32 %v7289_v16, %v8211_v3  ;;  %v8212_v14 = vld [vmem:[#allocation69_spill] sm:$0xff]  ;;  %v8213_v29 = vld [vmem:[#allocation75_spill] sm:$0xff]  ;;  %v4260_v47 = vsel %vm1266_vm1, %v4215_v51, 0.0  ;;  %v4270_v35 = vsel %vm1266_vm1, %v7296_v19, 0.0 }
 0x325   :  { %v7442_v0 = vmul.f32 %v8212_v14, %v7289_v16  ;;  %v7446_v55 = vmul.f32 %v7292_v49, %v8213_v29  ;;  %v8214_v13 = vld [vmem:[#allocation73_spill] sm:$0xff]  ;;  %v4259_v54 = vadd.f32 %v4258_v61, %v4257_v62  ;;  %v4262_v16 = vsel %vm1266_vm1, %v4223_v26, 0.0 }
 0x326   :  { %v7450_v25 = vmul.f32 %v8214_v13, %v7292_v49  ;;  %v4264_v3 = vsel %vm1266_vm1, %v4231_v39, 0.0  ;;  %v4271_v14 = vsel %vm1266_vm1, %v7318_v34, 0.0  ;;  %v4266_v58 = vsel %vm1266_vm1, %v4239_v43, 0.0 }
 0x327   :  { %v4268_v49 = vsel %vm1266_vm1, %v4247_v32, 0.0  ;;  %v4272_v12 = vadd.f32 %v4271_v14, %v4270_v35  ;;  %v4273_v53 = vsel %vm1266_vm1, %v4208_v21, 0.0  ;;  %v4261_v29 = vadd.f32 %v4260_v47, %v4259_v54 }
 0x328   :  { %v4275_v51 = vsel %vm1266_vm1, %v4216_v33, 0.0  ;;  %v4285_v19 = vsel %vm1266_vm1, %v7299_v5, 0.0  ;;  %v4286_v26 = vsel %vm1266_vm1, %v7321_v60, 0.0  ;;  %v4277_v62 = vsel %vm1266_vm1, %v4224_v50, 0.0 }
 0x329   :  { %v4274_v39 = vadd.f32 %v4273_v53, %v4272_v12  ;;  %v4279_v34 = vsel %vm1266_vm1, %v4232_v37, 0.0  ;;  %v4287_v43 = vadd.f32 %v4286_v26, %v4285_v19  ;;  %v4263_v13 = vadd.f32 %v4262_v16, %v4261_v29 }
 0x32a   :  { %v4281_v32 = vsel %vm1266_vm1, %v4240_v2, 0.0  ;;  %v4283_v21 = vsel %vm1266_vm1, %v4248_v52, 0.0  ;;  %v4288_v33 = vsel %vm1266_vm1, %v7341_v7, 0.0  ;;  %v4290_v5 = vsel %vm1266_vm1, %v7361_v40, 0.0 }
 0x32b   :  { %v4276_v61 = vadd.f32 %v4275_v51, %v4274_v39  ;;  %v4289_v47 = vadd.f32 %v4288_v33, %v4287_v43  ;;  %v4300_v60 = vsel %vm1266_vm1, %v7302_v8, 0.0  ;;  %v4265_v50 = vadd.f32 %v4264_v3, %v4263_v13 }
 0x32c   :  { %v4292_v37 = vsel %vm1266_vm1, %v4225_v1, 0.0  ;;  %v4294_v35 = vsel %vm1266_vm1, %v4233_v36, 0.0  ;;  %v4301_v2 = vsel %vm1266_vm1, %v7324_v56, 0.0  ;;  %v4296_v7 = vsel %vm1266_vm1, %v4241_v27, 0.0 }
 0x32d   :  { %v4278_v52 = vadd.f32 %v4277_v62, %v4276_v61  ;;  %v4291_v54 = vadd.f32 %v4290_v5, %v4289_v47  ;;  %v4302_v16 = vadd.f32 %v4301_v2, %v4300_v60  ;;  %v4267_v14 = vadd.f32 %v4266_v58, %v4265_v50  ;;  %v8215_v5 = vld [vmem:[#allocation87_spill] sm:$0xff] }
 0x32e   :  { %v4298_v12 = vsel %vm1266_vm1, %v4249_v23, 0.0  ;;  %v4303_v40 = vsel %vm1266_vm1, %v7344_v24, 0.0  ;;  %v4305_v8 = vsel %vm1266_vm1, %v7364_v4, 0.0  ;;  %v4315_v56 = vsel %vm1266_vm1, %v7305_v48, 0.0 }
 0x32f   :  { %v4280_v1 = vadd.f32 %v4279_v34, %v4278_v52  ;;  %v4293_v3 = vadd.f32 %v4292_v37, %v4291_v54  ;;  %v4304_v36 = vadd.f32 %v4303_v40, %v4302_v16  ;;  %v4307_v53 = vsel %vm1266_vm1, %v7382_v30, 0.0  ;;  %v8218_v52 = vld [vmem:[#allocation88_spill] sm:$0xff]  ;;  %v8219_v54 = vld [vmem:[#allocation85_spill] sm:$0xff] }
 0x330   :  { %v4309_v27 = vsel %vm1266_vm1, %v7400_v44, 0.0  ;;  %v4311_v23 = vsel %vm1266_vm1, %v4242_v59, 0.0  ;;  %v4316_v24 = vsel %vm1266_vm1, %v7327_v42, 0.0  ;;  %v4313_v4 = vsel %vm1266_vm1, %v4250_v38, 0.0 }
 0x331   :  { %v4295_v58 = vadd.f32 %v4294_v35, %v4293_v3  ;;  %v4306_v29 = vadd.f32 %v4305_v8, %v4304_v36  ;;  %v4317_v51 = vadd.f32 %v4316_v24, %v4315_v56  ;;  %v7498_v19 = vadd.f32 %v4268_v49, %v4267_v14  ;;  %v8221_v8 = vld [vmem:[#allocation92_spill] sm:$0xff] }
 0x332   :  { %v4282_v26 = vadd.f32 %v4281_v32, %v4280_v1  ;;  %v4318_v48 = vsel %vm1266_vm1, %v7347_v9, 0.0  ;;  %v4320_v30 = vsel %vm1266_vm1, %v7367_v22, 0.0  ;;  %v4322_v42 = vsel %vm1266_vm1, %v7385_v41, 0.0 }
 0x333   :  { %v4297_v44 = vadd.f32 %v4296_v7, %v4295_v58  ;;  %v4308_v39 = vadd.f32 %v4307_v53, %v4306_v29  ;;  %v4319_v59 = vadd.f32 %v4318_v48, %v4317_v51  ;;  %v4324_v62 = vsel %vm1266_vm1, %v7403_v15, 0.0  ;;  %v8223_v29 = vld [vmem:[#allocation93_spill] sm:$0xff] }
 0x334   :  { %v4326_v38 = vsel %vm1266_vm1, %v7419_v6, 0.0  ;;  %v4330_v49 = vsel %vm1266_vm1, %v7308_v28, 0.0  ;;  %v4331_v9 = vsel %vm1266_vm1, %v7330_v31, 0.0  ;;  %v4328_v43 = vsel %vm1266_vm1, %v7438_v18, 0.0 }
 0x335   :  { %v4310_v34 = vadd.f32 %v4309_v27, %v4308_v39  ;;  %v4321_v22 = vadd.f32 %v4320_v30, %v4319_v59  ;;  %v4332_v13 = vadd.f32 %v4331_v9, %v4330_v49  ;;  %v7516_v32 = vadd.f32 %v4283_v21, %v4282_v26 }
 0x336   :  { %v7518_v41 = vadd.f32 %v4298_v12, %v4297_v44  ;;  %v4333_v15 = vsel %vm1266_vm1, %v7350_v10, 0.0  ;;  %v4335_v6 = vsel %vm1266_vm1, %v7370_v11, 0.0  ;;  %v4337_v31 = vsel %vm1266_vm1, %v7388_v63, 0.0  ;;  %v8216_v63 = vld [vmem:[#allocation91_spill] sm:$0xff]  ;;  %v8220_v12 = vld [vmem:[#allocation89_spill] sm:$0xff] }
 0x337   :  { %v4323_v28 = vadd.f32 %v4322_v42, %v4321_v22  ;;  %v4334_v33 = vadd.f32 %v4333_v15, %v4332_v13  ;;  %v4345_v61 = vsel %vm1266_vm1, %v7311_v20, 0.0  ;;  %v4312_v18 = vadd.f32 %v4311_v23, %v4310_v34  ;;  %v8217_v20 = vld [vmem:[#allocation86_spill] sm:$0xff]  ;;  %v8222_v23 = vld [vmem:[#allocation84_spill] sm:$0xff] }
 0x338   :  { %v4339_v21 = vsel %vm1266_vm1, %v7406_v45, 0.0  ;;  %v4341_v47 = vsel %vm1266_vm1, %v7422_v17, 0.0  ;;  %v4346_v10 = vsel %vm1266_vm1, %v8215_v5, 0.0  ;;  %v4343_v50 = vsel %vm1266_vm1, %v7442_v0, 0.0  ;;  %v8225_v13 = vld [vmem:[#allocation94_spill] sm:$0xff] }
 0x339   :  { %v4325_v60 = vadd.f32 %v4324_v62, %v4323_v28  ;;  %v4336_v11 = vadd.f32 %v4335_v6, %v4334_v33  ;;  %v4347_v37 = vadd.f32 %v4346_v10, %v4345_v61  ;;  %v4348_v35 = vsel %vm1266_vm1, %v8216_v63, 0.0 }
 0x33a   :  { %v4350_v2 = vsel %vm1266_vm1, %v8217_v20, 0.0  ;;  %v4352_v45 = vsel %vm1266_vm1, %v8218_v52, 0.0  ;;  %v4360_v17 = vsel %vm1266_vm1, %v8219_v54, 0.0  ;;  %v4361_v40 = vsel %vm1266_vm1, %v8220_v12, 0.0 }
 0x33b   :  { %v4327_v7 = vadd.f32 %v4326_v38, %v4325_v60  ;;  %v4338_v16 = vadd.f32 %v4337_v31, %v4336_v11  ;;  %v4349_v14 = vadd.f32 %v4348_v35, %v4347_v37  ;;  %v7546_v0 = vadd.f32 %v4313_v4, %v4312_v18  ;;  %v8224_v4 = vld [vmem:[#allocation90_spill] sm:$0xff] }
 0x33c   :  { %v4354_v1 = vsel %vm1266_vm1, %v8221_v8, 0.0  ;;  %v4356_v3 = vsel %vm1266_vm1, %v7425_v46, 0.0  ;;  %v4362_v36 = vadd.f32 %v4361_v40, %v4360_v17  ;;  %v4363_v24 = vsel %vm1266_vm1, %v8222_v23, 0.0 }
 0x33d   :  { %v7552_v56 = vadd.f32 %v4328_v43, %v4327_v7  ;;  %v4340_v53 = vadd.f32 %v4339_v21, %v4338_v16  ;;  %v4351_v27 = vadd.f32 %v4350_v2, %v4349_v14  ;;  %v4365_v51 = vsel %vm1266_vm1, %v8223_v29, 0.0 }
 0x33e   :  { %v4364_v58 = vadd.f32 %v4363_v24, %v4362_v36  ;;  %v4367_v26 = vsel %vm1266_vm1, %v8224_v4, 0.0  ;;  %v4375_v48 = vmul.f32 %v7498_v19, %v7498_v19  ;;  %v4376_v44 = vmul.f32 %v7516_v32, %v7516_v32 }
 0x33f   :  { %v4342_v30 = vadd.f32 %v4341_v47, %v4340_v53  ;;  %v4353_v46 = vadd.f32 %v4352_v45, %v4351_v27  ;;  %v4377_v39 = vmul.f32 %v7518_v41, %v7518_v41  ;;  %v4378_v42 = vmul.f32 %v7546_v0, %v7546_v0 }
 0x340   :  { %v4366_v59 = vadd.f32 %v4365_v51, %v4364_v58  ;;  %v4379_v62 = vmul.f32 %v7552_v56, %v7552_v56  ;;  %v4383_v38 = vsel %vm1266_vm1, %v4375_v48, 0.0  ;;  %v4384_v34 = vsel %vm1266_vm1, %v4376_v44, 0.0 }
 0x341   :  { %v7571_v49 = vadd.f32 %v4343_v50, %v4342_v30  ;;  %v4355_v9 = vadd.f32 %v4354_v1, %v4353_v46  ;;  %v4392_v22 = vsel %vm1266_vm1, %v4377_v39, 0.0  ;;  %v4369_v15 = vsel %vm1266_vm1, %v8225_v13, 0.0 }
 0x342   :  { %v4368_v43 = vadd.f32 %v4367_v26, %v4366_v59  ;;  %v4385_v6 = vadd.f32 %v4384_v34, %v4383_v38  ;;  %v4393_v28 = vsel %vm1266_vm1, %v4378_v42, 0.0  ;;  %v4401_v18 = vsel %vm1266_vm1, %v4379_v62, 0.0 }
 0x343   :  { %v4357_v33 = vadd.f32 %v4356_v3, %v4355_v9  ;;  %v4380_v31 = vmul.f32 %v7571_v49, %v7571_v49  ;;  %v4394_v61 = vadd.f32 %v4393_v28, %v4392_v22  ;;  %v4358_v21 = vsel %vm1266_vm1, %v7446_v55, 0.0 }
 0x344   :  { %v4370_v47 = vadd.f32 %v4369_v15, %v4368_v43  ;;  %v4386_v5 = vrot.slane %v4385_v6, 4  ;;  %v4371_v60 = vsel %vm1266_vm1, %v7428_v57, 0.0  ;;  %v4373_v20 = vsel %vm1266_vm1, %v7450_v25, 0.0 }
 0x345   :  { %v7583_v10 = vadd.f32 %v4358_v21, %v4357_v33  ;;  %v4395_v11 = vrot.slane %v4394_v61, 4  ;;  %v4402_v50 = vsel %vm1266_vm1, %v4380_v31, 0.0 }
 0x346   :  { %v4372_v37 = vadd.f32 %v4371_v60, %v4370_v47  ;;  %v4387_v63 = vadd.f32 %v4386_v5, %v4385_v6  ;;  %v4403_v35 = vadd.f32 %v4402_v50, %v4401_v18 }
 0x347   :  { %v4381_v2 = vmul.f32 %v7583_v10, %v7583_v10  ;;  %v4396_v55 = vadd.f32 %v4395_v11, %v4394_v61 }
 0x348   :  { %v7592_v52 = vadd.f32 %v4373_v20, %v4372_v37  ;;  %v4388_v45 = vrot.slane %v4387_v63, 2  ;;  %v4404_v54 = vrot.slane %v4403_v35, 4 }
 0x349   :  { %v4397_v17 = vrot.slane %v4396_v55, 2  ;;  %v4410_v14 = vsel %vm1266_vm1, %v4381_v2, 0.0 }
 0x34a   :  { %v4382_v57 = vmul.f32 %v7592_v52, %v7592_v52  ;;  %v4389_v7 = vadd.f32 %v4388_v45, %v4387_v63  ;;  %v4405_v16 = vadd.f32 %v4404_v54, %v4403_v35 }
 0x34b   :  { %v4398_v12 = vadd.f32 %v4397_v17, %v4396_v55 }
 0x34c   :  { %v4390_v40 = vrot.slane %v4389_v7, 1  ;;  %v4406_v8 = vrot.slane %v4405_v16, 2  ;;  %v4411_v25 = vsel %vm1266_vm1, %v4382_v57, 0.0 }
 0x34d   :  { %v4399_v1 = vrot.slane %v4398_v12, 1  ;;  %v4412_v3 = vadd.f32 %v4411_v25, %v4410_v14 }
 0x34e   :  { %v4391_v36 = vadd.f32 %v4390_v40, %v4389_v7  ;;  %v4407_v53 = vadd.f32 %v4406_v8, %v4405_v16 }
 0x34f   :  { %v4400_v27 = vadd.f32 %v4399_v1, %v4398_v12  ;;  %v4413_v23 = vrot.slane %v4412_v3, 4 }
 0x350   :  { %v4408_v24 = vrot.slane %v4407_v53, 1  ;;  %4937 = vrsqrt.f32 %v4391_v36  ;;  %vm4425_vm2 = vcmp.eq.f32.partialorder %v4391_v36, inf  ;;  %v4428_v39 = vand.u32 2147483648, %v4391_v36 }
 0x351   :  { %v4414_v58 = vadd.f32 %v4413_v23, %v4412_v3  ;;  %4939 = vrsqrt.f32 %v4400_v27  ;;  %vm4427_vm8 = vcmp.eq.f32.partialorder %v4391_v36, 0.0  ;;  %v4419_v38 = vadd.f32 1.0, %v4391_v36 }
 0x352   :  { %v4409_v29 = vadd.f32 %v4408_v24, %v4407_v53  ;;  %vm4432_vm9 = vcmp.eq.f32.partialorder %v4400_v27, inf  ;;  %v4435_v34 = vand.u32 2147483648, %v4400_v27  ;;  %vm4434_vm10 = vcmp.eq.f32.partialorder %v4400_v27, 0.0 }
 0x353   :  { %v4415_v51 = vrot.slane %v4414_v58, 2  ;;  %v4420_v15 = vadd.f32 1.0, %v4400_v27 }
 0x354   :  { %4941 = vrsqrt.f32 %v4409_v29  ;;  %vm4439_vm11 = vcmp.eq.f32.partialorder %v4409_v29, inf  ;;  %v4442_v28 = vand.u32 2147483648, %v4409_v29  ;;  %vm4441_vm12 = vcmp.eq.f32.partialorder %v4409_v29, 0.0 }
 0x355   :  { %v4416_v4 = vadd.f32 %v4415_v51, %v4414_v58  ;;  %v4421_v21 = vadd.f32 1.0, %v4409_v29 }
 0x357   :  { %v4417_v26 = vrot.slane %v4416_v4, 1 }
 0x359   :  { %v7598_v48 = vadd.f32 %v4417_v26, %v4416_v4 }
 0x35b   :  { %4943 = vrsqrt.f32 %v7598_v48  ;;  %vm4446_vm13 = vcmp.eq.f32.partialorder %v7598_v48, inf  ;;  %v4449_v37 = vand.u32 2147483648, %v7598_v48  ;;  %vm4448_vm14 = vcmp.eq.f32.partialorder %v7598_v48, 0.0 }
 0x35c   :  { %v4422_v20 = vadd.f32 1.0, %v7598_v48 }
 0x35d   :  { %v4938_v30 = vpop.eup %4937 }
 0x35e   :  { %v4424_v46 = vmul.f32 %v4938_v30, %v4391_v36  ;;  %v4940_v44 = vpop.eup %4939 }
 0x35f   :  { %v4431_v42 = vmul.f32 %v4940_v44, %v4400_v27 }
 0x360   :  { %v4426_v59 = vsel %vm4425_vm2, %v4391_v36, %v4424_v46 }
 0x361   :  { %v4942_v62 = vpop.eup %4941  ;;  %v4429_v9 = vsel %vm4427_vm8, %v4428_v39, %v4426_v59  ;;  %v4433_v22 = vsel %vm4432_vm9, %v4400_v27, %v4431_v42 }
 0x362   :  { %v4438_v43 = vmul.f32 %v4942_v62, %v4409_v29  ;;  %v4451_v13 = vadd.f32 6e-08, %v4429_v9  ;;  %v4436_v6 = vsel %vm4434_vm10, %v4435_v34, %v4433_v22 }
 0x363   :  { %v4452_v31 = vadd.f32 6e-08, %v4436_v6 }
 0x364   :  { %v4440_v33 = vsel %vm4439_vm11, %v4409_v29, %v4438_v43  ;;  %v4455_v61 = vmul.f32 %v4451_v13, %v4419_v38 }
 0x365   :  { %v4443_v18 = vsel %vm4441_vm12, %v4442_v28, %v4440_v33  ;;  %v4456_v5 = vmul.f32 %v4452_v31, %v4420_v15 }
 0x366   :  { %v4453_v47 = vadd.f32 6e-08, %v4443_v18  ;;  %4945 = vrcp.f32 %v4455_v61 }
 0x367   :  { %4947 = vrcp.f32 %v4456_v5 }
 0x368   :  { %v4944_v60 = vpop.eup %4943  ;;  %v4457_v11 = vmul.f32 %v4453_v47, %v4421_v21 }
 0x369   :  { %v4445_v50 = vmul.f32 %v4944_v60, %v7598_v48 }
 0x36a   :  { %4949 = vrcp.f32 %v4457_v11 }
 0x36b   :  { %v4447_v63 = vsel %vm4446_vm13, %v7598_v48, %v4445_v50 }
 0x36c   :  { %v4450_v35 = vsel %vm4448_vm14, %v4449_v37, %v4447_v63 }
 0x36d   :  { %v4454_v2 = vadd.f32 6e-08, %v4450_v35 }
 0x36f   :  { %v4458_v55 = vmul.f32 %v4454_v2, %v4422_v20 }
 0x371   :  { %4951 = vrcp.f32 %v4458_v55 }
 0x373   :  { %v4946_v45 = vpop.eup %4945 }
 0x374   :  { %v4463_v54 = vmul.f32 %v4946_v45, %v4391_v36  ;;  %v4948_v17 = vpop.eup %4947 }
 0x375   :  { %v4464_v57 = vmul.f32 %v4948_v17, %v4400_v27 }
 0x376   :  { %v4467_v7 = vmul.f32 %v4463_v54, %v7498_v19  ;;  %v4468_v16 = vmul.f32 %v4463_v54, %v7516_v32 }
 0x377   :  { %v4950_v14 = vpop.eup %4949  ;;  %v4469_v40 = vmul.f32 %v4464_v57, %v7518_v41  ;;  %v4470_v8 = vmul.f32 %v4464_v57, %v7546_v0 }
 0x378   :  { %v4465_v12 = vmul.f32 %v4950_v14, %v4409_v29  ;;  %4475 = vst.msk [vmem:[%s7651_s3] sm:$0xff] %vm1266_vm1, %v4467_v7  ;;  %4476 = vst.msk [vmem:[%s7651_s3 + $0x8] sm:$0xff] %vm1266_vm1, %v4468_v16 }
 0x379   :  { %4477 = vst.msk [vmem:[%s7651_s3 + $0x10] sm:$0xff] %vm1266_vm1, %v4469_v40  ;;  %4478 = vst.msk [vmem:[%s7651_s3 + $0x18] sm:$0xff] %vm1266_vm1, %v4470_v8 }
 0x37a   :  { %v4471_v19 = vmul.f32 %v4465_v12, %v7552_v56  ;;  %v4472_v32 = vmul.f32 %v4465_v12, %v7571_v49 }
 0x37c   :  { %4479 = vst.msk [vmem:[%s7651_s3 + $0x20] sm:$0xff] %vm1266_vm1, %v4471_v19  ;;  %4480 = vst.msk [vmem:[%s7651_s3 + $0x28] sm:$0xff] %vm1266_vm1, %v4472_v32 }
 0x37e   :  { %v4952_v41 = vpop.eup %4951 }
 0x37f   :  { %v4466_v0 = vmul.f32 %v4952_v41, %v7598_v48 }
 0x381   :  { %v4473_v56 = vmul.f32 %v4466_v0, %v7583_v10  ;;  %v4474_v49 = vmul.f32 %v4466_v0, %v7592_v52 }
 0x383   :  { %4481 = vst.msk [vmem:[%s7651_s3 + $0x30] sm:$0xff] %vm1266_vm1, %v4473_v56  ;;  %4482 = vst.msk [vmem:[%s7651_s3 + $0x38] sm:$0xff] %vm1266_vm1, %v4474_v49 }

</bundles_post_ra>
